<compile_context>
chip_gen: v7x
topology: tpu7x:2x2x1
jax: 0.10.0
libtpu: 0.0.40
codegen_flags: <defaults>
</compile_context>

<pallas_src>
import numpy as np

import jax
import jax.numpy as jnp
from jax.experimental import pallas as pl
from jax.experimental.pallas import tpu as pltpu

# ----------------------- model hyper-parameters (small) -----------------------
IN_CH = 3      # image channels
IMG = 16       # spatial size (H = W)
C = 16         # base channel width
LATENT = 8     # latent_dim
FEAT_HW = IMG // 4                      # 4
FEAT_DIM = 2 * C * FEAT_HW * FEAT_HW    # 512  (flattened encoder feature)
LANE = 128                              # every conv activation row = one 128-lane vreg row


# --------------------- host-side conv -> block-matrix prep --------------------
def _bd_from_conv(w, W, stride, k_pad=None, n_pad=None):
    """w: (3,3,Cin,Cout).  Returns (3, K, N) row-tap matrices for a 3x3 /
    pad-1 / `stride` conv over an (H, W, Cin) NHWC input stored row-wise as
    (H, W*Cin).  K/N optionally zero-padded to a lane-dense width."""
    cin, cout = w.shape[2], w.shape[3]
    Wo = (W - 1) // stride + 1
    K = k_pad if k_pad is not None else W * cin
    N = n_pad if n_pad is not None else Wo * cout
    B = np.zeros((3, K, N), np.float32)
    for di in range(3):
        for wo in range(Wo):
            for dj in range(3):
                wi = stride * wo + dj - 1
                if 0 <= wi < W:
                    B[di, wi * cin:(wi + 1) * cin, wo * cout:(wo + 1) * cout] = w[di, dj]
    return B


def _bd_from_conv_up(w, W, n_pad=None):
    """Same, with a 2x nearest-neighbour W-upsample folded into the weights:
    the conv consumes the (2H, 2W) upsampled input while reading the
    original-width rows.  Returns (3, W*Cin, N)."""
    cin, cout = w.shape[2], w.shape[3]
    Wo = 2 * W
    N = n_pad if n_pad is not None else Wo * cout
    B = np.zeros((3, W * cin, N), np.float32)
    for di in range(3):
        for wo in range(Wo):
            for dj in range(3):
                u = wo + dj                     # padded upsampled column index
                if 1 <= u <= 2 * W:
                    wi = (u - 1) // 2           # original column feeding it
                    B[di, wi * cin:(wi + 1) * cin, wo * cout:(wo + 1) * cout] += w[di, dj]
    return B


def _bias_row(n):
    return np.zeros((1, n), np.float32)


def init_params(key):
    ks = iter(jax.random.split(key, 32))

    def conv(cin, cout):
        return np.asarray(jax.random.normal(next(ks), (3, 3, cin, cout), jnp.float32)
                          * np.sqrt(2.0 / (9 * cin)))

    def dense(shape, fan_in):
        return np.asarray(jax.random.normal(next(ks), shape, jnp.float32)
                          * np.sqrt(2.0 / fan_in))

    weights = [
        # ----- encoder -----
        _bd_from_conv(conv(IN_CH, C), IMG, 2, k_pad=LANE), _bias_row(LANE),   # e_conv1 (16->8)
        _bd_from_conv(conv(C, C), 8, 1),                   _bias_row(LANE),   # e_rb1 conv1
        _bd_from_conv(conv(C, C), 8, 1),                   _bias_row(LANE),   # e_rb1 conv2
        _bd_from_conv(conv(C, 2 * C), 8, 2),               _bias_row(LANE),   # e_conv2 (8->4)
        _bd_from_conv(conv(2 * C, 2 * C), 4, 1),           _bias_row(LANE),   # e_rb2 conv1
        _bd_from_conv(conv(2 * C, 2 * C), 4, 1),           _bias_row(LANE),   # e_rb2 conv2
        dense((FEAT_HW, 2 * C * FEAT_HW, 2 * LATENT), FEAT_DIM),              # fc mean||logvar
        np.zeros((1, 2 * LATENT), np.float32),
        # ----- decoder -----
        dense((FEAT_HW, LATENT, 2 * C * FEAT_HW), LATENT),                    # d_fc
        np.zeros((FEAT_HW, 2 * C * FEAT_HW), np.float32),
        _bd_from_conv(conv(2 * C, 2 * C), 4, 1),           _bias_row(LANE),   # d_rb1 conv1
        _bd_from_conv(conv(2 * C, 2 * C), 4, 1),           _bias_row(LANE),   # d_rb1 conv2
        _bd_from_conv_up(conv(2 * C, C), 4),               _bias_row(LANE),   # d_conv1 (+2x up)
        _bd_from_conv(conv(C, C), 8, 1),                   _bias_row(LANE),   # d_rb2 conv1
        _bd_from_conv(conv(C, C), 8, 1),                   _bias_row(LANE),   # d_rb2 conv2
        _bd_from_conv_up(conv(C, IN_CH), 8, n_pad=LANE),   _bias_row(LANE),   # d_conv2 (+2x up)
    ]
    return [jnp.asarray(w) for w in weights]


# ------------------------------ in-kernel helpers ------------------------------
def _conv_bd(pad, act, w_ref, b_ref, H, stride=1):
    """3x3 / pad-1 conv.  act: (H, 128) value.  Returns pre-activation
    (Ho, 128) accumulated over 3 row-tap matmuls.  The top halo row (row 0 of
    `pad`) is zeroed once per kernel invocation by the caller."""
    Ho = (H - 1) // stride + 1
    pad[1:H + 1, 0:LANE] = act
    pad[H + 1:H + 2, 0:LANE] = jnp.zeros((1, LANE), jnp.float32)
    acc = None
    for di in range(3):
        rows = pl.ds(di, Ho, stride=stride) if stride > 1 else pl.ds(di, Ho)
        t = jnp.dot(pad[rows, pl.ds(0, LANE)], w_ref[di],
                    preferred_element_type=jnp.float32)
        acc = t if acc is None else acc + t
    return acc + b_ref[...]


def _conv_bd_up(pad, act, w_ref, b_ref, H):
    """2x nearest-neighbour upsample folded into a 3x3 / pad-1 / stride-1 conv.
    act: (H, 128).  Returns (2H, 128) pre-activation (W-upsample is folded into
    the weights, H-upsample is done by row duplication in the scratch)."""
    Ho = 2 * H
    for i in range(H):                       # row duplication (upsample along H)
        row = act[i:i + 1, :]
        pad[1 + 2 * i:2 + 2 * i, 0:LANE] = row
        pad[2 + 2 * i:3 + 2 * i, 0:LANE] = row
    pad[Ho + 1:Ho + 2, 0:LANE] = jnp.zeros((1, LANE), jnp.float32)
    acc = None
    for di in range(3):
        t = jnp.dot(pad[pl.ds(di, Ho), pl.ds(0, LANE)], w_ref[di],
                    preferred_element_type=jnp.float32)
        acc = t if acc is None else acc + t
    return acc + b_ref[...]


def _resblock(pad, x, w1, b1, w2, b2, H):
    h = jnp.maximum(_conv_bd(pad, x, w1, b1, H), 0.0)
    y = _conv_bd(pad, h, w2, b2, H)
    return jnp.maximum(y + x, 0.0)


# --------------------------------- fused kernel --------------------------------
def _vae_kernel(x_ref, eps_ref, *refs):
    (ec1_w, ec1_b, er11_w, er11_b, er12_w, er12_b,
     ec2_w, ec2_b, er21_w, er21_b, er22_w, er22_b,
     wmlv, bmlv, wdfc, bdfc,
     dr11_w, dr11_b, dr12_w, dr12_b,
     dc1_w, dc1_b, dr21_w, dr21_b, dr22_w, dr22_b,
     dc2_w, dc2_b,
     o_img, o_mlv, pad) = refs

    # Top halo row of the shared padded-row scratch: zero once per sample.
    pad[0:1, 0:LANE] = jnp.zeros((1, LANE), jnp.float32)

    # ---------------- ResnetEnc ----------------
    x = x_ref[...]                                                            # (16, 128)
    a = jnp.maximum(_conv_bd(pad, x, ec1_w, ec1_b, IMG, stride=2), 0.0)       # (8, 128)
    a = _resblock(pad, a, er11_w, er11_b, er12_w, er12_b, 8)
    a = jnp.maximum(_conv_bd(pad, a, ec2_w, ec2_b, 8, stride=2), 0.0)         # (4, 128)
    feat = _resblock(pad, a, er21_w, er21_b, er22_w, er22_b, 4)               # (4, 128)

    # fused fc_mean || fc_logvar  (feat rows contracted against per-row blocks)
    mlv = bmlv[...]                                                           # (1, 16)
    for h in range(FEAT_HW):
        mlv = mlv + jnp.dot(feat[h:h + 1, :], wmlv[h],
                            preferred_element_type=jnp.float32)
    o_mlv[...] = mlv

    # reparameterize (eps supplied from outside)
    mean = mlv[:, 0:LATENT]
    logvar = mlv[:, LATENT:2 * LATENT]
    z = mean + jnp.exp(0.5 * logvar) * eps_ref[...]                           # (1, 8)

    # ---------------- ResnetDec ----------------
    # d_fc: z -> (4,4,32) feature, written row-wise into the shared scratch
    for h in range(FEAT_HW):
        row = jnp.dot(z, wdfc[h], preferred_element_type=jnp.float32) + bdfc[h:h + 1, :]
        pad[1 + h:2 + h, 0:LANE] = jnp.maximum(row, 0.0)
    d = pad[pl.ds(1, FEAT_HW), pl.ds(0, LANE)]                                # (4, 128)

    d = _resblock(pad, d, dr11_w, dr11_b, dr12_w, dr12_b, 4)
    d = jnp.maximum(_conv_bd_up(pad, d, dc1_w, dc1_b, 4), 0.0)                # (8, 128)  (up 4->8)
    d = _resblock(pad, d, dr21_w, dr21_b, dr22_w, dr22_b, 8)
    img = jax.nn.sigmoid(_conv_bd_up(pad, d, dc2_w, dc2_b, 8))                # (16, 128) (up 8->16)
    o_img[...] = img                                                          # lane-dense store


# ------------------------------ CameraVAE forward ------------------------------
def camera_vae_forward(params, x_nchw, eps):
    """x_nchw: (B, 3, 16, 16) float32; eps: (B, LATENT) standard-normal noise.
    Returns (img, mean, logvar) with img in NCHW, matching the PyTorch module."""
    Bsz = x_nchw.shape[0]
    x = jnp.transpose(x_nchw, (0, 2, 3, 1)).reshape(Bsz, IMG, IMG * IN_CH)    # NHWC rows
    x = jnp.pad(x, ((0, 0), (0, 0), (0, LANE - IMG * IN_CH)))                 # (B, 16, 128) lane-dense
    eps3 = eps.reshape(Bsz, 1, LATENT)

    def full(shape):
        nd = len(shape)
        return pl.BlockSpec(shape, lambda b, _nd=nd: (0,) * _nd)

    in_specs = [
        pl.BlockSpec((None, IMG, LANE), lambda b: (b, 0, 0)),          # x (per-sample)
        pl.BlockSpec((None, 1, LATENT), lambda b: (b, 0, 0)),          # eps (per-sample)
    ] + [full(tuple(w.shape)) for w in params]                         # weights (VMEM-resident)

    out_specs = [
        pl.BlockSpec((None, IMG, LANE), lambda b: (b, 0, 0)),          # reconstruction (padded)
        pl.BlockSpec((None, 1, 2 * LATENT), lambda b: (b, 0, 0)),      # mean || logvar
    ]
    out_shape = [
        jax.ShapeDtypeStruct((Bsz, IMG, LANE), jnp.float32),
        jax.ShapeDtypeStruct((Bsz, 1, 2 * LATENT), jnp.float32),
    ]

    img_pad, mlv = pl.pallas_call(
        _vae_kernel,
        grid=(Bsz,),
        in_specs=in_specs,
        out_specs=out_specs,
        out_shape=out_shape,
        scratch_shapes=[pltpu.VMEM((IMG + 2, LANE), jnp.float32)],     # shared padded-row buffer
        compiler_params=pltpu.CompilerParams(
            dimension_semantics=("parallel",)),                        # batch across TCs (v7x)
    )(x, eps3, *params)

    img = (img_pad[:, :, :IMG * IN_CH]
           .reshape(Bsz, IMG, IMG, IN_CH).transpose(0, 3, 1, 2))       # NHWC -> NCHW
    mean = mlv[:, 0, :LATENT]
    logvar = mlv[:, 0, LATENT:]
    return img, mean, logvar


# ------------------------------------ main --------------------------------------
if __name__ == "__main__":
    key = jax.random.PRNGKey(0)
    k_param, k_x, k_eps = jax.random.split(key, 3)

    params = init_params(k_param)
    x = jax.random.normal(k_x, (2, IN_CH, IMG, IMG), jnp.float32)
    # TODO(synk): torch.randn_like in the encoder's reparameterization has no
    # in-kernel equivalent with matching semantics; the noise is sampled outside
    # and passed in as `eps` (could be moved in-kernel with pltpu.prng_*).
    eps = jax.random.normal(k_eps, (2, LATENT), jnp.float32)

    fwd = jax.jit(camera_vae_forward)
    img, mean, logvar = fwd(params, x, eps)
    jax.block_until_ready((img, mean, logvar))

    assert img.shape == x.shape, img.shape
    assert mean.shape == (2, LATENT) and logvar.shape == (2, LATENT)
    assert jnp.all(jnp.isfinite(img)) and jnp.all(jnp.isfinite(mean)) and jnp.all(jnp.isfinite(logvar))
    print("KERNEL_OK")
</pallas_src>

<mosaic_0001>
module attributes {stable_mosaic.version = 11 : i64} {
  func.func @_vae_kernel(%arg0: i32, %arg1: memref<1x16x128xf32, #tpu.memory_space<vmem>>, %arg2: memref<1x1x8xf32, #tpu.memory_space<vmem>>, %arg3: memref<3x128x128xf32, #tpu.memory_space<vmem>>, %arg4: memref<1x128xf32, #tpu.memory_space<vmem>>, %arg5: memref<3x128x128xf32, #tpu.memory_space<vmem>>, %arg6: memref<1x128xf32, #tpu.memory_space<vmem>>, %arg7: memref<3x128x128xf32, #tpu.memory_space<vmem>>, %arg8: memref<1x128xf32, #tpu.memory_space<vmem>>, %arg9: memref<3x128x128xf32, #tpu.memory_space<vmem>>, %arg10: memref<1x128xf32, #tpu.memory_space<vmem>>, %arg11: memref<3x128x128xf32, #tpu.memory_space<vmem>>, %arg12: memref<1x128xf32, #tpu.memory_space<vmem>>, %arg13: memref<3x128x128xf32, #tpu.memory_space<vmem>>, %arg14: memref<1x128xf32, #tpu.memory_space<vmem>>, %arg15: memref<4x128x16xf32, #tpu.memory_space<vmem>>, %arg16: memref<1x16xf32, #tpu.memory_space<vmem>>, %arg17: memref<4x8x128xf32, #tpu.memory_space<vmem>>, %arg18: memref<4x128xf32, #tpu.memory_space<vmem>>, %arg19: memref<3x128x128xf32, #tpu.memory_space<vmem>>, %arg20: memref<1x128xf32, #tpu.memory_space<vmem>>, %arg21: memref<3x128x128xf32, #tpu.memory_space<vmem>>, %arg22: memref<1x128xf32, #tpu.memory_space<vmem>>, %arg23: memref<3x128x128xf32, #tpu.memory_space<vmem>>, %arg24: memref<1x128xf32, #tpu.memory_space<vmem>>, %arg25: memref<3x128x128xf32, #tpu.memory_space<vmem>>, %arg26: memref<1x128xf32, #tpu.memory_space<vmem>>, %arg27: memref<3x128x128xf32, #tpu.memory_space<vmem>>, %arg28: memref<1x128xf32, #tpu.memory_space<vmem>>, %arg29: memref<3x128x128xf32, #tpu.memory_space<vmem>>, %arg30: memref<1x128xf32, #tpu.memory_space<vmem>>, %arg31: memref<1x16x128xf32, #tpu.memory_space<vmem>>, %arg32: memref<1x1x16xf32, #tpu.memory_space<vmem>>, %arg33: memref<18x128xf32, #tpu.memory_space<vmem>>) attributes {dimension_semantics = [#tpu.dimension_semantics<parallel>], iteration_bounds = array<i64: 2>, scalar_prefetch = 0 : i64, scratch_operands = 1 : i64, tpu.core_type = #tpu.core_type<tc>, window_params = [{transform_indices = @transform_0, window_bounds = array<i64: 1, 16, 128>}, {transform_indices = @transform_1, window_bounds = array<i64: 1, 1, 8>}, {pipeline_mode = #tpu.pipeline_mode<synchronous>, transform_indices = @transform_2, window_bounds = array<i64: 3, 128, 128>}, {pipeline_mode = #tpu.pipeline_mode<synchronous>, transform_indices = @transform_3, window_bounds = array<i64: 1, 128>}, {pipeline_mode = #tpu.pipeline_mode<synchronous>, transform_indices = @transform_4, window_bounds = array<i64: 3, 128, 128>}, {pipeline_mode = #tpu.pipeline_mode<synchronous>, transform_indices = @transform_5, window_bounds = array<i64: 1, 128>}, {pipeline_mode = #tpu.pipeline_mode<synchronous>, transform_indices = @transform_6, window_bounds = array<i64: 3, 128, 128>}, {pipeline_mode = #tpu.pipeline_mode<synchronous>, transform_indices = @transform_7, window_bounds = array<i64: 1, 128>}, {pipeline_mode = #tpu.pipeline_mode<synchronous>, transform_indices = @transform_8, window_bounds = array<i64: 3, 128, 128>}, {pipeline_mode = #tpu.pipeline_mode<synchronous>, transform_indices = @transform_9, window_bounds = array<i64: 1, 128>}, {pipeline_mode = #tpu.pipeline_mode<synchronous>, transform_indices = @transform_10, window_bounds = array<i64: 3, 128, 128>}, {pipeline_mode = #tpu.pipeline_mode<synchronous>, transform_indices = @transform_11, window_bounds = array<i64: 1, 128>}, {pipeline_mode = #tpu.pipeline_mode<synchronous>, transform_indices = @transform_12, window_bounds = array<i64: 3, 128, 128>}, {pipeline_mode = #tpu.pipeline_mode<synchronous>, transform_indices = @transform_13, window_bounds = array<i64: 1, 128>}, {pipeline_mode = #tpu.pipeline_mode<synchronous>, transform_indices = @transform_14, window_bounds = array<i64: 4, 128, 16>}, {pipeline_mode = #tpu.pipeline_mode<synchronous>, transform_indices = @transform_15, window_bounds = array<i64: 1, 16>}, {pipeline_mode = #tpu.pipeline_mode<synchronous>, transform_indices = @transform_16, window_bounds = array<i64: 4, 8, 128>}, {pipeline_mode = #tpu.pipeline_mode<synchronous>, transform_indices = @transform_17, window_bounds = array<i64: 4, 128>}, {pipeline_mode = #tpu.pipeline_mode<synchronous>, transform_indices = @transform_18, window_bounds = array<i64: 3, 128, 128>}, {pipeline_mode = #tpu.pipeline_mode<synchronous>, transform_indices = @transform_19, window_bounds = array<i64: 1, 128>}, {pipeline_mode = #tpu.pipeline_mode<synchronous>, transform_indices = @transform_20, window_bounds = array<i64: 3, 128, 128>}, {pipeline_mode = #tpu.pipeline_mode<synchronous>, transform_indices = @transform_21, window_bounds = array<i64: 1, 128>}, {pipeline_mode = #tpu.pipeline_mode<synchronous>, transform_indices = @transform_22, window_bounds = array<i64: 3, 128, 128>}, {pipeline_mode = #tpu.pipeline_mode<synchronous>, transform_indices = @transform_23, window_bounds = array<i64: 1, 128>}, {pipeline_mode = #tpu.pipeline_mode<synchronous>, transform_indices = @transform_24, window_bounds = array<i64: 3, 128, 128>}, {pipeline_mode = #tpu.pipeline_mode<synchronous>, transform_indices = @transform_25, window_bounds = array<i64: 1, 128>}, {pipeline_mode = #tpu.pipeline_mode<synchronous>, transform_indices = @transform_26, window_bounds = array<i64: 3, 128, 128>}, {pipeline_mode = #tpu.pipeline_mode<synchronous>, transform_indices = @transform_27, window_bounds = array<i64: 1, 128>}, {pipeline_mode = #tpu.pipeline_mode<synchronous>, transform_indices = @transform_28, window_bounds = array<i64: 3, 128, 128>}, {pipeline_mode = #tpu.pipeline_mode<synchronous>, transform_indices = @transform_29, window_bounds = array<i64: 1, 128>}, {transform_indices = @transform_30, window_bounds = array<i64: 1, 16, 128>}, {transform_indices = @transform_31, window_bounds = array<i64: 1, 1, 16>}]} {
    %cst = arith.constant 0.000000e+00 : f32
    %0 = vector.broadcast %cst : f32 to vector<1x128xf32>
    %c0 = arith.constant 0 : index
    %c0_0 = arith.constant 0 : index
    %1 = vector.load %arg33[%c0, %c0_0] : memref<18x128xf32, #tpu.memory_space<vmem>>, vector<1x128xf32>
    tpu.vector_store %arg33[%c0, %c0_0], %0 {strides = array<i32>} : memref<18x128xf32, #tpu.memory_space<vmem>>, vector<1x128xf32>,
    %c0_1 = arith.constant 0 : index
    %c0_2 = arith.constant 0 : index
    %c0_3 = arith.constant 0 : index
    %2 = vector.load %arg1[%c0_1, %c0_2, %c0_3] : memref<1x16x128xf32, #tpu.memory_space<vmem>>, vector<1x16x128xf32>
    %3 = vector.shape_cast %2 : vector<1x16x128xf32> to vector<16x128xf32>
    %c1 = arith.constant 1 : index
    %c0_4 = arith.constant 0 : index
    %4 = vector.load %arg33[%c1, %c0_4] : memref<18x128xf32, #tpu.memory_space<vmem>>, vector<16x128xf32>
    tpu.vector_store %arg33[%c1, %c0_4], %3 {strides = array<i32>} : memref<18x128xf32, #tpu.memory_space<vmem>>, vector<16x128xf32>,
    %cst_5 = arith.constant 0.000000e+00 : f32
    %5 = vector.broadcast %cst_5 : f32 to vector<1x128xf32>
    %c17 = arith.constant 17 : index
    %c0_6 = arith.constant 0 : index
    %6 = vector.load %arg33[%c17, %c0_6] : memref<18x128xf32, #tpu.memory_space<vmem>>, vector<1x128xf32>
    tpu.vector_store %arg33[%c17, %c0_6], %5 {strides = array<i32>} : memref<18x128xf32, #tpu.memory_space<vmem>>, vector<1x128xf32>,
    %c0_7 = arith.constant 0 : index
    %c0_8 = arith.constant 0 : index
    %7 = tpu.strided_load %arg33[%c0_7, %c0_8] {strides = array<i32: 2, 1>} : memref<18x128xf32, #tpu.memory_space<vmem>>, vector<8x128xf32>
    %c0_9 = arith.constant 0 : index
    %c0_10 = arith.constant 0 : index
    %c0_11 = arith.constant 0 : index
    %8 = vector.load %arg3[%c0_9, %c0_10, %c0_11] : memref<3x128x128xf32, #tpu.memory_space<vmem>>, vector<1x128x128xf32>
    %9 = vector.shape_cast %8 : vector<1x128x128xf32> to vector<128x128xf32>
    %cst_12 = arith.constant dense<0.000000e+00> : vector<8x128xf32>
    %10 = tpu.matmul %7, %9, %cst_12 {dimension_numbers = #tpu.dot_dimension_numbers<[1], [0], [0], [1], [0, 0, 1, 1], [], []>} : vector<8x128xf32>, vector<128x128xf32>, vector<8x128xf32> -> vector<8x128xf32>
    %c1_13 = arith.constant 1 : index
    %c0_14 = arith.constant 0 : index
    %11 = tpu.strided_load %arg33[%c1_13, %c0_14] {strides = array<i32: 2, 1>} : memref<18x128xf32, #tpu.memory_space<vmem>>, vector<8x128xf32>
    %c1_15 = arith.constant 1 : index
    %c0_16 = arith.constant 0 : index
    %c0_17 = arith.constant 0 : index
    %12 = vector.load %arg3[%c1_15, %c0_16, %c0_17] : memref<3x128x128xf32, #tpu.memory_space<vmem>>, vector<1x128x128xf32>
    %13 = vector.shape_cast %12 : vector<1x128x128xf32> to vector<128x128xf32>
    %cst_18 = arith.constant dense<0.000000e+00> : vector<8x128xf32>
    %14 = tpu.matmul %11, %13, %cst_18 {dimension_numbers = #tpu.dot_dimension_numbers<[1], [0], [0], [1], [0, 0, 1, 1], [], []>} : vector<8x128xf32>, vector<128x128xf32>, vector<8x128xf32> -> vector<8x128xf32>
    %15 = arith.addf %10, %14 : vector<8x128xf32>
    %c2 = arith.constant 2 : index
    %c0_19 = arith.constant 0 : index
    %16 = tpu.strided_load %arg33[%c2, %c0_19] {strides = array<i32: 2, 1>} : memref<18x128xf32, #tpu.memory_space<vmem>>, vector<8x128xf32>
    %c2_20 = arith.constant 2 : index
    %c0_21 = arith.constant 0 : index
    %c0_22 = arith.constant 0 : index
    %17 = vector.load %arg3[%c2_20, %c0_21, %c0_22] : memref<3x128x128xf32, #tpu.memory_space<vmem>>, vector<1x128x128xf32>
    %18 = vector.shape_cast %17 : vector<1x128x128xf32> to vector<128x128xf32>
    %cst_23 = arith.constant dense<0.000000e+00> : vector<8x128xf32>
    %19 = tpu.matmul %16, %18, %cst_23 {dimension_numbers = #tpu.dot_dimension_numbers<[1], [0], [0], [1], [0, 0, 1, 1], [], []>} : vector<8x128xf32>, vector<128x128xf32>, vector<8x128xf32> -> vector<8x128xf32>
    %20 = arith.addf %15, %19 : vector<8x128xf32>
    %c0_24 = arith.constant 0 : index
    %c0_25 = arith.constant 0 : index
    %21 = vector.load %arg4[%c0_24, %c0_25] : memref<1x128xf32, #tpu.memory_space<vmem>>, vector<1x128xf32>
    %22 = vector.broadcast %21 : vector<1x128xf32> to vector<8x128xf32>
    %23 = arith.addf %20, %22 : vector<8x128xf32>
    %cst_26 = arith.constant 0.000000e+00 : f32
    %24 = vector.broadcast %cst_26 : f32 to vector<8x128xf32>
    %25 = arith.maximumf %23, %24 : vector<8x128xf32>
    %c1_27 = arith.constant 1 : index
    %c0_28 = arith.constant 0 : index
    %26 = vector.load %arg33[%c1_27, %c0_28] : memref<18x128xf32, #tpu.memory_space<vmem>>, vector<8x128xf32>
    tpu.vector_store %arg33[%c1_27, %c0_28], %25 {strides = array<i32>} : memref<18x128xf32, #tpu.memory_space<vmem>>, vector<8x128xf32>,
    %cst_29 = arith.constant 0.000000e+00 : f32
    %27 = vector.broadcast %cst_29 : f32 to vector<1x128xf32>
    %c9 = arith.constant 9 : index
    %c0_30 = arith.constant 0 : index
    %28 = vector.load %arg33[%c9, %c0_30] : memref<18x128xf32, #tpu.memory_space<vmem>>, vector<1x128xf32>
    tpu.vector_store %arg33[%c9, %c0_30], %27 {strides = array<i32>} : memref<18x128xf32, #tpu.memory_space<vmem>>, vector<1x128xf32>,
    %c0_31 = arith.constant 0 : index
    %c0_32 = arith.constant 0 : index
    %29 = vector.load %arg33[%c0_31, %c0_32] : memref<18x128xf32, #tpu.memory_space<vmem>>, vector<8x128xf32>
    %c0_33 = arith.constant 0 : index
    %c0_34 = arith.constant 0 : index
    %c0_35 = arith.constant 0 : index
    %30 = vector.load %arg5[%c0_33, %c0_34, %c0_35] : memref<3x128x128xf32, #tpu.memory_space<vmem>>, vector<1x128x128xf32>
    %31 = vector.shape_cast %30 : vector<1x128x128xf32> to vector<128x128xf32>
    %cst_36 = arith.constant dense<0.000000e+00> : vector<8x128xf32>
    %32 = tpu.matmul %29, %31, %cst_36 {dimension_numbers = #tpu.dot_dimension_numbers<[1], [0], [0], [1], [0, 0, 1, 1], [], []>} : vector<8x128xf32>, vector<128x128xf32>, vector<8x128xf32> -> vector<8x128xf32>
    %c1_37 = arith.constant 1 : index
    %c0_38 = arith.constant 0 : index
    %33 = vector.load %arg33[%c1_37, %c0_38] : memref<18x128xf32, #tpu.memory_space<vmem>>, vector<8x128xf32>
    %c1_39 = arith.constant 1 : index
    %c0_40 = arith.constant 0 : index
    %c0_41 = arith.constant 0 : index
    %34 = vector.load %arg5[%c1_39, %c0_40, %c0_41] : memref<3x128x128xf32, #tpu.memory_space<vmem>>, vector<1x128x128xf32>
    %35 = vector.shape_cast %34 : vector<1x128x128xf32> to vector<128x128xf32>
    %cst_42 = arith.constant dense<0.000000e+00> : vector<8x128xf32>
    %36 = tpu.matmul %33, %35, %cst_42 {dimension_numbers = #tpu.dot_dimension_numbers<[1], [0], [0], [1], [0, 0, 1, 1], [], []>} : vector<8x128xf32>, vector<128x128xf32>, vector<8x128xf32> -> vector<8x128xf32>
    %37 = arith.addf %32, %36 : vector<8x128xf32>
    %c2_43 = arith.constant 2 : index
    %c0_44 = arith.constant 0 : index
    %38 = vector.load %arg33[%c2_43, %c0_44] : memref<18x128xf32, #tpu.memory_space<vmem>>, vector<8x128xf32>
    %c2_45 = arith.constant 2 : index
    %c0_46 = arith.constant 0 : index
    %c0_47 = arith.constant 0 : index
    %39 = vector.load %arg5[%c2_45, %c0_46, %c0_47] : memref<3x128x128xf32, #tpu.memory_space<vmem>>, vector<1x128x128xf32>
    %40 = vector.shape_cast %39 : vector<1x128x128xf32> to vector<128x128xf32>
    %cst_48 = arith.constant dense<0.000000e+00> : vector<8x128xf32>
    %41 = tpu.matmul %38, %40, %cst_48 {dimension_numbers = #tpu.dot_dimension_numbers<[1], [0], [0], [1], [0, 0, 1, 1], [], []>} : vector<8x128xf32>, vector<128x128xf32>, vector<8x128xf32> -> vector<8x128xf32>
    %42 = arith.addf %37, %41 : vector<8x128xf32>
    %c0_49 = arith.constant 0 : index
    %c0_50 = arith.constant 0 : index
    %43 = vector.load %arg6[%c0_49, %c0_50] : memref<1x128xf32, #tpu.memory_space<vmem>>, vector<1x128xf32>
    %44 = vector.broadcast %43 : vector<1x128xf32> to vector<8x128xf32>
    %45 = arith.addf %42, %44 : vector<8x128xf32>
    %cst_51 = arith.constant 0.000000e+00 : f32
    %46 = vector.broadcast %cst_51 : f32 to vector<8x128xf32>
    %47 = arith.maximumf %45, %46 : vector<8x128xf32>
    %c1_52 = arith.constant 1 : index
    %c0_53 = arith.constant 0 : index
    %48 = vector.load %arg33[%c1_52, %c0_53] : memref<18x128xf32, #tpu.memory_space<vmem>>, vector<8x128xf32>
    tpu.vector_store %arg33[%c1_52, %c0_53], %47 {strides = array<i32>} : memref<18x128xf32, #tpu.memory_space<vmem>>, vector<8x128xf32>,
    %cst_54 = arith.constant 0.000000e+00 : f32
    %49 = vector.broadcast %cst_54 : f32 to vector<1x128xf32>
    %c9_55 = arith.constant 9 : index
    %c0_56 = arith.constant 0 : index
    %50 = vector.load %arg33[%c9_55, %c0_56] : memref<18x128xf32, #tpu.memory_space<vmem>>, vector<1x128xf32>
    tpu.vector_store %arg33[%c9_55, %c0_56], %49 {strides = array<i32>} : memref<18x128xf32, #tpu.memory_space<vmem>>, vector<1x128xf32>,
    %c0_57 = arith.constant 0 : index
    %c0_58 = arith.constant 0 : index
    %51 = vector.load %arg33[%c0_57, %c0_58] : memref<18x128xf32, #tpu.memory_space<vmem>>, vector<8x128xf32>
    %c0_59 = arith.constant 0 : index
    %c0_60 = arith.constant 0 : index
    %c0_61 = arith.constant 0 : index
    %52 = vector.load %arg7[%c0_59, %c0_60, %c0_61] : memref<3x128x128xf32, #tpu.memory_space<vmem>>, vector<1x128x128xf32>
    %53 = vector.shape_cast %52 : vector<1x128x128xf32> to vector<128x128xf32>
    %cst_62 = arith.constant dense<0.000000e+00> : vector<8x128xf32>
    %54 = tpu.matmul %51, %53, %cst_62 {dimension_numbers = #tpu.dot_dimension_numbers<[1], [0], [0], [1], [0, 0, 1, 1], [], []>} : vector<8x128xf32>, vector<128x128xf32>, vector<8x128xf32> -> vector<8x128xf32>
    %c1_63 = arith.constant 1 : index
    %c0_64 = arith.constant 0 : index
    %55 = vector.load %arg33[%c1_63, %c0_64] : memref<18x128xf32, #tpu.memory_space<vmem>>, vector<8x128xf32>
    %c1_65 = arith.constant 1 : index
    %c0_66 = arith.constant 0 : index
    %c0_67 = arith.constant 0 : index
    %56 = vector.load %arg7[%c1_65, %c0_66, %c0_67] : memref<3x128x128xf32, #tpu.memory_space<vmem>>, vector<1x128x128xf32>
    %57 = vector.shape_cast %56 : vector<1x128x128xf32> to vector<128x128xf32>
    %cst_68 = arith.constant dense<0.000000e+00> : vector<8x128xf32>
    %58 = tpu.matmul %55, %57, %cst_68 {dimension_numbers = #tpu.dot_dimension_numbers<[1], [0], [0], [1], [0, 0, 1, 1], [], []>} : vector<8x128xf32>, vector<128x128xf32>, vector<8x128xf32> -> vector<8x128xf32>
    %59 = arith.addf %54, %58 : vector<8x128xf32>
    %c2_69 = arith.constant 2 : index
    %c0_70 = arith.constant 0 : index
    %60 = vector.load %arg33[%c2_69, %c0_70] : memref<18x128xf32, #tpu.memory_space<vmem>>, vector<8x128xf32>
    %c2_71 = arith.constant 2 : index
    %c0_72 = arith.constant 0 : index
    %c0_73 = arith.constant 0 : index
    %61 = vector.load %arg7[%c2_71, %c0_72, %c0_73] : memref<3x128x128xf32, #tpu.memory_space<vmem>>, vector<1x128x128xf32>
    %62 = vector.shape_cast %61 : vector<1x128x128xf32> to vector<128x128xf32>
    %cst_74 = arith.constant dense<0.000000e+00> : vector<8x128xf32>
    %63 = tpu.matmul %60, %62, %cst_74 {dimension_numbers = #tpu.dot_dimension_numbers<[1], [0], [0], [1], [0, 0, 1, 1], [], []>} : vector<8x128xf32>, vector<128x128xf32>, vector<8x128xf32> -> vector<8x128xf32>
    %64 = arith.addf %59, %63 : vector<8x128xf32>
    %c0_75 = arith.constant 0 : index
    %c0_76 = arith.constant 0 : index
    %65 = vector.load %arg8[%c0_75, %c0_76] : memref<1x128xf32, #tpu.memory_space<vmem>>, vector<1x128xf32>
    %66 = vector.broadcast %65 : vector<1x128xf32> to vector<8x128xf32>
    %67 = arith.addf %64, %66 : vector<8x128xf32>
    %68 = arith.addf %67, %25 : vector<8x128xf32>
    %cst_77 = arith.constant 0.000000e+00 : f32
    %69 = vector.broadcast %cst_77 : f32 to vector<8x128xf32>
    %70 = arith.maximumf %68, %69 : vector<8x128xf32>
    %c1_78 = arith.constant 1 : index
    %c0_79 = arith.constant 0 : index
    %71 = vector.load %arg33[%c1_78, %c0_79] : memref<18x128xf32, #tpu.memory_space<vmem>>, vector<8x128xf32>
    tpu.vector_store %arg33[%c1_78, %c0_79], %70 {strides = array<i32>} : memref<18x128xf32, #tpu.memory_space<vmem>>, vector<8x128xf32>,
    %cst_80 = arith.constant 0.000000e+00 : f32
    %72 = vector.broadcast %cst_80 : f32 to vector<1x128xf32>
    %c9_81 = arith.constant 9 : index
    %c0_82 = arith.constant 0 : index
    %73 = vector.load %arg33[%c9_81, %c0_82] : memref<18x128xf32, #tpu.memory_space<vmem>>, vector<1x128xf32>
    tpu.vector_store %arg33[%c9_81, %c0_82], %72 {strides = array<i32>} : memref<18x128xf32, #tpu.memory_space<vmem>>, vector<1x128xf32>,
    %c0_83 = arith.constant 0 : index
    %c0_84 = arith.constant 0 : index
    %74 = tpu.strided_load %arg33[%c0_83, %c0_84] {strides = array<i32: 2, 1>} : memref<18x128xf32, #tpu.memory_space<vmem>>, vector<4x128xf32>
    %c0_85 = arith.constant 0 : index
    %c0_86 = arith.constant 0 : index
    %c0_87 = arith.constant 0 : index
    %75 = vector.load %arg9[%c0_85, %c0_86, %c0_87] : memref<3x128x128xf32, #tpu.memory_space<vmem>>, vector<1x128x128xf32>
    %76 = vector.shape_cast %75 : vector<1x128x128xf32> to vector<128x128xf32>
    %cst_88 = arith.constant dense<0.000000e+00> : vector<4x128xf32>
    %77 = tpu.matmul %74, %76, %cst_88 {dimension_numbers = #tpu.dot_dimension_numbers<[1], [0], [0], [1], [0, 0, 1, 1], [], []>} : vector<4x128xf32>, vector<128x128xf32>, vector<4x128xf32> -> vector<4x128xf32>
    %c1_89 = arith.constant 1 : index
    %c0_90 = arith.constant 0 : index
    %78 = tpu.strided_load %arg33[%c1_89, %c0_90] {strides = array<i32: 2, 1>} : memref<18x128xf32, #tpu.memory_space<vmem>>, vector<4x128xf32>
    %c1_91 = arith.constant 1 : index
    %c0_92 = arith.constant 0 : index
    %c0_93 = arith.constant 0 : index
    %79 = vector.load %arg9[%c1_91, %c0_92, %c0_93] : memref<3x128x128xf32, #tpu.memory_space<vmem>>, vector<1x128x128xf32>
    %80 = vector.shape_cast %79 : vector<1x128x128xf32> to vector<128x128xf32>
    %cst_94 = arith.constant dense<0.000000e+00> : vector<4x128xf32>
    %81 = tpu.matmul %78, %80, %cst_94 {dimension_numbers = #tpu.dot_dimension_numbers<[1], [0], [0], [1], [0, 0, 1, 1], [], []>} : vector<4x128xf32>, vector<128x128xf32>, vector<4x128xf32> -> vector<4x128xf32>
    %82 = arith.addf %77, %81 : vector<4x128xf32>
    %c2_95 = arith.constant 2 : index
    %c0_96 = arith.constant 0 : index
    %83 = tpu.strided_load %arg33[%c2_95, %c0_96] {strides = array<i32: 2, 1>} : memref<18x128xf32, #tpu.memory_space<vmem>>, vector<4x128xf32>
    %c2_97 = arith.constant 2 : index
    %c0_98 = arith.constant 0 : index
    %c0_99 = arith.constant 0 : index
    %84 = vector.load %arg9[%c2_97, %c0_98, %c0_99] : memref<3x128x128xf32, #tpu.memory_space<vmem>>, vector<1x128x128xf32>
    %85 = vector.shape_cast %84 : vector<1x128x128xf32> to vector<128x128xf32>
    %cst_100 = arith.constant dense<0.000000e+00> : vector<4x128xf32>
    %86 = tpu.matmul %83, %85, %cst_100 {dimension_numbers = #tpu.dot_dimension_numbers<[1], [0], [0], [1], [0, 0, 1, 1], [], []>} : vector<4x128xf32>, vector<128x128xf32>, vector<4x128xf32> -> vector<4x128xf32>
    %87 = arith.addf %82, %86 : vector<4x128xf32>
    %c0_101 = arith.constant 0 : index
    %c0_102 = arith.constant 0 : index
    %88 = vector.load %arg10[%c0_101, %c0_102] : memref<1x128xf32, #tpu.memory_space<vmem>>, vector<1x128xf32>
    %89 = vector.broadcast %88 : vector<1x128xf32> to vector<4x128xf32>
    %90 = arith.addf %87, %89 : vector<4x128xf32>
    %cst_103 = arith.constant 0.000000e+00 : f32
    %91 = vector.broadcast %cst_103 : f32 to vector<4x128xf32>
    %92 = arith.maximumf %90, %91 : vector<4x128xf32>
    %c1_104 = arith.constant 1 : index
    %c0_105 = arith.constant 0 : index
    %93 = vector.load %arg33[%c1_104, %c0_105] : memref<18x128xf32, #tpu.memory_space<vmem>>, vector<4x128xf32>
    tpu.vector_store %arg33[%c1_104, %c0_105], %92 {strides = array<i32>} : memref<18x128xf32, #tpu.memory_space<vmem>>, vector<4x128xf32>,
    %cst_106 = arith.constant 0.000000e+00 : f32
    %94 = vector.broadcast %cst_106 : f32 to vector<1x128xf32>
    %c5 = arith.constant 5 : index
    %c0_107 = arith.constant 0 : index
    %95 = vector.load %arg33[%c5, %c0_107] : memref<18x128xf32, #tpu.memory_space<vmem>>, vector<1x128xf32>
    tpu.vector_store %arg33[%c5, %c0_107], %94 {strides = array<i32>} : memref<18x128xf32, #tpu.memory_space<vmem>>, vector<1x128xf32>,
    %c0_108 = arith.constant 0 : index
    %c0_109 = arith.constant 0 : index
    %96 = vector.load %arg33[%c0_108, %c0_109] : memref<18x128xf32, #tpu.memory_space<vmem>>, vector<4x128xf32>
    %c0_110 = arith.constant 0 : index
    %c0_111 = arith.constant 0 : index
    %c0_112 = arith.constant 0 : index
    %97 = vector.load %arg11[%c0_110, %c0_111, %c0_112] : memref<3x128x128xf32, #tpu.memory_space<vmem>>, vector<1x128x128xf32>
    %98 = vector.shape_cast %97 : vector<1x128x128xf32> to vector<128x128xf32>
    %cst_113 = arith.constant dense<0.000000e+00> : vector<4x128xf32>
    %99 = tpu.matmul %96, %98, %cst_113 {dimension_numbers = #tpu.dot_dimension_numbers<[1], [0], [0], [1], [0, 0, 1, 1], [], []>} : vector<4x128xf32>, vector<128x128xf32>, vector<4x128xf32> -> vector<4x128xf32>
    %c1_114 = arith.constant 1 : index
    %c0_115 = arith.constant 0 : index
    %100 = vector.load %arg33[%c1_114, %c0_115] : memref<18x128xf32, #tpu.memory_space<vmem>>, vector<4x128xf32>
    %c1_116 = arith.constant 1 : index
    %c0_117 = arith.constant 0 : index
    %c0_118 = arith.constant 0 : index
    %101 = vector.load %arg11[%c1_116, %c0_117, %c0_118] : memref<3x128x128xf32, #tpu.memory_space<vmem>>, vector<1x128x128xf32>
    %102 = vector.shape_cast %101 : vector<1x128x128xf32> to vector<128x128xf32>
    %cst_119 = arith.constant dense<0.000000e+00> : vector<4x128xf32>
    %103 = tpu.matmul %100, %102, %cst_119 {dimension_numbers = #tpu.dot_dimension_numbers<[1], [0], [0], [1], [0, 0, 1, 1], [], []>} : vector<4x128xf32>, vector<128x128xf32>, vector<4x128xf32> -> vector<4x128xf32>
    %104 = arith.addf %99, %103 : vector<4x128xf32>
    %c2_120 = arith.constant 2 : index
    %c0_121 = arith.constant 0 : index
    %105 = vector.load %arg33[%c2_120, %c0_121] : memref<18x128xf32, #tpu.memory_space<vmem>>, vector<4x128xf32>
    %c2_122 = arith.constant 2 : index
    %c0_123 = arith.constant 0 : index
    %c0_124 = arith.constant 0 : index
    %106 = vector.load %arg11[%c2_122, %c0_123, %c0_124] : memref<3x128x128xf32, #tpu.memory_space<vmem>>, vector<1x128x128xf32>
    %107 = vector.shape_cast %106 : vector<1x128x128xf32> to vector<128x128xf32>
    %cst_125 = arith.constant dense<0.000000e+00> : vector<4x128xf32>
    %108 = tpu.matmul %105, %107, %cst_125 {dimension_numbers = #tpu.dot_dimension_numbers<[1], [0], [0], [1], [0, 0, 1, 1], [], []>} : vector<4x128xf32>, vector<128x128xf32>, vector<4x128xf32> -> vector<4x128xf32>
    %109 = arith.addf %104, %108 : vector<4x128xf32>
    %c0_126 = arith.constant 0 : index
    %c0_127 = arith.constant 0 : index
    %110 = vector.load %arg12[%c0_126, %c0_127] : memref<1x128xf32, #tpu.memory_space<vmem>>, vector<1x128xf32>
    %111 = vector.broadcast %110 : vector<1x128xf32> to vector<4x128xf32>
    %112 = arith.addf %109, %111 : vector<4x128xf32>
    %cst_128 = arith.constant 0.000000e+00 : f32
    %113 = vector.broadcast %cst_128 : f32 to vector<4x128xf32>
    %114 = arith.maximumf %112, %113 : vector<4x128xf32>
    %c1_129 = arith.constant 1 : index
    %c0_130 = arith.constant 0 : index
    %115 = vector.load %arg33[%c1_129, %c0_130] : memref<18x128xf32, #tpu.memory_space<vmem>>, vector<4x128xf32>
    tpu.vector_store %arg33[%c1_129, %c0_130], %114 {strides = array<i32>} : memref<18x128xf32, #tpu.memory_space<vmem>>, vector<4x128xf32>,
    %cst_131 = arith.constant 0.000000e+00 : f32
    %116 = vector.broadcast %cst_131 : f32 to vector<1x128xf32>
    %c5_132 = arith.constant 5 : index
    %c0_133 = arith.constant 0 : index
    %117 = vector.load %arg33[%c5_132, %c0_133] : memref<18x128xf32, #tpu.memory_space<vmem>>, vector<1x128xf32>
    tpu.vector_store %arg33[%c5_132, %c0_133], %116 {strides = array<i32>} : memref<18x128xf32, #tpu.memory_space<vmem>>, vector<1x128xf32>,
    %c0_134 = arith.constant 0 : index
    %c0_135 = arith.constant 0 : index
    %118 = vector.load %arg33[%c0_134, %c0_135] : memref<18x128xf32, #tpu.memory_space<vmem>>, vector<4x128xf32>
    %c0_136 = arith.constant 0 : index
    %c0_137 = arith.constant 0 : index
    %c0_138 = arith.constant 0 : index
    %119 = vector.load %arg13[%c0_136, %c0_137, %c0_138] : memref<3x128x128xf32, #tpu.memory_space<vmem>>, vector<1x128x128xf32>
    %120 = vector.shape_cast %119 : vector<1x128x128xf32> to vector<128x128xf32>
    %cst_139 = arith.constant dense<0.000000e+00> : vector<4x128xf32>
    %121 = tpu.matmul %118, %120, %cst_139 {dimension_numbers = #tpu.dot_dimension_numbers<[1], [0], [0], [1], [0, 0, 1, 1], [], []>} : vector<4x128xf32>, vector<128x128xf32>, vector<4x128xf32> -> vector<4x128xf32>
    %c1_140 = arith.constant 1 : index
    %c0_141 = arith.constant 0 : index
    %122 = vector.load %arg33[%c1_140, %c0_141] : memref<18x128xf32, #tpu.memory_space<vmem>>, vector<4x128xf32>
    %c1_142 = arith.constant 1 : index
    %c0_143 = arith.constant 0 : index
    %c0_144 = arith.constant 0 : index
    %123 = vector.load %arg13[%c1_142, %c0_143, %c0_144] : memref<3x128x128xf32, #tpu.memory_space<vmem>>, vector<1x128x128xf32>
    %124 = vector.shape_cast %123 : vector<1x128x128xf32> to vector<128x128xf32>
    %cst_145 = arith.constant dense<0.000000e+00> : vector<4x128xf32>
    %125 = tpu.matmul %122, %124, %cst_145 {dimension_numbers = #tpu.dot_dimension_numbers<[1], [0], [0], [1], [0, 0, 1, 1], [], []>} : vector<4x128xf32>, vector<128x128xf32>, vector<4x128xf32> -> vector<4x128xf32>
    %126 = arith.addf %121, %125 : vector<4x128xf32>
    %c2_146 = arith.constant 2 : index
    %c0_147 = arith.constant 0 : index
    %127 = vector.load %arg33[%c2_146, %c0_147] : memref<18x128xf32, #tpu.memory_space<vmem>>, vector<4x128xf32>
    %c2_148 = arith.constant 2 : index
    %c0_149 = arith.constant 0 : index
    %c0_150 = arith.constant 0 : index
    %128 = vector.load %arg13[%c2_148, %c0_149, %c0_150] : memref<3x128x128xf32, #tpu.memory_space<vmem>>, vector<1x128x128xf32>
    %129 = vector.shape_cast %128 : vector<1x128x128xf32> to vector<128x128xf32>
    %cst_151 = arith.constant dense<0.000000e+00> : vector<4x128xf32>
    %130 = tpu.matmul %127, %129, %cst_151 {dimension_numbers = #tpu.dot_dimension_numbers<[1], [0], [0], [1], [0, 0, 1, 1], [], []>} : vector<4x128xf32>, vector<128x128xf32>, vector<4x128xf32> -> vector<4x128xf32>
    %131 = arith.addf %126, %130 : vector<4x128xf32>
    %c0_152 = arith.constant 0 : index
    %c0_153 = arith.constant 0 : index
    %132 = vector.load %arg14[%c0_152, %c0_153] : memref<1x128xf32, #tpu.memory_space<vmem>>, vector<1x128xf32>
    %133 = vector.broadcast %132 : vector<1x128xf32> to vector<4x128xf32>
    %134 = arith.addf %131, %133 : vector<4x128xf32>
    %135 = arith.addf %134, %92 : vector<4x128xf32>
    %cst_154 = arith.constant 0.000000e+00 : f32
    %136 = vector.broadcast %cst_154 : f32 to vector<4x128xf32>
    %137 = arith.maximumf %135, %136 : vector<4x128xf32>
    %c0_155 = arith.constant 0 : index
    %c0_156 = arith.constant 0 : index
    %138 = vector.load %arg16[%c0_155, %c0_156] : memref<1x16xf32, #tpu.memory_space<vmem>>, vector<1x16xf32>
    %139 = vector.extract_strided_slice %137 {offsets = [0, 0], sizes = [1, 128], strides = [1, 1]} : vector<4x128xf32> to vector<1x128xf32>
    %c0_157 = arith.constant 0 : index
    %c0_158 = arith.constant 0 : index
    %c0_159 = arith.constant 0 : index
    %140 = vector.load %arg15[%c0_157, %c0_158, %c0_159] : memref<4x128x16xf32, #tpu.memory_space<vmem>>, vector<1x128x16xf32>
    %141 = vector.shape_cast %140 : vector<1x128x16xf32> to vector<128x16xf32>
    %cst_160 = arith.constant dense<0.000000e+00> : vector<1x16xf32>
    %142 = tpu.matmul %139, %141, %cst_160 {dimension_numbers = #tpu.dot_dimension_numbers<[1], [0], [0], [1], [0, 0, 1, 1], [], []>} : vector<1x128xf32>, vector<128x16xf32>, vector<1x16xf32> -> vector<1x16xf32>
    %143 = arith.addf %138, %142 : vector<1x16xf32>
    %144 = vector.extract_strided_slice %137 {offsets = [1, 0], sizes = [1, 128], strides = [1, 1]} : vector<4x128xf32> to vector<1x128xf32>
    %c1_161 = arith.constant 1 : index
    %c0_162 = arith.constant 0 : index
    %c0_163 = arith.constant 0 : index
    %145 = vector.load %arg15[%c1_161, %c0_162, %c0_163] : memref<4x128x16xf32, #tpu.memory_space<vmem>>, vector<1x128x16xf32>
    %146 = vector.shape_cast %145 : vector<1x128x16xf32> to vector<128x16xf32>
    %cst_164 = arith.constant dense<0.000000e+00> : vector<1x16xf32>
    %147 = tpu.matmul %144, %146, %cst_164 {dimension_numbers = #tpu.dot_dimension_numbers<[1], [0], [0], [1], [0, 0, 1, 1], [], []>} : vector<1x128xf32>, vector<128x16xf32>, vector<1x16xf32> -> vector<1x16xf32>
    %148 = arith.addf %143, %147 : vector<1x16xf32>
    %149 = vector.extract_strided_slice %137 {offsets = [2, 0], sizes = [1, 128], strides = [1, 1]} : vector<4x128xf32> to vector<1x128xf32>
    %c2_165 = arith.constant 2 : index
    %c0_166 = arith.constant 0 : index
    %c0_167 = arith.constant 0 : index
    %150 = vector.load %arg15[%c2_165, %c0_166, %c0_167] : memref<4x128x16xf32, #tpu.memory_space<vmem>>, vector<1x128x16xf32>
    %151 = vector.shape_cast %150 : vector<1x128x16xf32> to vector<128x16xf32>
    %cst_168 = arith.constant dense<0.000000e+00> : vector<1x16xf32>
    %152 = tpu.matmul %149, %151, %cst_168 {dimension_numbers = #tpu.dot_dimension_numbers<[1], [0], [0], [1], [0, 0, 1, 1], [], []>} : vector<1x128xf32>, vector<128x16xf32>, vector<1x16xf32> -> vector<1x16xf32>
    %153 = arith.addf %148, %152 : vector<1x16xf32>
    %154 = vector.extract_strided_slice %137 {offsets = [3, 0], sizes = [1, 128], strides = [1, 1]} : vector<4x128xf32> to vector<1x128xf32>
    %c3 = arith.constant 3 : index
    %c0_169 = arith.constant 0 : index
    %c0_170 = arith.constant 0 : index
    %155 = vector.load %arg15[%c3, %c0_169, %c0_170] : memref<4x128x16xf32, #tpu.memory_space<vmem>>, vector<1x128x16xf32>
    %156 = vector.shape_cast %155 : vector<1x128x16xf32> to vector<128x16xf32>
    %cst_171 = arith.constant dense<0.000000e+00> : vector<1x16xf32>
    %157 = tpu.matmul %154, %156, %cst_171 {dimension_numbers = #tpu.dot_dimension_numbers<[1], [0], [0], [1], [0, 0, 1, 1], [], []>} : vector<1x128xf32>, vector<128x16xf32>, vector<1x16xf32> -> vector<1x16xf32>
    %158 = arith.addf %153, %157 : vector<1x16xf32>
    %c0_172 = arith.constant 0 : index
    %c0_173 = arith.constant 0 : index
    %c0_174 = arith.constant 0 : index
    %159 = vector.load %arg32[%c0_172, %c0_173, %c0_174] : memref<1x1x16xf32, #tpu.memory_space<vmem>>, vector<1x1x16xf32>
    %160 = vector.shape_cast %159 : vector<1x1x16xf32> to vector<1x16xf32>
    %161 = vector.shape_cast %158 : vector<1x16xf32> to vector<1x1x16xf32>
    tpu.vector_store %arg32[%c0_172, %c0_173, %c0_174], %161 {strides = array<i32>} : memref<1x1x16xf32, #tpu.memory_space<vmem>>, vector<1x1x16xf32>,
    %162 = vector.extract_strided_slice %158 {offsets = [0, 0], sizes = [1, 8], strides = [1, 1]} : vector<1x16xf32> to vector<1x8xf32>
    %163 = vector.extract_strided_slice %158 {offsets = [0, 8], sizes = [1, 8], strides = [1, 1]} : vector<1x16xf32> to vector<1x8xf32>
    %cst_175 = arith.constant 5.000000e-01 : f32
    %164 = vector.broadcast %cst_175 : f32 to vector<1x8xf32>
    %165 = arith.mulf %164, %163 : vector<1x8xf32>
    %166 = math.exp %165 : vector<1x8xf32>
    %c0_176 = arith.constant 0 : index
    %c0_177 = arith.constant 0 : index
    %c0_178 = arith.constant 0 : index
    %167 = vector.load %arg2[%c0_176, %c0_177, %c0_178] : memref<1x1x8xf32, #tpu.memory_space<vmem>>, vector<1x1x8xf32>
    %168 = vector.shape_cast %167 : vector<1x1x8xf32> to vector<1x8xf32>
    %169 = arith.mulf %166, %168 : vector<1x8xf32>
    %170 = arith.addf %162, %169 : vector<1x8xf32>
    %c0_179 = arith.constant 0 : index
    %c0_180 = arith.constant 0 : index
    %c0_181 = arith.constant 0 : index
    %171 = vector.load %arg17[%c0_179, %c0_180, %c0_181] : memref<4x8x128xf32, #tpu.memory_space<vmem>>, vector<1x8x128xf32>
    %172 = vector.shape_cast %171 : vector<1x8x128xf32> to vector<8x128xf32>
    %cst_182 = arith.constant dense<0.000000e+00> : vector<1x128xf32>
    %173 = tpu.matmul %170, %172, %cst_182 {dimension_numbers = #tpu.dot_dimension_numbers<[1], [0], [0], [1], [0, 0, 1, 1], [], []>} : vector<1x8xf32>, vector<8x128xf32>, vector<1x128xf32> -> vector<1x128xf32>
    %c0_183 = arith.constant 0 : index
    %c0_184 = arith.constant 0 : index
    %174 = vector.load %arg18[%c0_183, %c0_184] : memref<4x128xf32, #tpu.memory_space<vmem>>, vector<1x128xf32>
    %175 = arith.addf %173, %174 : vector<1x128xf32>
    %cst_185 = arith.constant 0.000000e+00 : f32
    %176 = vector.broadcast %cst_185 : f32 to vector<1x128xf32>
    %177 = arith.maximumf %175, %176 : vector<1x128xf32>
    %c1_186 = arith.constant 1 : index
    %c0_187 = arith.constant 0 : index
    %178 = vector.load %arg33[%c1_186, %c0_187] : memref<18x128xf32, #tpu.memory_space<vmem>>, vector<1x128xf32>
    tpu.vector_store %arg33[%c1_186, %c0_187], %177 {strides = array<i32>} : memref<18x128xf32, #tpu.memory_space<vmem>>, vector<1x128xf32>,
    %c1_188 = arith.constant 1 : index
    %c0_189 = arith.constant 0 : index
    %c0_190 = arith.constant 0 : index
    %179 = vector.load %arg17[%c1_188, %c0_189, %c0_190] : memref<4x8x128xf32, #tpu.memory_space<vmem>>, vector<1x8x128xf32>
    %180 = vector.shape_cast %179 : vector<1x8x128xf32> to vector<8x128xf32>
    %cst_191 = arith.constant dense<0.000000e+00> : vector<1x128xf32>
    %181 = tpu.matmul %170, %180, %cst_191 {dimension_numbers = #tpu.dot_dimension_numbers<[1], [0], [0], [1], [0, 0, 1, 1], [], []>} : vector<1x8xf32>, vector<8x128xf32>, vector<1x128xf32> -> vector<1x128xf32>
    %c1_192 = arith.constant 1 : index
    %c0_193 = arith.constant 0 : index
    %182 = vector.load %arg18[%c1_192, %c0_193] : memref<4x128xf32, #tpu.memory_space<vmem>>, vector<1x128xf32>
    %183 = arith.addf %181, %182 : vector<1x128xf32>
    %cst_194 = arith.constant 0.000000e+00 : f32
    %184 = vector.broadcast %cst_194 : f32 to vector<1x128xf32>
    %185 = arith.maximumf %183, %184 : vector<1x128xf32>
    %c2_195 = arith.constant 2 : index
    %c0_196 = arith.constant 0 : index
    %186 = vector.load %arg33[%c2_195, %c0_196] : memref<18x128xf32, #tpu.memory_space<vmem>>, vector<1x128xf32>
    tpu.vector_store %arg33[%c2_195, %c0_196], %185 {strides = array<i32>} : memref<18x128xf32, #tpu.memory_space<vmem>>, vector<1x128xf32>,
    %c2_197 = arith.constant 2 : index
    %c0_198 = arith.constant 0 : index
    %c0_199 = arith.constant 0 : index
    %187 = vector.load %arg17[%c2_197, %c0_198, %c0_199] : memref<4x8x128xf32, #tpu.memory_space<vmem>>, vector<1x8x128xf32>
    %188 = vector.shape_cast %187 : vector<1x8x128xf32> to vector<8x128xf32>
    %cst_200 = arith.constant dense<0.000000e+00> : vector<1x128xf32>
    %189 = tpu.matmul %170, %188, %cst_200 {dimension_numbers = #tpu.dot_dimension_numbers<[1], [0], [0], [1], [0, 0, 1, 1], [], []>} : vector<1x8xf32>, vector<8x128xf32>, vector<1x128xf32> -> vector<1x128xf32>
    %c2_201 = arith.constant 2 : index
    %c0_202 = arith.constant 0 : index
    %190 = vector.load %arg18[%c2_201, %c0_202] : memref<4x128xf32, #tpu.memory_space<vmem>>, vector<1x128xf32>
    %191 = arith.addf %189, %190 : vector<1x128xf32>
    %cst_203 = arith.constant 0.000000e+00 : f32
    %192 = vector.broadcast %cst_203 : f32 to vector<1x128xf32>
    %193 = arith.maximumf %191, %192 : vector<1x128xf32>
    %c3_204 = arith.constant 3 : index
    %c0_205 = arith.constant 0 : index
    %194 = vector.load %arg33[%c3_204, %c0_205] : memref<18x128xf32, #tpu.memory_space<vmem>>, vector<1x128xf32>
    tpu.vector_store %arg33[%c3_204, %c0_205], %193 {strides = array<i32>} : memref<18x128xf32, #tpu.memory_space<vmem>>, vector<1x128xf32>,
    %c3_206 = arith.constant 3 : index
    %c0_207 = arith.constant 0 : index
    %c0_208 = arith.constant 0 : index
    %195 = vector.load %arg17[%c3_206, %c0_207, %c0_208] : memref<4x8x128xf32, #tpu.memory_space<vmem>>, vector<1x8x128xf32>
    %196 = vector.shape_cast %195 : vector<1x8x128xf32> to vector<8x128xf32>
    %cst_209 = arith.constant dense<0.000000e+00> : vector<1x128xf32>
    %197 = tpu.matmul %170, %196, %cst_209 {dimension_numbers = #tpu.dot_dimension_numbers<[1], [0], [0], [1], [0, 0, 1, 1], [], []>} : vector<1x8xf32>, vector<8x128xf32>, vector<1x128xf32> -> vector<1x128xf32>
    %c3_210 = arith.constant 3 : index
    %c0_211 = arith.constant 0 : index
    %198 = vector.load %arg18[%c3_210, %c0_211] : memref<4x128xf32, #tpu.memory_space<vmem>>, vector<1x128xf32>
    %199 = arith.addf %197, %198 : vector<1x128xf32>
    %cst_212 = arith.constant 0.000000e+00 : f32
    %200 = vector.broadcast %cst_212 : f32 to vector<1x128xf32>
    %201 = arith.maximumf %199, %200 : vector<1x128xf32>
    %c4 = arith.constant 4 : index
    %c0_213 = arith.constant 0 : index
    %202 = vector.load %arg33[%c4, %c0_213] : memref<18x128xf32, #tpu.memory_space<vmem>>, vector<1x128xf32>
    tpu.vector_store %arg33[%c4, %c0_213], %201 {strides = array<i32>} : memref<18x128xf32, #tpu.memory_space<vmem>>, vector<1x128xf32>,
    %c1_214 = arith.constant 1 : index
    %c0_215 = arith.constant 0 : index
    %203 = vector.load %arg33[%c1_214, %c0_215] : memref<18x128xf32, #tpu.memory_space<vmem>>, vector<4x128xf32>
    %c1_216 = arith.constant 1 : index
    %c0_217 = arith.constant 0 : index
    %204 = vector.load %arg33[%c1_216, %c0_217] : memref<18x128xf32, #tpu.memory_space<vmem>>, vector<4x128xf32>
    tpu.vector_store %arg33[%c1_216, %c0_217], %203 {strides = array<i32>} : memref<18x128xf32, #tpu.memory_space<vmem>>, vector<4x128xf32>,
    %cst_218 = arith.constant 0.000000e+00 : f32
    %205 = vector.broadcast %cst_218 : f32 to vector<1x128xf32>
    %c5_219 = arith.constant 5 : index
    %c0_220 = arith.constant 0 : index
    %206 = vector.load %arg33[%c5_219, %c0_220] : memref<18x128xf32, #tpu.memory_space<vmem>>, vector<1x128xf32>
    tpu.vector_store %arg33[%c5_219, %c0_220], %205 {strides = array<i32>} : memref<18x128xf32, #tpu.memory_space<vmem>>, vector<1x128xf32>,
    %c0_221 = arith.constant 0 : index
    %c0_222 = arith.constant 0 : index
    %207 = vector.load %arg33[%c0_221, %c0_222] : memref<18x128xf32, #tpu.memory_space<vmem>>, vector<4x128xf32>
    %c0_223 = arith.constant 0 : index
    %c0_224 = arith.constant 0 : index
    %c0_225 = arith.constant 0 : index
    %208 = vector.load %arg19[%c0_223, %c0_224, %c0_225] : memref<3x128x128xf32, #tpu.memory_space<vmem>>, vector<1x128x128xf32>
    %209 = vector.shape_cast %208 : vector<1x128x128xf32> to vector<128x128xf32>
    %cst_226 = arith.constant dense<0.000000e+00> : vector<4x128xf32>
    %210 = tpu.matmul %207, %209, %cst_226 {dimension_numbers = #tpu.dot_dimension_numbers<[1], [0], [0], [1], [0, 0, 1, 1], [], []>} : vector<4x128xf32>, vector<128x128xf32>, vector<4x128xf32> -> vector<4x128xf32>
    %c1_227 = arith.constant 1 : index
    %c0_228 = arith.constant 0 : index
    %211 = vector.load %arg33[%c1_227, %c0_228] : memref<18x128xf32, #tpu.memory_space<vmem>>, vector<4x128xf32>
    %c1_229 = arith.constant 1 : index
    %c0_230 = arith.constant 0 : index
    %c0_231 = arith.constant 0 : index
    %212 = vector.load %arg19[%c1_229, %c0_230, %c0_231] : memref<3x128x128xf32, #tpu.memory_space<vmem>>, vector<1x128x128xf32>
    %213 = vector.shape_cast %212 : vector<1x128x128xf32> to vector<128x128xf32>
    %cst_232 = arith.constant dense<0.000000e+00> : vector<4x128xf32>
    %214 = tpu.matmul %211, %213, %cst_232 {dimension_numbers = #tpu.dot_dimension_numbers<[1], [0], [0], [1], [0, 0, 1, 1], [], []>} : vector<4x128xf32>, vector<128x128xf32>, vector<4x128xf32> -> vector<4x128xf32>
    %215 = arith.addf %210, %214 : vector<4x128xf32>
    %c2_233 = arith.constant 2 : index
    %c0_234 = arith.constant 0 : index
    %216 = vector.load %arg33[%c2_233, %c0_234] : memref<18x128xf32, #tpu.memory_space<vmem>>, vector<4x128xf32>
    %c2_235 = arith.constant 2 : index
    %c0_236 = arith.constant 0 : index
    %c0_237 = arith.constant 0 : index
    %217 = vector.load %arg19[%c2_235, %c0_236, %c0_237] : memref<3x128x128xf32, #tpu.memory_space<vmem>>, vector<1x128x128xf32>
    %218 = vector.shape_cast %217 : vector<1x128x128xf32> to vector<128x128xf32>
    %cst_238 = arith.constant dense<0.000000e+00> : vector<4x128xf32>
    %219 = tpu.matmul %216, %218, %cst_238 {dimension_numbers = #tpu.dot_dimension_numbers<[1], [0], [0], [1], [0, 0, 1, 1], [], []>} : vector<4x128xf32>, vector<128x128xf32>, vector<4x128xf32> -> vector<4x128xf32>
    %220 = arith.addf %215, %219 : vector<4x128xf32>
    %c0_239 = arith.constant 0 : index
    %c0_240 = arith.constant 0 : index
    %221 = vector.load %arg20[%c0_239, %c0_240] : memref<1x128xf32, #tpu.memory_space<vmem>>, vector<1x128xf32>
    %222 = vector.broadcast %221 : vector<1x128xf32> to vector<4x128xf32>
    %223 = arith.addf %220, %222 : vector<4x128xf32>
    %cst_241 = arith.constant 0.000000e+00 : f32
    %224 = vector.broadcast %cst_241 : f32 to vector<4x128xf32>
    %225 = arith.maximumf %223, %224 : vector<4x128xf32>
    %c1_242 = arith.constant 1 : index
    %c0_243 = arith.constant 0 : index
    %226 = vector.load %arg33[%c1_242, %c0_243] : memref<18x128xf32, #tpu.memory_space<vmem>>, vector<4x128xf32>
    tpu.vector_store %arg33[%c1_242, %c0_243], %225 {strides = array<i32>} : memref<18x128xf32, #tpu.memory_space<vmem>>, vector<4x128xf32>,
    %cst_244 = arith.constant 0.000000e+00 : f32
    %227 = vector.broadcast %cst_244 : f32 to vector<1x128xf32>
    %c5_245 = arith.constant 5 : index
    %c0_246 = arith.constant 0 : index
    %228 = vector.load %arg33[%c5_245, %c0_246] : memref<18x128xf32, #tpu.memory_space<vmem>>, vector<1x128xf32>
    tpu.vector_store %arg33[%c5_245, %c0_246], %227 {strides = array<i32>} : memref<18x128xf32, #tpu.memory_space<vmem>>, vector<1x128xf32>,
    %c0_247 = arith.constant 0 : index
    %c0_248 = arith.constant 0 : index
    %229 = vector.load %arg33[%c0_247, %c0_248] : memref<18x128xf32, #tpu.memory_space<vmem>>, vector<4x128xf32>
    %c0_249 = arith.constant 0 : index
    %c0_250 = arith.constant 0 : index
    %c0_251 = arith.constant 0 : index
    %230 = vector.load %arg21[%c0_249, %c0_250, %c0_251] : memref<3x128x128xf32, #tpu.memory_space<vmem>>, vector<1x128x128xf32>
    %231 = vector.shape_cast %230 : vector<1x128x128xf32> to vector<128x128xf32>
    %cst_252 = arith.constant dense<0.000000e+00> : vector<4x128xf32>
    %232 = tpu.matmul %229, %231, %cst_252 {dimension_numbers = #tpu.dot_dimension_numbers<[1], [0], [0], [1], [0, 0, 1, 1], [], []>} : vector<4x128xf32>, vector<128x128xf32>, vector<4x128xf32> -> vector<4x128xf32>
    %c1_253 = arith.constant 1 : index
    %c0_254 = arith.constant 0 : index
    %233 = vector.load %arg33[%c1_253, %c0_254] : memref<18x128xf32, #tpu.memory_space<vmem>>, vector<4x128xf32>
    %c1_255 = arith.constant 1 : index
    %c0_256 = arith.constant 0 : index
    %c0_257 = arith.constant 0 : index
    %234 = vector.load %arg21[%c1_255, %c0_256, %c0_257] : memref<3x128x128xf32, #tpu.memory_space<vmem>>, vector<1x128x128xf32>
    %235 = vector.shape_cast %234 : vector<1x128x128xf32> to vector<128x128xf32>
    %cst_258 = arith.constant dense<0.000000e+00> : vector<4x128xf32>
    %236 = tpu.matmul %233, %235, %cst_258 {dimension_numbers = #tpu.dot_dimension_numbers<[1], [0], [0], [1], [0, 0, 1, 1], [], []>} : vector<4x128xf32>, vector<128x128xf32>, vector<4x128xf32> -> vector<4x128xf32>
    %237 = arith.addf %232, %236 : vector<4x128xf32>
    %c2_259 = arith.constant 2 : index
    %c0_260 = arith.constant 0 : index
    %238 = vector.load %arg33[%c2_259, %c0_260] : memref<18x128xf32, #tpu.memory_space<vmem>>, vector<4x128xf32>
    %c2_261 = arith.constant 2 : index
    %c0_262 = arith.constant 0 : index
    %c0_263 = arith.constant 0 : index
    %239 = vector.load %arg21[%c2_261, %c0_262, %c0_263] : memref<3x128x128xf32, #tpu.memory_space<vmem>>, vector<1x128x128xf32>
    %240 = vector.shape_cast %239 : vector<1x128x128xf32> to vector<128x128xf32>
    %cst_264 = arith.constant dense<0.000000e+00> : vector<4x128xf32>
    %241 = tpu.matmul %238, %240, %cst_264 {dimension_numbers = #tpu.dot_dimension_numbers<[1], [0], [0], [1], [0, 0, 1, 1], [], []>} : vector<4x128xf32>, vector<128x128xf32>, vector<4x128xf32> -> vector<4x128xf32>
    %242 = arith.addf %237, %241 : vector<4x128xf32>
    %c0_265 = arith.constant 0 : index
    %c0_266 = arith.constant 0 : index
    %243 = vector.load %arg22[%c0_265, %c0_266] : memref<1x128xf32, #tpu.memory_space<vmem>>, vector<1x128xf32>
    %244 = vector.broadcast %243 : vector<1x128xf32> to vector<4x128xf32>
    %245 = arith.addf %242, %244 : vector<4x128xf32>
    %246 = arith.addf %245, %203 : vector<4x128xf32>
    %cst_267 = arith.constant 0.000000e+00 : f32
    %247 = vector.broadcast %cst_267 : f32 to vector<4x128xf32>
    %248 = arith.maximumf %246, %247 : vector<4x128xf32>
    %249 = vector.extract_strided_slice %248 {offsets = [0, 0], sizes = [1, 128], strides = [1, 1]} : vector<4x128xf32> to vector<1x128xf32>
    %c1_268 = arith.constant 1 : index
    %c0_269 = arith.constant 0 : index
    %250 = vector.load %arg33[%c1_268, %c0_269] : memref<18x128xf32, #tpu.memory_space<vmem>>, vector<1x128xf32>
    tpu.vector_store %arg33[%c1_268, %c0_269], %249 {strides = array<i32>} : memref<18x128xf32, #tpu.memory_space<vmem>>, vector<1x128xf32>,
    %c2_270 = arith.constant 2 : index
    %c0_271 = arith.constant 0 : index
    %251 = vector.load %arg33[%c2_270, %c0_271] : memref<18x128xf32, #tpu.memory_space<vmem>>, vector<1x128xf32>
    tpu.vector_store %arg33[%c2_270, %c0_271], %249 {strides = array<i32>} : memref<18x128xf32, #tpu.memory_space<vmem>>, vector<1x128xf32>,
    %252 = vector.extract_strided_slice %248 {offsets = [1, 0], sizes = [1, 128], strides = [1, 1]} : vector<4x128xf32> to vector<1x128xf32>
    %c3_272 = arith.constant 3 : index
    %c0_273 = arith.constant 0 : index
    %253 = vector.load %arg33[%c3_272, %c0_273] : memref<18x128xf32, #tpu.memory_space<vmem>>, vector<1x128xf32>
    tpu.vector_store %arg33[%c3_272, %c0_273], %252 {strides = array<i32>} : memref<18x128xf32, #tpu.memory_space<vmem>>, vector<1x128xf32>,
    %c4_274 = arith.constant 4 : index
    %c0_275 = arith.constant 0 : index
    %254 = vector.load %arg33[%c4_274, %c0_275] : memref<18x128xf32, #tpu.memory_space<vmem>>, vector<1x128xf32>
    tpu.vector_store %arg33[%c4_274, %c0_275], %252 {strides = array<i32>} : memref<18x128xf32, #tpu.memory_space<vmem>>, vector<1x128xf32>,
    %255 = vector.extract_strided_slice %248 {offsets = [2, 0], sizes = [1, 128], strides = [1, 1]} : vector<4x128xf32> to vector<1x128xf32>
    %c5_276 = arith.constant 5 : index
    %c0_277 = arith.constant 0 : index
    %256 = vector.load %arg33[%c5_276, %c0_277] : memref<18x128xf32, #tpu.memory_space<vmem>>, vector<1x128xf32>
    tpu.vector_store %arg33[%c5_276, %c0_277], %255 {strides = array<i32>} : memref<18x128xf32, #tpu.memory_space<vmem>>, vector<1x128xf32>,
    %c6 = arith.constant 6 : index
    %c0_278 = arith.constant 0 : index
    %257 = vector.load %arg33[%c6, %c0_278] : memref<18x128xf32, #tpu.memory_space<vmem>>, vector<1x128xf32>
    tpu.vector_store %arg33[%c6, %c0_278], %255 {strides = array<i32>} : memref<18x128xf32, #tpu.memory_space<vmem>>, vector<1x128xf32>,
    %258 = vector.extract_strided_slice %248 {offsets = [3, 0], sizes = [1, 128], strides = [1, 1]} : vector<4x128xf32> to vector<1x128xf32>
    %c7 = arith.constant 7 : index
    %c0_279 = arith.constant 0 : index
    %259 = vector.load %arg33[%c7, %c0_279] : memref<18x128xf32, #tpu.memory_space<vmem>>, vector<1x128xf32>
    tpu.vector_store %arg33[%c7, %c0_279], %258 {strides = array<i32>} : memref<18x128xf32, #tpu.memory_space<vmem>>, vector<1x128xf32>,
    %c8 = arith.constant 8 : index
    %c0_280 = arith.constant 0 : index
    %260 = vector.load %arg33[%c8, %c0_280] : memref<18x128xf32, #tpu.memory_space<vmem>>, vector<1x128xf32>
    tpu.vector_store %arg33[%c8, %c0_280], %258 {strides = array<i32>} : memref<18x128xf32, #tpu.memory_space<vmem>>, vector<1x128xf32>,
    %cst_281 = arith.constant 0.000000e+00 : f32
    %261 = vector.broadcast %cst_281 : f32 to vector<1x128xf32>
    %c9_282 = arith.constant 9 : index
    %c0_283 = arith.constant 0 : index
    %262 = vector.load %arg33[%c9_282, %c0_283] : memref<18x128xf32, #tpu.memory_space<vmem>>, vector<1x128xf32>
    tpu.vector_store %arg33[%c9_282, %c0_283], %261 {strides = array<i32>} : memref<18x128xf32, #tpu.memory_space<vmem>>, vector<1x128xf32>,
    %c0_284 = arith.constant 0 : index
    %c0_285 = arith.constant 0 : index
    %263 = vector.load %arg33[%c0_284, %c0_285] : memref<18x128xf32, #tpu.memory_space<vmem>>, vector<8x128xf32>
    %c0_286 = arith.constant 0 : index
    %c0_287 = arith.constant 0 : index
    %c0_288 = arith.constant 0 : index
    %264 = vector.load %arg23[%c0_286, %c0_287, %c0_288] : memref<3x128x128xf32, #tpu.memory_space<vmem>>, vector<1x128x128xf32>
    %265 = vector.shape_cast %264 : vector<1x128x128xf32> to vector<128x128xf32>
    %cst_289 = arith.constant dense<0.000000e+00> : vector<8x128xf32>
    %266 = tpu.matmul %263, %265, %cst_289 {dimension_numbers = #tpu.dot_dimension_numbers<[1], [0], [0], [1], [0, 0, 1, 1], [], []>} : vector<8x128xf32>, vector<128x128xf32>, vector<8x128xf32> -> vector<8x128xf32>
    %c1_290 = arith.constant 1 : index
    %c0_291 = arith.constant 0 : index
    %267 = vector.load %arg33[%c1_290, %c0_291] : memref<18x128xf32, #tpu.memory_space<vmem>>, vector<8x128xf32>
    %c1_292 = arith.constant 1 : index
    %c0_293 = arith.constant 0 : index
    %c0_294 = arith.constant 0 : index
    %268 = vector.load %arg23[%c1_292, %c0_293, %c0_294] : memref<3x128x128xf32, #tpu.memory_space<vmem>>, vector<1x128x128xf32>
    %269 = vector.shape_cast %268 : vector<1x128x128xf32> to vector<128x128xf32>
    %cst_295 = arith.constant dense<0.000000e+00> : vector<8x128xf32>
    %270 = tpu.matmul %267, %269, %cst_295 {dimension_numbers = #tpu.dot_dimension_numbers<[1], [0], [0], [1], [0, 0, 1, 1], [], []>} : vector<8x128xf32>, vector<128x128xf32>, vector<8x128xf32> -> vector<8x128xf32>
    %271 = arith.addf %266, %270 : vector<8x128xf32>
    %c2_296 = arith.constant 2 : index
    %c0_297 = arith.constant 0 : index
    %272 = vector.load %arg33[%c2_296, %c0_297] : memref<18x128xf32, #tpu.memory_space<vmem>>, vector<8x128xf32>
    %c2_298 = arith.constant 2 : index
    %c0_299 = arith.constant 0 : index
    %c0_300 = arith.constant 0 : index
    %273 = vector.load %arg23[%c2_298, %c0_299, %c0_300] : memref<3x128x128xf32, #tpu.memory_space<vmem>>, vector<1x128x128xf32>
    %274 = vector.shape_cast %273 : vector<1x128x128xf32> to vector<128x128xf32>
    %cst_301 = arith.constant dense<0.000000e+00> : vector<8x128xf32>
    %275 = tpu.matmul %272, %274, %cst_301 {dimension_numbers = #tpu.dot_dimension_numbers<[1], [0], [0], [1], [0, 0, 1, 1], [], []>} : vector<8x128xf32>, vector<128x128xf32>, vector<8x128xf32> -> vector<8x128xf32>
    %276 = arith.addf %271, %275 : vector<8x128xf32>
    %c0_302 = arith.constant 0 : index
    %c0_303 = arith.constant 0 : index
    %277 = vector.load %arg24[%c0_302, %c0_303] : memref<1x128xf32, #tpu.memory_space<vmem>>, vector<1x128xf32>
    %278 = vector.broadcast %277 : vector<1x128xf32> to vector<8x128xf32>
    %279 = arith.addf %276, %278 : vector<8x128xf32>
    %cst_304 = arith.constant 0.000000e+00 : f32
    %280 = vector.broadcast %cst_304 : f32 to vector<8x128xf32>
    %281 = arith.maximumf %279, %280 : vector<8x128xf32>
    %c1_305 = arith.constant 1 : index
    %c0_306 = arith.constant 0 : index
    %282 = vector.load %arg33[%c1_305, %c0_306] : memref<18x128xf32, #tpu.memory_space<vmem>>, vector<8x128xf32>
    tpu.vector_store %arg33[%c1_305, %c0_306], %281 {strides = array<i32>} : memref<18x128xf32, #tpu.memory_space<vmem>>, vector<8x128xf32>,
    %cst_307 = arith.constant 0.000000e+00 : f32
    %283 = vector.broadcast %cst_307 : f32 to vector<1x128xf32>
    %c9_308 = arith.constant 9 : index
    %c0_309 = arith.constant 0 : index
    %284 = vector.load %arg33[%c9_308, %c0_309] : memref<18x128xf32, #tpu.memory_space<vmem>>, vector<1x128xf32>
    tpu.vector_store %arg33[%c9_308, %c0_309], %283 {strides = array<i32>} : memref<18x128xf32, #tpu.memory_space<vmem>>, vector<1x128xf32>,
    %c0_310 = arith.constant 0 : index
    %c0_311 = arith.constant 0 : index
    %285 = vector.load %arg33[%c0_310, %c0_311] : memref<18x128xf32, #tpu.memory_space<vmem>>, vector<8x128xf32>
    %c0_312 = arith.constant 0 : index
    %c0_313 = arith.constant 0 : index
    %c0_314 = arith.constant 0 : index
    %286 = vector.load %arg25[%c0_312, %c0_313, %c0_314] : memref<3x128x128xf32, #tpu.memory_space<vmem>>, vector<1x128x128xf32>
    %287 = vector.shape_cast %286 : vector<1x128x128xf32> to vector<128x128xf32>
    %cst_315 = arith.constant dense<0.000000e+00> : vector<8x128xf32>
    %288 = tpu.matmul %285, %287, %cst_315 {dimension_numbers = #tpu.dot_dimension_numbers<[1], [0], [0], [1], [0, 0, 1, 1], [], []>} : vector<8x128xf32>, vector<128x128xf32>, vector<8x128xf32> -> vector<8x128xf32>
    %c1_316 = arith.constant 1 : index
    %c0_317 = arith.constant 0 : index
    %289 = vector.load %arg33[%c1_316, %c0_317] : memref<18x128xf32, #tpu.memory_space<vmem>>, vector<8x128xf32>
    %c1_318 = arith.constant 1 : index
    %c0_319 = arith.constant 0 : index
    %c0_320 = arith.constant 0 : index
    %290 = vector.load %arg25[%c1_318, %c0_319, %c0_320] : memref<3x128x128xf32, #tpu.memory_space<vmem>>, vector<1x128x128xf32>
    %291 = vector.shape_cast %290 : vector<1x128x128xf32> to vector<128x128xf32>
    %cst_321 = arith.constant dense<0.000000e+00> : vector<8x128xf32>
    %292 = tpu.matmul %289, %291, %cst_321 {dimension_numbers = #tpu.dot_dimension_numbers<[1], [0], [0], [1], [0, 0, 1, 1], [], []>} : vector<8x128xf32>, vector<128x128xf32>, vector<8x128xf32> -> vector<8x128xf32>
    %293 = arith.addf %288, %292 : vector<8x128xf32>
    %c2_322 = arith.constant 2 : index
    %c0_323 = arith.constant 0 : index
    %294 = vector.load %arg33[%c2_322, %c0_323] : memref<18x128xf32, #tpu.memory_space<vmem>>, vector<8x128xf32>
    %c2_324 = arith.constant 2 : index
    %c0_325 = arith.constant 0 : index
    %c0_326 = arith.constant 0 : index
    %295 = vector.load %arg25[%c2_324, %c0_325, %c0_326] : memref<3x128x128xf32, #tpu.memory_space<vmem>>, vector<1x128x128xf32>
    %296 = vector.shape_cast %295 : vector<1x128x128xf32> to vector<128x128xf32>
    %cst_327 = arith.constant dense<0.000000e+00> : vector<8x128xf32>
    %297 = tpu.matmul %294, %296, %cst_327 {dimension_numbers = #tpu.dot_dimension_numbers<[1], [0], [0], [1], [0, 0, 1, 1], [], []>} : vector<8x128xf32>, vector<128x128xf32>, vector<8x128xf32> -> vector<8x128xf32>
    %298 = arith.addf %293, %297 : vector<8x128xf32>
    %c0_328 = arith.constant 0 : index
    %c0_329 = arith.constant 0 : index
    %299 = vector.load %arg26[%c0_328, %c0_329] : memref<1x128xf32, #tpu.memory_space<vmem>>, vector<1x128xf32>
    %300 = vector.broadcast %299 : vector<1x128xf32> to vector<8x128xf32>
    %301 = arith.addf %298, %300 : vector<8x128xf32>
    %cst_330 = arith.constant 0.000000e+00 : f32
    %302 = vector.broadcast %cst_330 : f32 to vector<8x128xf32>
    %303 = arith.maximumf %301, %302 : vector<8x128xf32>
    %c1_331 = arith.constant 1 : index
    %c0_332 = arith.constant 0 : index
    %304 = vector.load %arg33[%c1_331, %c0_332] : memref<18x128xf32, #tpu.memory_space<vmem>>, vector<8x128xf32>
    tpu.vector_store %arg33[%c1_331, %c0_332], %303 {strides = array<i32>} : memref<18x128xf32, #tpu.memory_space<vmem>>, vector<8x128xf32>,
    %cst_333 = arith.constant 0.000000e+00 : f32
    %305 = vector.broadcast %cst_333 : f32 to vector<1x128xf32>
    %c9_334 = arith.constant 9 : index
    %c0_335 = arith.constant 0 : index
    %306 = vector.load %arg33[%c9_334, %c0_335] : memref<18x128xf32, #tpu.memory_space<vmem>>, vector<1x128xf32>
    tpu.vector_store %arg33[%c9_334, %c0_335], %305 {strides = array<i32>} : memref<18x128xf32, #tpu.memory_space<vmem>>, vector<1x128xf32>,
    %c0_336 = arith.constant 0 : index
    %c0_337 = arith.constant 0 : index
    %307 = vector.load %arg33[%c0_336, %c0_337] : memref<18x128xf32, #tpu.memory_space<vmem>>, vector<8x128xf32>
    %c0_338 = arith.constant 0 : index
    %c0_339 = arith.constant 0 : index
    %c0_340 = arith.constant 0 : index
    %308 = vector.load %arg27[%c0_338, %c0_339, %c0_340] : memref<3x128x128xf32, #tpu.memory_space<vmem>>, vector<1x128x128xf32>
    %309 = vector.shape_cast %308 : vector<1x128x128xf32> to vector<128x128xf32>
    %cst_341 = arith.constant dense<0.000000e+00> : vector<8x128xf32>
    %310 = tpu.matmul %307, %309, %cst_341 {dimension_numbers = #tpu.dot_dimension_numbers<[1], [0], [0], [1], [0, 0, 1, 1], [], []>} : vector<8x128xf32>, vector<128x128xf32>, vector<8x128xf32> -> vector<8x128xf32>
    %c1_342 = arith.constant 1 : index
    %c0_343 = arith.constant 0 : index
    %311 = vector.load %arg33[%c1_342, %c0_343] : memref<18x128xf32, #tpu.memory_space<vmem>>, vector<8x128xf32>
    %c1_344 = arith.constant 1 : index
    %c0_345 = arith.constant 0 : index
    %c0_346 = arith.constant 0 : index
    %312 = vector.load %arg27[%c1_344, %c0_345, %c0_346] : memref<3x128x128xf32, #tpu.memory_space<vmem>>, vector<1x128x128xf32>
    %313 = vector.shape_cast %312 : vector<1x128x128xf32> to vector<128x128xf32>
    %cst_347 = arith.constant dense<0.000000e+00> : vector<8x128xf32>
    %314 = tpu.matmul %311, %313, %cst_347 {dimension_numbers = #tpu.dot_dimension_numbers<[1], [0], [0], [1], [0, 0, 1, 1], [], []>} : vector<8x128xf32>, vector<128x128xf32>, vector<8x128xf32> -> vector<8x128xf32>
    %315 = arith.addf %310, %314 : vector<8x128xf32>
    %c2_348 = arith.constant 2 : index
    %c0_349 = arith.constant 0 : index
    %316 = vector.load %arg33[%c2_348, %c0_349] : memref<18x128xf32, #tpu.memory_space<vmem>>, vector<8x128xf32>
    %c2_350 = arith.constant 2 : index
    %c0_351 = arith.constant 0 : index
    %c0_352 = arith.constant 0 : index
    %317 = vector.load %arg27[%c2_350, %c0_351, %c0_352] : memref<3x128x128xf32, #tpu.memory_space<vmem>>, vector<1x128x128xf32>
    %318 = vector.shape_cast %317 : vector<1x128x128xf32> to vector<128x128xf32>
    %cst_353 = arith.constant dense<0.000000e+00> : vector<8x128xf32>
    %319 = tpu.matmul %316, %318, %cst_353 {dimension_numbers = #tpu.dot_dimension_numbers<[1], [0], [0], [1], [0, 0, 1, 1], [], []>} : vector<8x128xf32>, vector<128x128xf32>, vector<8x128xf32> -> vector<8x128xf32>
    %320 = arith.addf %315, %319 : vector<8x128xf32>
    %c0_354 = arith.constant 0 : index
    %c0_355 = arith.constant 0 : index
    %321 = vector.load %arg28[%c0_354, %c0_355] : memref<1x128xf32, #tpu.memory_space<vmem>>, vector<1x128xf32>
    %322 = vector.broadcast %321 : vector<1x128xf32> to vector<8x128xf32>
    %323 = arith.addf %320, %322 : vector<8x128xf32>
    %324 = arith.addf %323, %281 : vector<8x128xf32>
    %cst_356 = arith.constant 0.000000e+00 : f32
    %325 = vector.broadcast %cst_356 : f32 to vector<8x128xf32>
    %326 = arith.maximumf %324, %325 : vector<8x128xf32>
    %327 = vector.extract_strided_slice %326 {offsets = [0, 0], sizes = [1, 128], strides = [1, 1]} : vector<8x128xf32> to vector<1x128xf32>
    %c1_357 = arith.constant 1 : index
    %c0_358 = arith.constant 0 : index
    %328 = vector.load %arg33[%c1_357, %c0_358] : memref<18x128xf32, #tpu.memory_space<vmem>>, vector<1x128xf32>
    tpu.vector_store %arg33[%c1_357, %c0_358], %327 {strides = array<i32>} : memref<18x128xf32, #tpu.memory_space<vmem>>, vector<1x128xf32>,
    %c2_359 = arith.constant 2 : index
    %c0_360 = arith.constant 0 : index
    %329 = vector.load %arg33[%c2_359, %c0_360] : memref<18x128xf32, #tpu.memory_space<vmem>>, vector<1x128xf32>
    tpu.vector_store %arg33[%c2_359, %c0_360], %327 {strides = array<i32>} : memref<18x128xf32, #tpu.memory_space<vmem>>, vector<1x128xf32>,
    %330 = vector.extract_strided_slice %326 {offsets = [1, 0], sizes = [1, 128], strides = [1, 1]} : vector<8x128xf32> to vector<1x128xf32>
    %c3_361 = arith.constant 3 : index
    %c0_362 = arith.constant 0 : index
    %331 = vector.load %arg33[%c3_361, %c0_362] : memref<18x128xf32, #tpu.memory_space<vmem>>, vector<1x128xf32>
    tpu.vector_store %arg33[%c3_361, %c0_362], %330 {strides = array<i32>} : memref<18x128xf32, #tpu.memory_space<vmem>>, vector<1x128xf32>,
    %c4_363 = arith.constant 4 : index
    %c0_364 = arith.constant 0 : index
    %332 = vector.load %arg33[%c4_363, %c0_364] : memref<18x128xf32, #tpu.memory_space<vmem>>, vector<1x128xf32>
    tpu.vector_store %arg33[%c4_363, %c0_364], %330 {strides = array<i32>} : memref<18x128xf32, #tpu.memory_space<vmem>>, vector<1x128xf32>,
    %333 = vector.extract_strided_slice %326 {offsets = [2, 0], sizes = [1, 128], strides = [1, 1]} : vector<8x128xf32> to vector<1x128xf32>
    %c5_365 = arith.constant 5 : index
    %c0_366 = arith.constant 0 : index
    %334 = vector.load %arg33[%c5_365, %c0_366] : memref<18x128xf32, #tpu.memory_space<vmem>>, vector<1x128xf32>
    tpu.vector_store %arg33[%c5_365, %c0_366], %333 {strides = array<i32>} : memref<18x128xf32, #tpu.memory_space<vmem>>, vector<1x128xf32>,
    %c6_367 = arith.constant 6 : index
    %c0_368 = arith.constant 0 : index
    %335 = vector.load %arg33[%c6_367, %c0_368] : memref<18x128xf32, #tpu.memory_space<vmem>>, vector<1x128xf32>
    tpu.vector_store %arg33[%c6_367, %c0_368], %333 {strides = array<i32>} : memref<18x128xf32, #tpu.memory_space<vmem>>, vector<1x128xf32>,
    %336 = vector.extract_strided_slice %326 {offsets = [3, 0], sizes = [1, 128], strides = [1, 1]} : vector<8x128xf32> to vector<1x128xf32>
    %c7_369 = arith.constant 7 : index
    %c0_370 = arith.constant 0 : index
    %337 = vector.load %arg33[%c7_369, %c0_370] : memref<18x128xf32, #tpu.memory_space<vmem>>, vector<1x128xf32>
    tpu.vector_store %arg33[%c7_369, %c0_370], %336 {strides = array<i32>} : memref<18x128xf32, #tpu.memory_space<vmem>>, vector<1x128xf32>,
    %c8_371 = arith.constant 8 : index
    %c0_372 = arith.constant 0 : index
    %338 = vector.load %arg33[%c8_371, %c0_372] : memref<18x128xf32, #tpu.memory_space<vmem>>, vector<1x128xf32>
    tpu.vector_store %arg33[%c8_371, %c0_372], %336 {strides = array<i32>} : memref<18x128xf32, #tpu.memory_space<vmem>>, vector<1x128xf32>,
    %339 = vector.extract_strided_slice %326 {offsets = [4, 0], sizes = [1, 128], strides = [1, 1]} : vector<8x128xf32> to vector<1x128xf32>
    %c9_373 = arith.constant 9 : index
    %c0_374 = arith.constant 0 : index
    %340 = vector.load %arg33[%c9_373, %c0_374] : memref<18x128xf32, #tpu.memory_space<vmem>>, vector<1x128xf32>
    tpu.vector_store %arg33[%c9_373, %c0_374], %339 {strides = array<i32>} : memref<18x128xf32, #tpu.memory_space<vmem>>, vector<1x128xf32>,
    %c10 = arith.constant 10 : index
    %c0_375 = arith.constant 0 : index
    %341 = vector.load %arg33[%c10, %c0_375] : memref<18x128xf32, #tpu.memory_space<vmem>>, vector<1x128xf32>
    tpu.vector_store %arg33[%c10, %c0_375], %339 {strides = array<i32>} : memref<18x128xf32, #tpu.memory_space<vmem>>, vector<1x128xf32>,
    %342 = vector.extract_strided_slice %326 {offsets = [5, 0], sizes = [1, 128], strides = [1, 1]} : vector<8x128xf32> to vector<1x128xf32>
    %c11 = arith.constant 11 : index
    %c0_376 = arith.constant 0 : index
    %343 = vector.load %arg33[%c11, %c0_376] : memref<18x128xf32, #tpu.memory_space<vmem>>, vector<1x128xf32>
    tpu.vector_store %arg33[%c11, %c0_376], %342 {strides = array<i32>} : memref<18x128xf32, #tpu.memory_space<vmem>>, vector<1x128xf32>,
    %c12 = arith.constant 12 : index
    %c0_377 = arith.constant 0 : index
    %344 = vector.load %arg33[%c12, %c0_377] : memref<18x128xf32, #tpu.memory_space<vmem>>, vector<1x128xf32>
    tpu.vector_store %arg33[%c12, %c0_377], %342 {strides = array<i32>} : memref<18x128xf32, #tpu.memory_space<vmem>>, vector<1x128xf32>,
    %345 = vector.extract_strided_slice %326 {offsets = [6, 0], sizes = [1, 128], strides = [1, 1]} : vector<8x128xf32> to vector<1x128xf32>
    %c13 = arith.constant 13 : index
    %c0_378 = arith.constant 0 : index
    %346 = vector.load %arg33[%c13, %c0_378] : memref<18x128xf32, #tpu.memory_space<vmem>>, vector<1x128xf32>
    tpu.vector_store %arg33[%c13, %c0_378], %345 {strides = array<i32>} : memref<18x128xf32, #tpu.memory_space<vmem>>, vector<1x128xf32>,
    %c14 = arith.constant 14 : index
    %c0_379 = arith.constant 0 : index
    %347 = vector.load %arg33[%c14, %c0_379] : memref<18x128xf32, #tpu.memory_space<vmem>>, vector<1x128xf32>
    tpu.vector_store %arg33[%c14, %c0_379], %345 {strides = array<i32>} : memref<18x128xf32, #tpu.memory_space<vmem>>, vector<1x128xf32>,
    %348 = vector.extract_strided_slice %326 {offsets = [7, 0], sizes = [1, 128], strides = [1, 1]} : vector<8x128xf32> to vector<1x128xf32>
    %c15 = arith.constant 15 : index
    %c0_380 = arith.constant 0 : index
    %349 = vector.load %arg33[%c15, %c0_380] : memref<18x128xf32, #tpu.memory_space<vmem>>, vector<1x128xf32>
    tpu.vector_store %arg33[%c15, %c0_380], %348 {strides = array<i32>} : memref<18x128xf32, #tpu.memory_space<vmem>>, vector<1x128xf32>,
    %c16 = arith.constant 16 : index
    %c0_381 = arith.constant 0 : index
    %350 = vector.load %arg33[%c16, %c0_381] : memref<18x128xf32, #tpu.memory_space<vmem>>, vector<1x128xf32>
    tpu.vector_store %arg33[%c16, %c0_381], %348 {strides = array<i32>} : memref<18x128xf32, #tpu.memory_space<vmem>>, vector<1x128xf32>,
    %cst_382 = arith.constant 0.000000e+00 : f32
    %351 = vector.broadcast %cst_382 : f32 to vector<1x128xf32>
    %c17_383 = arith.constant 17 : index
    %c0_384 = arith.constant 0 : index
    %352 = vector.load %arg33[%c17_383, %c0_384] : memref<18x128xf32, #tpu.memory_space<vmem>>, vector<1x128xf32>
    tpu.vector_store %arg33[%c17_383, %c0_384], %351 {strides = array<i32>} : memref<18x128xf32, #tpu.memory_space<vmem>>, vector<1x128xf32>,
    %c0_385 = arith.constant 0 : index
    %c0_386 = arith.constant 0 : index
    %353 = vector.load %arg33[%c0_385, %c0_386] : memref<18x128xf32, #tpu.memory_space<vmem>>, vector<16x128xf32>
    %c0_387 = arith.constant 0 : index
    %c0_388 = arith.constant 0 : index
    %c0_389 = arith.constant 0 : index
    %354 = vector.load %arg29[%c0_387, %c0_388, %c0_389] : memref<3x128x128xf32, #tpu.memory_space<vmem>>, vector<1x128x128xf32>
    %355 = vector.shape_cast %354 : vector<1x128x128xf32> to vector<128x128xf32>
    %cst_390 = arith.constant dense<0.000000e+00> : vector<16x128xf32>
    %356 = tpu.matmul %353, %355, %cst_390 {dimension_numbers = #tpu.dot_dimension_numbers<[1], [0], [0], [1], [0, 0, 1, 1], [], []>} : vector<16x128xf32>, vector<128x128xf32>, vector<16x128xf32> -> vector<16x128xf32>
    %c1_391 = arith.constant 1 : index
    %c0_392 = arith.constant 0 : index
    %357 = vector.load %arg33[%c1_391, %c0_392] : memref<18x128xf32, #tpu.memory_space<vmem>>, vector<16x128xf32>
    %c1_393 = arith.constant 1 : index
    %c0_394 = arith.constant 0 : index
    %c0_395 = arith.constant 0 : index
    %358 = vector.load %arg29[%c1_393, %c0_394, %c0_395] : memref<3x128x128xf32, #tpu.memory_space<vmem>>, vector<1x128x128xf32>
    %359 = vector.shape_cast %358 : vector<1x128x128xf32> to vector<128x128xf32>
    %cst_396 = arith.constant dense<0.000000e+00> : vector<16x128xf32>
    %360 = tpu.matmul %357, %359, %cst_396 {dimension_numbers = #tpu.dot_dimension_numbers<[1], [0], [0], [1], [0, 0, 1, 1], [], []>} : vector<16x128xf32>, vector<128x128xf32>, vector<16x128xf32> -> vector<16x128xf32>
    %361 = arith.addf %356, %360 : vector<16x128xf32>
    %c2_397 = arith.constant 2 : index
    %c0_398 = arith.constant 0 : index
    %362 = vector.load %arg33[%c2_397, %c0_398] : memref<18x128xf32, #tpu.memory_space<vmem>>, vector<16x128xf32>
    %c2_399 = arith.constant 2 : index
    %c0_400 = arith.constant 0 : index
    %c0_401 = arith.constant 0 : index
    %363 = vector.load %arg29[%c2_399, %c0_400, %c0_401] : memref<3x128x128xf32, #tpu.memory_space<vmem>>, vector<1x128x128xf32>
    %364 = vector.shape_cast %363 : vector<1x128x128xf32> to vector<128x128xf32>
    %cst_402 = arith.constant dense<0.000000e+00> : vector<16x128xf32>
    %365 = tpu.matmul %362, %364, %cst_402 {dimension_numbers = #tpu.dot_dimension_numbers<[1], [0], [0], [1], [0, 0, 1, 1], [], []>} : vector<16x128xf32>, vector<128x128xf32>, vector<16x128xf32> -> vector<16x128xf32>
    %366 = arith.addf %361, %365 : vector<16x128xf32>
    %c0_403 = arith.constant 0 : index
    %c0_404 = arith.constant 0 : index
    %367 = vector.load %arg30[%c0_403, %c0_404] : memref<1x128xf32, #tpu.memory_space<vmem>>, vector<1x128xf32>
    %368 = vector.broadcast %367 : vector<1x128xf32> to vector<16x128xf32>
    %369 = arith.addf %366, %368 : vector<16x128xf32>
    %370 = arith.negf %369 : vector<16x128xf32>
    %371 = math.exp %370 : vector<16x128xf32>
    %cst_405 = arith.constant 1.000000e+00 : f32
    %372 = vector.broadcast %cst_405 : f32 to vector<16x128xf32>
    %373 = arith.addf %372, %371 : vector<16x128xf32>
    %374 = arith.divf %372, %373 : vector<16x128xf32>
    %c0_406 = arith.constant 0 : index
    %c0_407 = arith.constant 0 : index
    %c0_408 = arith.constant 0 : index
    %375 = vector.load %arg31[%c0_406, %c0_407, %c0_408] : memref<1x16x128xf32, #tpu.memory_space<vmem>>, vector<1x16x128xf32>
    %376 = vector.shape_cast %375 : vector<1x16x128xf32> to vector<16x128xf32>
    %377 = vector.shape_cast %374 : vector<16x128xf32> to vector<1x16x128xf32>
    tpu.vector_store %arg31[%c0_406, %c0_407, %c0_408], %377 {strides = array<i32>} : memref<1x16x128xf32, #tpu.memory_space<vmem>>, vector<1x16x128xf32>,
    return
  }
  func.func @transform_0(%arg0: i32) -> (i32, i32, i32) {
    %c0_i32 = arith.constant 0 : i32
    %c0_i32_0 = arith.constant 0 : i32
    %c0_i32_1 = arith.constant 0 : i32
    return %arg0, %c0_i32, %c0_i32_0 : i32, i32, i32
  }
  func.func @transform_1(%arg0: i32) -> (i32, i32, i32) {
    %c0_i32 = arith.constant 0 : i32
    %c0_i32_0 = arith.constant 0 : i32
    %c0_i32_1 = arith.constant 0 : i32
    return %arg0, %c0_i32, %c0_i32_0 : i32, i32, i32
  }
  func.func @transform_2(%arg0: i32) -> (i32, i32, i32) {
    %c0_i32 = arith.constant 0 : i32
    %c0_i32_0 = arith.constant 0 : i32
    %c0_i32_1 = arith.constant 0 : i32
    %c0_i32_2 = arith.constant 0 : i32
    return %c0_i32, %c0_i32_0, %c0_i32_1 : i32, i32, i32
  }
  func.func @transform_3(%arg0: i32) -> (i32, i32) {
    %c0_i32 = arith.constant 0 : i32
    %c0_i32_0 = arith.constant 0 : i32
    %c0_i32_1 = arith.constant 0 : i32
    return %c0_i32, %c0_i32_0 : i32, i32
  }
  func.func @transform_4(%arg0: i32) -> (i32, i32, i32) {
    %c0_i32 = arith.constant 0 : i32
    %c0_i32_0 = arith.constant 0 : i32
    %c0_i32_1 = arith.constant 0 : i32
    %c0_i32_2 = arith.constant 0 : i32
    return %c0_i32, %c0_i32_0, %c0_i32_1 : i32, i32, i32
  }
  func.func @transform_5(%arg0: i32) -> (i32, i32) {
    %c0_i32 = arith.constant 0 : i32
    %c0_i32_0 = arith.constant 0 : i32
    %c0_i32_1 = arith.constant 0 : i32
    return %c0_i32, %c0_i32_0 : i32, i32
  }
  func.func @transform_6(%arg0: i32) -> (i32, i32, i32) {
    %c0_i32 = arith.constant 0 : i32
    %c0_i32_0 = arith.constant 0 : i32
    %c0_i32_1 = arith.constant 0 : i32
    %c0_i32_2 = arith.constant 0 : i32
    return %c0_i32, %c0_i32_0, %c0_i32_1 : i32, i32, i32
  }
  func.func @transform_7(%arg0: i32) -> (i32, i32) {
    %c0_i32 = arith.constant 0 : i32
    %c0_i32_0 = arith.constant 0 : i32
    %c0_i32_1 = arith.constant 0 : i32
    return %c0_i32, %c0_i32_0 : i32, i32
  }
  func.func @transform_8(%arg0: i32) -> (i32, i32, i32) {
    %c0_i32 = arith.constant 0 : i32
    %c0_i32_0 = arith.constant 0 : i32
    %c0_i32_1 = arith.constant 0 : i32
    %c0_i32_2 = arith.constant 0 : i32
    return %c0_i32, %c0_i32_0, %c0_i32_1 : i32, i32, i32
  }
  func.func @transform_9(%arg0: i32) -> (i32, i32) {
    %c0_i32 = arith.constant 0 : i32
    %c0_i32_0 = arith.constant 0 : i32
    %c0_i32_1 = arith.constant 0 : i32
    return %c0_i32, %c0_i32_0 : i32, i32
  }
  func.func @transform_10(%arg0: i32) -> (i32, i32, i32) {
    %c0_i32 = arith.constant 0 : i32
    %c0_i32_0 = arith.constant 0 : i32
    %c0_i32_1 = arith.constant 0 : i32
    %c0_i32_2 = arith.constant 0 : i32
    return %c0_i32, %c0_i32_0, %c0_i32_1 : i32, i32, i32
  }
  func.func @transform_11(%arg0: i32) -> (i32, i32) {
    %c0_i32 = arith.constant 0 : i32
    %c0_i32_0 = arith.constant 0 : i32
    %c0_i32_1 = arith.constant 0 : i32
    return %c0_i32, %c0_i32_0 : i32, i32
  }
  func.func @transform_12(%arg0: i32) -> (i32, i32, i32) {
    %c0_i32 = arith.constant 0 : i32
    %c0_i32_0 = arith.constant 0 : i32
    %c0_i32_1 = arith.constant 0 : i32
    %c0_i32_2 = arith.constant 0 : i32
    return %c0_i32, %c0_i32_0, %c0_i32_1 : i32, i32, i32
  }
  func.func @transform_13(%arg0: i32) -> (i32, i32) {
    %c0_i32 = arith.constant 0 : i32
    %c0_i32_0 = arith.constant 0 : i32
    %c0_i32_1 = arith.constant 0 : i32
    return %c0_i32, %c0_i32_0 : i32, i32
  }
  func.func @transform_14(%arg0: i32) -> (i32, i32, i32) {
    %c0_i32 = arith.constant 0 : i32
    %c0_i32_0 = arith.constant 0 : i32
    %c0_i32_1 = arith.constant 0 : i32
    %c0_i32_2 = arith.constant 0 : i32
    return %c0_i32, %c0_i32_0, %c0_i32_1 : i32, i32, i32
  }
  func.func @transform_15(%arg0: i32) -> (i32, i32) {
    %c0_i32 = arith.constant 0 : i32
    %c0_i32_0 = arith.constant 0 : i32
    %c0_i32_1 = arith.constant 0 : i32
    return %c0_i32, %c0_i32_0 : i32, i32
  }
  func.func @transform_16(%arg0: i32) -> (i32, i32, i32) {
    %c0_i32 = arith.constant 0 : i32
    %c0_i32_0 = arith.constant 0 : i32
    %c0_i32_1 = arith.constant 0 : i32
    %c0_i32_2 = arith.constant 0 : i32
    return %c0_i32, %c0_i32_0, %c0_i32_1 : i32, i32, i32
  }
  func.func @transform_17(%arg0: i32) -> (i32, i32) {
    %c0_i32 = arith.constant 0 : i32
    %c0_i32_0 = arith.constant 0 : i32
    %c0_i32_1 = arith.constant 0 : i32
    return %c0_i32, %c0_i32_0 : i32, i32
  }
  func.func @transform_18(%arg0: i32) -> (i32, i32, i32) {
    %c0_i32 = arith.constant 0 : i32
    %c0_i32_0 = arith.constant 0 : i32
    %c0_i32_1 = arith.constant 0 : i32
    %c0_i32_2 = arith.constant 0 : i32
    return %c0_i32, %c0_i32_0, %c0_i32_1 : i32, i32, i32
  }
  func.func @transform_19(%arg0: i32) -> (i32, i32) {
    %c0_i32 = arith.constant 0 : i32
    %c0_i32_0 = arith.constant 0 : i32
    %c0_i32_1 = arith.constant 0 : i32
    return %c0_i32, %c0_i32_0 : i32, i32
  }
  func.func @transform_20(%arg0: i32) -> (i32, i32, i32) {
    %c0_i32 = arith.constant 0 : i32
    %c0_i32_0 = arith.constant 0 : i32
    %c0_i32_1 = arith.constant 0 : i32
    %c0_i32_2 = arith.constant 0 : i32
    return %c0_i32, %c0_i32_0, %c0_i32_1 : i32, i32, i32
  }
  func.func @transform_21(%arg0: i32) -> (i32, i32) {
    %c0_i32 = arith.constant 0 : i32
    %c0_i32_0 = arith.constant 0 : i32
    %c0_i32_1 = arith.constant 0 : i32
    return %c0_i32, %c0_i32_0 : i32, i32
  }
  func.func @transform_22(%arg0: i32) -> (i32, i32, i32) {
    %c0_i32 = arith.constant 0 : i32
    %c0_i32_0 = arith.constant 0 : i32
    %c0_i32_1 = arith.constant 0 : i32
    %c0_i32_2 = arith.constant 0 : i32
    return %c0_i32, %c0_i32_0, %c0_i32_1 : i32, i32, i32
  }
  func.func @transform_23(%arg0: i32) -> (i32, i32) {
    %c0_i32 = arith.constant 0 : i32
    %c0_i32_0 = arith.constant 0 : i32
    %c0_i32_1 = arith.constant 0 : i32
    return %c0_i32, %c0_i32_0 : i32, i32
  }
  func.func @transform_24(%arg0: i32) -> (i32, i32, i32) {
    %c0_i32 = arith.constant 0 : i32
    %c0_i32_0 = arith.constant 0 : i32
    %c0_i32_1 = arith.constant 0 : i32
    %c0_i32_2 = arith.constant 0 : i32
    return %c0_i32, %c0_i32_0, %c0_i32_1 : i32, i32, i32
  }
  func.func @transform_25(%arg0: i32) -> (i32, i32) {
    %c0_i32 = arith.constant 0 : i32
    %c0_i32_0 = arith.constant 0 : i32
    %c0_i32_1 = arith.constant 0 : i32
    return %c0_i32, %c0_i32_0 : i32, i32
  }
  func.func @transform_26(%arg0: i32) -> (i32, i32, i32) {
    %c0_i32 = arith.constant 0 : i32
    %c0_i32_0 = arith.constant 0 : i32
    %c0_i32_1 = arith.constant 0 : i32
    %c0_i32_2 = arith.constant 0 : i32
    return %c0_i32, %c0_i32_0, %c0_i32_1 : i32, i32, i32
  }
  func.func @transform_27(%arg0: i32) -> (i32, i32) {
    %c0_i32 = arith.constant 0 : i32
    %c0_i32_0 = arith.constant 0 : i32
    %c0_i32_1 = arith.constant 0 : i32
    return %c0_i32, %c0_i32_0 : i32, i32
  }
  func.func @transform_28(%arg0: i32) -> (i32, i32, i32) {
    %c0_i32 = arith.constant 0 : i32
    %c0_i32_0 = arith.constant 0 : i32
    %c0_i32_1 = arith.constant 0 : i32
    %c0_i32_2 = arith.constant 0 : i32
    return %c0_i32, %c0_i32_0, %c0_i32_1 : i32, i32, i32
  }
  func.func @transform_29(%arg0: i32) -> (i32, i32) {
    %c0_i32 = arith.constant 0 : i32
    %c0_i32_0 = arith.constant 0 : i32
    %c0_i32_1 = arith.constant 0 : i32
    return %c0_i32, %c0_i32_0 : i32, i32
  }
  func.func @transform_30(%arg0: i32) -> (i32, i32, i32) {
    %c0_i32 = arith.constant 0 : i32
    %c0_i32_0 = arith.constant 0 : i32
    %c0_i32_1 = arith.constant 0 : i32
    return %arg0, %c0_i32, %c0_i32_0 : i32, i32, i32
  }
  func.func @transform_31(%arg0: i32) -> (i32, i32, i32) {
    %c0_i32 = arith.constant 0 : i32
    %c0_i32_0 = arith.constant 0 : i32
    %c0_i32_1 = arith.constant 0 : i32
    return %arg0, %c0_i32, %c0_i32_0 : i32, i32, i32
  }
}

</mosaic_0001>

<bundles_post_ra>
// kernel: camera_vae_forward.1
= control target key start
LH: loop header
LB: loop body
LE: loop exit
PB: predicated region body
PF: predicated region fallthrough
CT: control target
= control target key end

     0   :  { %s9132_s6 = smov 1   ;;  %s9133_s10 = smov 2   ;;  %s10182_s0 = inlined_call_operand.smem [shape: u32[32], index: -1, kind: input, shape index: {}] }
   0x1   :  { %s9188_s5 = sld [smem:[%s10182_s0]]   ;;  %s9134_s14 = smov 3  }
   0x2   :  { %s9193_s9 = sld [smem:[%s10182_s0 + %s9132_s6]]   ;;  %s9135_s18 = smov 4  }
   0x3   :  { %s9198_s13 = sld [smem:[%s10182_s0 + %s9133_s10]]   ;;  %s9136_s22 = smov 5  }
   0x4   :  { %s9203_s17 = sld [smem:[%s10182_s0 + %s9134_s14]]   ;;  %s9137_s26 = smov 6  }
   0x5   :  { %s9208_s21 = sld [smem:[%s10182_s0 + %s9135_s18]]   ;;  %s9138_s30 = smov 7  }
   0x6   :  { %s9213_s25 = sld [smem:[%s10182_s0 + %s9136_s22]]   ;;  %s9139_s4 = smov 8  }
   0x7   :  { %s9218_s29 = sld [smem:[%s10182_s0 + %s9137_s26]]   ;;  %s9140_s10 = smov 9  }
   0x8   :  { %10189 = sst [smem:[#allocation25_spill]] %s9193_s9  ;;  %s9141_s15 = smov 10  }
   0x9   :  { %s9223_s3 = sld [smem:[%s10182_s0 + %s9138_s30]]   ;;  %s9142_s20 = smov 11  }
   0xa   :  { %s9228_s8 = sld [smem:[%s10182_s0 + %s9139_s4]]   ;;  %s9143_s26 = smov 12  }
   0xb   :  { %s9233_s14 = sld [smem:[%s10182_s0 + %s9140_s10]]   ;;  %s9144_s1 = smov 13  }
   0xc   :  { %s9238_s19 = sld [smem:[%s10182_s0 + %s9141_s15]]   ;;  %s9145_s7 = smov 14  }
   0xd   :  { %s9243_s24 = sld [smem:[%s10182_s0 + %s9142_s20]]   ;;  %s9146_s15 = smov 15  }
   0xe   :  { %s9248_s30 = sld [smem:[%s10182_s0 + %s9143_s26]]   ;;  %s9147_s22 = smov 16  }
   0xf   :  { %10190 = sst [smem:[#allocation26_spill]] %s9223_s3  ;;  %s9148_s28 = smov 17  }
  0x10   :  { %10191 = sst [smem:[#allocation27_spill]] %s9228_s8 }
  0x11   :  { %10192 = sst [smem:[#allocation28_spill]] %s9233_s14 }
  0x12   :  { %s9253_s6 = sld [smem:[%s10182_s0 + %s9144_s1]]  }
  0x13   :  { %10193 = sst [smem:[#allocation29_spill]] %s9243_s24 }
  0x14   :  { %s9258_s12 = sld [smem:[%s10182_s0 + %s9145_s7]]   ;;  %s9149_s7 = smov 18  }
  0x15   :  { %s9263_s20 = sld [smem:[%s10182_s0 + %s9146_s15]]   ;;  %s9150_s15 = smov 19  }
  0x16   :  { %s9268_s27 = sld [smem:[%s10182_s0 + %s9147_s22]]   ;;  %s9151_s22 = smov 20  }
  0x17   :  { %s9273_s4 = sld [smem:[%s10182_s0 + %s9148_s28]]   ;;  %s9152_s28 = smov 21  }
  0x18   :  { %10194 = sst [smem:[#allocation30_spill]] %s9253_s6 }
  0x19   :  { %s9278_s6 = sld [smem:[%s10182_s0 + %s9149_s7]]   ;;  %s9153_s7 = smov 22  }
  0x1a   :  { %10195 = sst [smem:[#allocation31_spill]] %s9258_s12 }
  0x1b   :  { %10196 = sst [smem:[#allocation32_spill]] %s9263_s20 }
  0x1c   :  { %10197 = sst [smem:[#allocation33_spill]] %s9268_s27 }
  0x1d   :  { %10198 = sst [smem:[#allocation34_spill]] %s9273_s4 }
  0x1e   :  { %s9283_s20 = sld [smem:[%s10182_s0 + %s9150_s15]]   ;;  %s9154_s15 = smov 23  }
  0x1f   :  { %s9288_s27 = sld [smem:[%s10182_s0 + %s9151_s22]]   ;;  %s9155_s22 = smov 24  }
  0x20   :  { %s9293_s4 = sld [smem:[%s10182_s0 + %s9152_s28]]   ;;  %s9156_s28 = smov 25  }
  0x21   :  { %s9298_s9 = sld [smem:[%s10182_s0 + %s9153_s7]]   ;;  %s9157_s7 = smov 26  }
  0x22   :  { %s9308_s12 = sld [smem:[%s10182_s0 + %s9155_s22]]   ;;  %s9159_s22 = smov 28  }
  0x23   :  { %s9318_s24 = sld [smem:[%s10182_s0 + %s9157_s7]]   ;;  %s9161_s7 = smov 30  }
  0x24   :  { %10199 = sst [smem:[#allocation35_spill]] %s9283_s20 }
  0x25   :  { %s9303_s20 = sld [smem:[%s10182_s0 + %s9154_s15]]   ;;  %s9158_s15 = smov 27  }
  0x26   :  { %10200 = sst [smem:[#allocation36_spill]] %s9293_s4 }
  0x27   :  { %s9313_s4 = sld [smem:[%s10182_s0 + %s9156_s28]]   ;;  %s9160_s28 = smov 29  }
  0x28   :  { %s9328_s14 = sld [smem:[%s10182_s0 + %s9159_s22]]  }
  0x29   :  { %s9338_s3 = sld [smem:[%s10182_s0 + %s9161_s7]]  }
  0x2b   :  { %10201 = sst [smem:[#allocation37_spill]] %s9303_s20 }
  0x2c   :  { %s9323_s20 = sld [smem:[%s10182_s0 + %s9158_s15]]   ;;  %s9162_s15 = smov 31  }
  0x2d   :  { %10202 = sst [smem:[#allocation38_spill]] %s9313_s4 }
  0x2e   :  { %s9333_s4 = sld [smem:[%s10182_s0 + %s9160_s28]]  }
  0x32   :  { %10203 = sst [smem:[#allocation39_spill]] %s9323_s20 }
  0x33   :  { %s9343_s20 = sld [smem:[%s10182_s0 + %s9162_s15]]  }
  0x34   :  { %69 = vsyncpa [#allocation4], 0 }
  0x35   :  { %70 = vsyncpa [#allocation6], 0 }
  0x36   :  { %71 = vsyncpa [#allocation9], 0 }
  0x37   :  { %72 = vsyncpa [#allocation12], 0 }
  0x38   :  { %73 = vsyncpa [#allocation15], 0 }
  0x39   :  { %74 = vsyncpa [#allocation18], 0  ;;  %s9345_s22 = smov 0  }
  0x3a LB: > { %s10204_s8 = sld [smem:[#allocation27_spill]]  ;;  %s9351_s23 = sadd.s32 4294967295, %s9130_s22   ;;  %s9130_s22 = sphi %s9345_s22, %s80_s22  }
  0x3b   : > { %p5393_p0 = scmp.ge.s32.totalorder %s9130_s22, 1  ;;  %p777_p1 = scmp.lt.s32.totalorder %s9130_s22, 3 }
  0x3c   : > { %p10186_p2 = scmp.eq.s32.totalorder %s9351_s23, 0  ;;  %s9163_s26 = smov [#allocation5]  }
  0x3d   : > { %p9356_p3 = pnand %p5393_p0, %p777_p1  ;;  %s817_s28 = sshll.u32 %s9163_s26, 4  ;;  %s9360_s28 = int_to_ptr.vmem [resolvable:$true] %s817_s28 }
  0x3e   : > { %s9164_s1 = smov [#allocation8]   ;;  %s9165_s10 = smov [#allocation11]  }
  0x3f   : > { %s10205_s0 = scalar_select %p9356_p3, 1, 0 }
  0x40   : > { %p8703_p4 = pneg %p9356_p3  ;;  %s849_s2 = sshll.u32 %s9164_s1, 4  ;;  %s9364_s2 = int_to_ptr.vmem [resolvable:$true] %s849_s2 }
  0x41   : > { %s893_s11 = sshll.u32 %s9165_s10, 4  ;;  %s9166_s15 = smov [#allocation14]   ;;  %s9372_s11 = int_to_ptr.vmem [resolvable:$true] %s893_s11 }
  0x42   : > { %p9368_p5 = pnand %p10186_p2, %p8703_p4  ;;  %s9374_s16 = sshll.u32 %s9166_s15, 4  ;;  %s926_s16 = int_to_ptr.vmem [resolvable:$true] %s9374_s16 }
  0x43   : > { %s8820_s18 = scalar_lea.hbm %s10204_s8, 6144 }
  0x44   : > { %p8821_p6 = scmp.ne.s32.totalorder %s10204_s8, %s8820_s18  ;;  %p9380_p7 = pneg %p9368_p5 }
  0x45   : > { %p8827_p10 = scmp.lt.u32.totalorder %s8820_s18, %s10204_s8 }
  0x46   : > { %p8823_p8 = pnand %p9380_p7, %p8821_p6 }
  0x48   : > { %p8824_p9 = pneg %p8823_p8 }
  0x4a   : > { %p8829_p11 = pnand %p8827_p10, %p8824_p9 }
  0x4c   : > { %8832 = shalt.err (!%p8829_p11)
}
  0x4d   : > { %s8833_s1 = scalar_lea.vmem %s9360_s28, 6144  ;;  %p8841_p1 = scmp.lt.s32.totalorder %s9360_s28, %s9360_s28 }
  0x4e   : > { %p8834_p12 = scmp.ne.s32.totalorder %s9360_s28, %s8833_s1  ;;  %p8842_p4 = scmp.lt.s32.totalorder %s8833_s1, %s8833_s1 }
  0x50   : > { %p8836_p13 = pnand %p8834_p12, %p9380_p7  ;;  %p8843_p2 = por %p8842_p4, %p8841_p1 }
  0x52   : > { %p8837_p0 = pneg %p8836_p13 }
  0x54   : > { %p8844_p3 = pnand %p8843_p2, %p8837_p0 }
  0x56   : > { %8847 = shalt.err (!%p8844_p3)
}
  0x57   : > { %s9167_s10 = smov 128   ;;  %s9168_s15 = smov 8  }
  0x58   : > { %8709 = dma.hbm_to_vmem [thread:$0]  (!%p9368_p5), %s10204_s8, 6144, %s9360_s28, [#allocation6], %s9167_s10, %s9167_s10, %s9168_s15  }
  0x59   : > { %s8848_s18 = scalar_lea.hbm %s9248_s30, 6144 }
  0x5a   : > { %p8849_p6 = scmp.ne.s32.totalorder %s9248_s30, %s8848_s18  ;;  %p8855_p3 = scmp.lt.u32.totalorder %s8848_s18, %s9248_s30 }
  0x5c   : > { %p8851_p8 = pnand %p8849_p6, %p9380_p7 }
  0x5e   : > { %p8852_p2 = pneg %p8851_p8 }
  0x60   : > { %p8857_p9 = pnand %p8855_p3, %p8852_p2 }
  0x62   : > { %8860 = shalt.err (!%p8857_p9)
}
  0x63   : > { %s8861_s1 = scalar_lea.vmem %s9364_s2, 6144  ;;  %p8869_p13 = scmp.lt.s32.totalorder %s9364_s2, %s9364_s2 }
  0x64   : > { %p8862_p10 = scmp.ne.s32.totalorder %s9364_s2, %s8861_s1  ;;  %p8870_p0 = scmp.lt.s32.totalorder %s8861_s1, %s8861_s1 }
  0x66   : > { %p8864_p11 = pnand %p8862_p10, %p9380_p7  ;;  %p8871_p1 = por %p8870_p0, %p8869_p13 }
  0x68   : > { %p8865_p12 = pneg %p8864_p11 }
  0x6a   : > { %p8872_p4 = pnand %p8871_p1, %p8865_p12 }
  0x6c   : > { %8875 = shalt.err (!%p8872_p4)
}
  0x6d   : > { %8715 = dma.hbm_to_vmem [thread:$0]  (!%p9368_p5), %s9248_s30, 6144, %s9364_s2, [#allocation9], %s9167_s10, %s9167_s10, %s9168_s15  }
  0x6e   : > { %s8876_s28 = scalar_lea.hbm %s9288_s27, 6144 }
  0x6f   : > { %p8877_p6 = scmp.ne.s32.totalorder %s9288_s27, %s8876_s28  ;;  %p8883_p3 = scmp.lt.u32.totalorder %s8876_s28, %s9288_s27 }
  0x71   : > { %p8879_p8 = pnand %p8877_p6, %p9380_p7 }
  0x73   : > { %p8880_p2 = pneg %p8879_p8 }
  0x75   : > { %p8885_p9 = pnand %p8883_p3, %p8880_p2 }
  0x77   : > { %8888 = shalt.err (!%p8885_p9)
}
  0x78   : > { %s8889_s18 = scalar_lea.vmem %s9372_s11, 6144  ;;  %p8897_p13 = scmp.lt.s32.totalorder %s9372_s11, %s9372_s11 }
  0x79   : > { %p8890_p10 = scmp.ne.s32.totalorder %s9372_s11, %s8889_s18  ;;  %p8898_p0 = scmp.lt.s32.totalorder %s8889_s18, %s8889_s18 }
  0x7b   : > { %p8892_p11 = pnand %p8890_p10, %p9380_p7  ;;  %p8899_p1 = por %p8898_p0, %p8897_p13 }
  0x7d   : > { %p8893_p12 = pneg %p8892_p11 }
  0x7f   : > { %p8900_p4 = pnand %p8899_p1, %p8893_p12 }
  0x81   : > { %8903 = shalt.err (!%p8900_p4)
}
  0x82   : > { %8721 = dma.hbm_to_vmem [thread:$0]  (!%p9368_p5), %s9288_s27, 6144, %s9372_s11, [#allocation12], %s9167_s10, %s9167_s10, %s9168_s15  }
  0x83   : > { %s8904_s2 = scalar_lea.hbm %s9308_s12, 6144 }
  0x84   : > { %p8905_p6 = scmp.ne.s32.totalorder %s9308_s12, %s8904_s2  ;;  %p8911_p3 = scmp.lt.u32.totalorder %s8904_s2, %s9308_s12 }
  0x86   : > { %p8907_p8 = pnand %p8905_p6, %p9380_p7 }
  0x88   : > { %p8908_p2 = pneg %p8907_p8 }
  0x8a   : > { %p8913_p9 = pnand %p8911_p3, %p8908_p2 }
  0x8c   : > { %8916 = shalt.err (!%p8913_p9)
}
  0x8d   : > { %s8917_s1 = scalar_lea.vmem %s926_s16, 6144  ;;  %p8925_p13 = scmp.lt.s32.totalorder %s926_s16, %s926_s16 }
  0x8e   : > { %p8918_p10 = scmp.ne.s32.totalorder %s926_s16, %s8917_s1  ;;  %p8926_p0 = scmp.lt.s32.totalorder %s8917_s1, %s8917_s1 }
  0x90   : > { %p8920_p11 = pnand %p8918_p10, %p9380_p7  ;;  %p8927_p1 = por %p8926_p0, %p8925_p13 }
  0x92   : > { %p8921_p12 = pneg %p8920_p11 }
  0x94   : > { %p8928_p4 = pnand %p8927_p1, %p8921_p12 }
  0x96   : > { %8931 = shalt.err (!%p8928_p4)
}
  0x97   : > { %8727 = dma.hbm_to_vmem [thread:$0]  (!%p9368_p5), %s9308_s12, 6144, %s926_s16, [#allocation15], %s9167_s10, %s9167_s10, %s9168_s15  }
  0x98   : > { %s9169_s11 = smov [#allocation3]   ;;  %s9170_s18 = smov [#allocation7]  }
  0x99   : > { %s801_s28 = sshll.u32 %s9169_s11, 4  ;;  %s833_s2 = sshll.u32 %s9170_s18, 4  ;;  %s802_s28 = int_to_ptr.vmem [resolvable:$true] %s801_s28  ;;  %s834_s2 = int_to_ptr.vmem [resolvable:$true] %s833_s2 }
  0x9a   : > { %s8932_s1 = scalar_lea.hbm %s9218_s29, 6144 }
  0x9b   : > { %p8933_p6 = scmp.ne.s32.totalorder %s9218_s29, %s8932_s1  ;;  %p8939_p3 = scmp.lt.u32.totalorder %s8932_s1, %s9218_s29 }
  0x9d   : > { %p8935_p8 = pnand %p8933_p6, %p9380_p7 }
  0x9f   : > { %p8936_p2 = pneg %p8935_p8 }
  0xa1   : > { %p8941_p9 = pnand %p8939_p3, %p8936_p2 }
  0xa3   : > { %8944 = shalt.err (!%p8941_p9)
}
  0xa4   : > { %s8945_s8 = scalar_lea.vmem %s802_s28, 6144  ;;  %p8953_p13 = scmp.lt.s32.totalorder %s802_s28, %s802_s28 }
  0xa5   : > { %p8946_p10 = scmp.ne.s32.totalorder %s802_s28, %s8945_s8  ;;  %p8954_p0 = scmp.lt.s32.totalorder %s8945_s8, %s8945_s8 }
  0xa7   : > { %p8948_p11 = pnand %p8946_p10, %p9380_p7  ;;  %p8955_p1 = por %p8954_p0, %p8953_p13 }
  0xa9   : > { %p8949_p12 = pneg %p8948_p11 }
  0xab   : > { %p8956_p4 = pnand %p8955_p1, %p8949_p12 }
  0xad   : > { %8959 = shalt.err (!%p8956_p4)
}
  0xae   : > { %8706 = dma.hbm_to_vmem [thread:$0]  (!%p9368_p5), %s9218_s29, 6144, %s802_s28, [#allocation4], %s9167_s10, %s9167_s10, %s9168_s15  }
  0xaf   : > { %s8960_s16 = scalar_lea.hbm %s9238_s19, 6144 }
  0xb0   : > { %p8961_p6 = scmp.ne.s32.totalorder %s9238_s19, %s8960_s16  ;;  %p8967_p3 = scmp.lt.u32.totalorder %s8960_s16, %s9238_s19 }
  0xb2   : > { %p8963_p8 = pnand %p8961_p6, %p9380_p7 }
  0xb4   : > { %p8964_p2 = pneg %p8963_p8 }
  0xb6   : > { %p8969_p9 = pnand %p8967_p3, %p8964_p2 }
  0xb8   : > { %8972 = shalt.err (!%p8969_p9)
}
  0xb9   : > { %s8973_s8 = scalar_lea.vmem %s834_s2, 6144  ;;  %p8981_p13 = scmp.lt.s32.totalorder %s834_s2, %s834_s2 }
  0xba   : > { %p8974_p10 = scmp.ne.s32.totalorder %s834_s2, %s8973_s8  ;;  %p8982_p0 = scmp.lt.s32.totalorder %s8973_s8, %s8973_s8 }
  0xbc   : > { %p8976_p11 = pnand %p8974_p10, %p9380_p7  ;;  %p8983_p1 = por %p8982_p0, %p8981_p13 }
  0xbe   : > { %p8977_p12 = pneg %p8976_p11 }
  0xc0   : > { %p8984_p4 = pnand %p8983_p1, %p8977_p12 }
  0xc2   : > { %8987 = shalt.err (!%p8984_p4)
}
  0xc3   : > { %8712 = dma.hbm_to_vmem [thread:$0]  (!%p9368_p5), %s9238_s19, 6144, %s834_s2, [#allocation6], %s9167_s10, %s9167_s10, %s9168_s15  }
  0xc4   : > { %s9171_s11 = smov [#allocation10]   ;;  %s9172_s18 = smov [#allocation13]  }
  0xc5   : > { %s877_s28 = sshll.u32 %s9171_s11, 4  ;;  %s909_s1 = sshll.u32 %s9172_s18, 4  ;;  %s878_s28 = int_to_ptr.vmem [resolvable:$true] %s877_s28  ;;  %s910_s1 = int_to_ptr.vmem [resolvable:$true] %s909_s1 }
  0xc6   : > { %s8988_s16 = scalar_lea.hbm %s9278_s6, 6144 }
  0xc7   : > { %p8989_p6 = scmp.ne.s32.totalorder %s9278_s6, %s8988_s16  ;;  %p8995_p3 = scmp.lt.u32.totalorder %s8988_s16, %s9278_s6 }
  0xc9   : > { %p8991_p8 = pnand %p8989_p6, %p9380_p7 }
  0xcb   : > { %p8992_p2 = pneg %p8991_p8 }
  0xcd   : > { %p8997_p9 = pnand %p8995_p3, %p8992_p2 }
  0xcf   : > { %9000 = shalt.err (!%p8997_p9)
}
  0xd0   : > { %s9001_s8 = scalar_lea.vmem %s878_s28, 6144  ;;  %p9009_p13 = scmp.lt.s32.totalorder %s878_s28, %s878_s28 }
  0xd1   : > { %p9002_p10 = scmp.ne.s32.totalorder %s878_s28, %s9001_s8  ;;  %p9010_p0 = scmp.lt.s32.totalorder %s9001_s8, %s9001_s8 }
  0xd3   : > { %p9004_p11 = pnand %p9002_p10, %p9380_p7  ;;  %p9011_p1 = por %p9010_p0, %p9009_p13 }
  0xd5   : > { %p9005_p12 = pneg %p9004_p11 }
  0xd7   : > { %p9012_p4 = pnand %p9011_p1, %p9005_p12 }
  0xd9   : > { %9015 = shalt.err (!%p9012_p4)
}
  0xda   : > { %8718 = dma.hbm_to_vmem [thread:$0]  (!%p9368_p5), %s9278_s6, 6144, %s878_s28, [#allocation9], %s9167_s10, %s9167_s10, %s9168_s15  }
  0xdb   : > { %s9016_s2 = scalar_lea.hbm %s9298_s9, 6144 }
  0xdc   : > { %p9017_p6 = scmp.ne.s32.totalorder %s9298_s9, %s9016_s2  ;;  %p9023_p3 = scmp.lt.u32.totalorder %s9016_s2, %s9298_s9 }
  0xde   : > { %p9019_p8 = pnand %p9017_p6, %p9380_p7 }
  0xe0   : > { %p9020_p2 = pneg %p9019_p8 }
  0xe2   : > { %p9025_p9 = pnand %p9023_p3, %p9020_p2 }
  0xe4   : > { %9028 = shalt.err (!%p9025_p9)
}
  0xe5   : > { %s9029_s11 = scalar_lea.vmem %s910_s1, 6144  ;;  %p9037_p13 = scmp.lt.s32.totalorder %s910_s1, %s910_s1 }
  0xe6   : > { %p9030_p10 = scmp.ne.s32.totalorder %s910_s1, %s9029_s11  ;;  %p9038_p0 = scmp.lt.s32.totalorder %s9029_s11, %s9029_s11 }
  0xe8   : > { %p9032_p11 = pnand %p9030_p10, %p9380_p7  ;;  %p9039_p1 = por %p9038_p0, %p9037_p13 }
  0xea   : > { %p9033_p12 = pneg %p9032_p11 }
  0xec   : > { %p9040_p4 = pnand %p9039_p1, %p9033_p12 }
  0xee   : > { %9043 = shalt.err (!%p9040_p4)
}
  0xef   : > { %8724 = dma.hbm_to_vmem [thread:$0]  (!%p9368_p5), %s9298_s9, 6144, %s910_s1, [#allocation12], %s9167_s10, %s9167_s10, %s9168_s15  }
  0xf0   : > { %s9173_s28 = smov [#allocation16]   ;;  %s9174_s16 = smov [#allocation17]  }
  0xf1   : > { %s941_s18 = sshll.u32 %s9173_s28, 4  ;;  %s957_s8 = sshll.u32 %s9174_s16, 4  ;;  %s942_s18 = int_to_ptr.vmem [resolvable:$true] %s941_s18  ;;  %s958_s8 = int_to_ptr.vmem [resolvable:$true] %s957_s8 }
  0xf2   : > { %s9044_s2 = scalar_lea.hbm %s9318_s24, 6144 }
  0xf3   : > { %p9045_p6 = scmp.ne.s32.totalorder %s9318_s24, %s9044_s2  ;;  %p9051_p3 = scmp.lt.u32.totalorder %s9044_s2, %s9318_s24 }
  0xf5   : > { %p9047_p8 = pnand %p9045_p6, %p9380_p7 }
  0xf7   : > { %p9048_p2 = pneg %p9047_p8 }
  0xf9   : > { %p9053_p9 = pnand %p9051_p3, %p9048_p2 }
  0xfb   : > { %9056 = shalt.err (!%p9053_p9)
}
  0xfc   : > { %s9057_s11 = scalar_lea.vmem %s942_s18, 6144  ;;  %p9065_p13 = scmp.lt.s32.totalorder %s942_s18, %s942_s18 }
  0xfd   : > { %p9058_p10 = scmp.ne.s32.totalorder %s942_s18, %s9057_s11  ;;  %p9066_p0 = scmp.lt.s32.totalorder %s9057_s11, %s9057_s11 }
  0xff   : > { %p9060_p11 = pnand %p9058_p10, %p9380_p7  ;;  %p9067_p1 = por %p9066_p0, %p9065_p13 }
 0x101   : > { %p9061_p12 = pneg %p9060_p11 }
 0x103   : > { %p9068_p4 = pnand %p9067_p1, %p9061_p12 }
 0x105   : > { %9071 = shalt.err (!%p9068_p4)
}
 0x106   : > { %8730 = dma.hbm_to_vmem [thread:$0]  (!%p9368_p5), %s9318_s24, 6144, %s942_s18, [#allocation15], %s9167_s10, %s9167_s10, %s9168_s15  }
 0x107   : > { %s9072_s1 = scalar_lea.hbm %s9328_s14, 6144 }
 0x108   : > { %p9073_p6 = scmp.ne.s32.totalorder %s9328_s14, %s9072_s1  ;;  %p9079_p3 = scmp.lt.u32.totalorder %s9072_s1, %s9328_s14 }
 0x10a   : > { %p9075_p8 = pnand %p9073_p6, %p9380_p7 }
 0x10c   : > { %p9076_p2 = pneg %p9075_p8 }
 0x10e   : > { %p9081_p9 = pnand %p9079_p3, %p9076_p2 }
 0x110   : > { %9084 = shalt.err (!%p9081_p9)
}
 0x111   : > { %s9085_s28 = scalar_lea.vmem %s958_s8, 6144  ;;  %p9093_p13 = scmp.lt.s32.totalorder %s958_s8, %s958_s8 }
 0x112   : > { %p9086_p10 = scmp.ne.s32.totalorder %s958_s8, %s9085_s28  ;;  %p9094_p0 = scmp.lt.s32.totalorder %s9085_s28, %s9085_s28 }
 0x114   : > { %p9088_p11 = pnand %p9086_p10, %p9380_p7  ;;  %p9095_p1 = por %p9094_p0, %p9093_p13 }
 0x116   : > { %p9089_p12 = pneg %p9088_p11 }
 0x118   : > { %p9096_p4 = pnand %p9095_p1, %p9089_p12 }
 0x11a   : > { %9099 = shalt.err (!%p9096_p4)
}
 0x11b   : > { %8733 = dma.hbm_to_vmem [thread:$0]  (!%p9368_p5), %s9328_s14, 6144, %s958_s8, [#allocation18], %s9167_s10, %s9167_s10, %s9168_s15  }
 0x11c   : > { %p10208_p6 = scmp.ne.s32.totalorder %s10205_s0, 0 }
 0x11d   : > { %p10209_p8 = scmp.eq.s32.totalorder (!%p10208_p6), %s9351_s23, 0 }
 0x11e   : > { %990 = sbr.rel (%p10208_p6) target bundleno = 4205 (0x106d), region = 140 }
 0x125   : > { %9105 = dma.done.wait (%p10209_p8), [#allocation4], 6144   ;;  %p10210_p7 = pmov %p10209_p8 }
 0x127   : > { %9107 = vsyncadd (%p10210_p7), [#allocation4], 4294961152  ;;  %p10211_p2 = pmov %p10210_p7 }
 0x129   : > { %9109 = dma.done.wait (%p10211_p2), [#allocation6], 12288   ;;  %p10212_p3 = pmov %p10211_p2 }
 0x12a   : > { %p10213_p9 = pmov %p10211_p2 }
 0x12b   : > { %9111 = vsyncadd (%p10212_p3), [#allocation6], 4294955008 }
 0x12c   : > { %9113 = dma.done.wait (%p10213_p9), [#allocation9], 12288   ;;  %p10214_p5 = pmov %p10211_p2 }
 0x12d   : > { %p10215_p10 = pmov %p10211_p2 }
 0x12e   : > { %9115 = vsyncadd (%p10214_p5), [#allocation9], 4294955008 }
 0x12f   : > { %9117 = dma.done.wait (%p10215_p10), [#allocation12], 12288   ;;  %p10216_p11 = pmov %p10211_p2 }
 0x130   : > { %p10217_p12 = pmov %p10211_p2 }
 0x131   : > { %9119 = vsyncadd (%p10216_p11), [#allocation12], 4294955008 }
 0x132   : > { %9121 = dma.done.wait (%p10217_p12), [#allocation15], 12288   ;;  %p10218_p13 = pmov %p10211_p2 }
 0x133   : > { %p10219_p0 = pmov %p10211_p2 }
 0x134   : > { %9123 = vsyncadd (%p10218_p13), [#allocation15], 4294955008 }
 0x135   : > { %9125 = dma.done.wait (%p10219_p0), [#allocation18], 6144   ;;  %p10220_p1 = pmov %p10219_p0 }
 0x136   : > { %p1112_p4 = scmp.lt.s32.totalorder %s9351_s23, 1  ;;  %v9175_v0 = vmov 0.0|0.0   ;;  %vm9176_vm0 = vmmov 0   ;;  %v9177_v1 = vmov 0.0   ;;  %v5420_v2 = vld [vmem:[%s9198_s13 + $0x80] sm:$0xff]  ;;  %v5421_v3 = vld [vmem:[%s9198_s13 + $0x88] sm:$0xff] }
 0x137   : > { %9127 = vsyncadd (%p10220_p1), [#allocation18], 4294961152  ;;  %7668 = vmatprep.subr.bf16.mxu0 %v9175_v0  ;;  %6280 = vmatprep.mubr.msk.f32.mxu0 %vm9176_vm0, %v9177_v1  ;;  %1128 = vst [vmem:[#allocation2] sm:$0x1] %v9177_v1  ;;  %v5422_v4 = vld [vmem:[%s9198_s13 + $0x90] sm:$0xff]  ;;  %v7669_v5 = vpack.c.bf16 %v5421_v3, %v5420_v2  ;;  %v5423_v6 = vld [vmem:[%s9198_s13 + $0x98] sm:$0xff] }
 0x138   : > { %1133 = vst [vmem:[#allocation2 + $0x11] sm:$0x1] %v9177_v1  ;;  %s10236_s23 = smov (!%p1112_p4, %s9351_s23), 1  ;;  %7740 = vmatprep.subr.bf16.mxu1 %v9175_v0  ;;  %6385 = vmatprep.mubr.msk.f32.mxu1 %vm9176_vm0, %v9177_v1  ;;  %v7672_v7 = vpack.c.bf16 %v5423_v6, %v5422_v4  ;;  %v5424_v8 = vld [vmem:[%s9198_s13 + $0xa0] sm:$0xff]  ;;  %v5425_v9 = vld [vmem:[%s9198_s13 + $0xa8] sm:$0xff]  ;;  %v5426_v13 = vld [vmem:[%s9198_s13 + $0xb0] sm:$0xff] }
 0x139   : > { %4866 = vst [vmem:[#allocation2 + $0x11] sm:$0x1] %v9177_v1  ;;  %s5555_s0 = sshll.u32 %s10236_s23, 4  ;;  %7670 = vmatpush3.bf16.msra.mxu0 %v7669_v5  ;;  %v7675_v12 = vpack.c.bf16 %v5425_v9, %v5424_v8  ;;  %v5427_v14 = vld [vmem:[%s9198_s13 + $0xb8] sm:$0xff]  ;;  %v5428_v16 = vld [vmem:[%s9198_s13 + $0xc0] sm:$0xff]  ;;  %v5429_v17 = vld [vmem:[%s9198_s13 + $0xc8] sm:$0xff] }
 0x13a   : > { %s1116_s7 = scalar_lea.vmem %s9188_s5, %s5555_s0  ;;  %7671 = vmatprep.subr.bf16.mxu0 %v9175_v0  ;;  %v7678_v15 = vpack.c.bf16 %v5427_v14, %v5426_v13  ;;  %v7681_v19 = vpack.c.bf16 %v5429_v17, %v5428_v16  ;;  %v5430_v20 = vld [vmem:[%s9198_s13 + $0xd0] sm:$0xff]  ;;  %v5431_v21 = vld [vmem:[%s9198_s13 + $0xd8] sm:$0xff]  ;;  %v5432_v23 = vld [vmem:[%s9198_s13 + $0xe0] sm:$0xff]  ;;  %s10221_s26 = sld [smem:[#allocation26_spill]]  ;;  %vm3146_vm1 = vcmask 122880   ;;  %vm3164_vm2 = vcmask 64512  }
 0x13b   : > { %v1129_v10 = vld [vmem:[%s1116_s7] sm:$0xff]  ;;  %v1130_v11 = vld [vmem:[%s1116_s7 + $0x8] sm:$0xff]  ;;  %v7684_v22 = vpack.c.bf16 %v5431_v21, %v5430_v20  ;;  %v5434_v26 = vld [vmem:[%s9198_s13 + $0xf0] sm:$0xff]  ;;  %s10222_s10 = sld [smem:[#allocation28_spill]]  ;;  %s10223_s15 = sld [smem:[#allocation29_spill]] }
 0x13c   : > { %1131 = vst [vmem:[#allocation2 + $0x1] sm:$0xff] %v1129_v10  ;;  %1132 = vst [vmem:[#allocation2 + $0x9] sm:$0xff] %v1130_v11  ;;  %v5433_v24 = vld [vmem:[%s9198_s13 + $0xe8] sm:$0xff]  ;;  %v5435_v27 = vld [vmem:[%s9198_s13 + $0xf8] sm:$0xff]  ;;  %s10224_s18 = sld [smem:[#allocation31_spill]]  ;;  %s10225_s16 = sld [smem:[#allocation25_spill]] }
 0x13d   : > { %7673 = vmatpush3.bf16.msra.mxu0 %v7672_v7  ;;  %v7687_v25 = vpack.c.bf16 %v5433_v24, %v5432_v23  ;;  %v7690_v28 = vpack.c.bf16 %v5435_v27, %v5434_v26  ;;  %v1135_v29 = vld [vmem:[%s9198_s13] sm:$0xff]  ;;  %v1136_v30 = vld [vmem:[%s9198_s13 + $0x8] sm:$0xff]  ;;  %v1137_v32 = vld [vmem:[%s9198_s13 + $0x10] sm:$0xff]  ;;  %s10226_s8 = sld [smem:[#allocation30_spill]]  ;;  %s9178_s11 = smov 8  }
 0x13e   : > { %7674 = vmatprep.subr.bf16.mxu0 %v9175_v0  ;;  %v7693_v31 = vpack.c.bf16 %v1136_v30, %v1135_v29  ;;  %v1138_v33 = vld [vmem:[%s9198_s13 + $0x18] sm:$0xff]  ;;  %v1139_v35 = vld [vmem:[%s9198_s13 + $0x20] sm:$0xff]  ;;  %v1140_v36 = vld [vmem:[%s9198_s13 + $0x28] sm:$0xff]  ;;  %s10227_s1 = sld [smem:[#allocation33_spill]]  ;;  %s10228_s28 = sld [smem:[#allocation32_spill]] }
 0x13f   : > { %v7696_v34 = vpack.c.bf16 %v1138_v33, %v1137_v32  ;;  %v7699_v37 = vpack.c.bf16 %v1140_v36, %v1139_v35  ;;  %v1141_v38 = vld [vmem:[%s9198_s13 + $0x30] sm:$0xff]  ;;  %v1142_v39 = vld [vmem:[%s9198_s13 + $0x38] sm:$0xff]  ;;  %v1143_v41 = vld [vmem:[%s9198_s13 + $0x40] sm:$0xff]  ;;  %s1127_s7 = scalar_lea.vmem %s9343_s20, %s10236_s23 }
 0x140   : > { %v7702_v40 = vpack.c.bf16 %v1142_v39, %v1141_v38  ;;  %v1144_v42 = vld [vmem:[%s9198_s13 + $0x48] sm:$0xff]  ;;  %v1145_v44 = vld [vmem:[%s9198_s13 + $0x50] sm:$0xff]  ;;  %v1146_v45 = vld [vmem:[%s9198_s13 + $0x58] sm:$0xff] }
 0x141   : > { %7676 = vmatpush3.bf16.msra.mxu0 %v7675_v12  ;;  %v7705_v43 = vpack.c.bf16 %v1144_v42, %v1143_v41  ;;  %v7708_v46 = vpack.c.bf16 %v1146_v45, %v1145_v44  ;;  %v1147_v47 = vld [vmem:[%s9198_s13 + $0x60] sm:$0xff]  ;;  %v1148_v48 = vld [vmem:[%s9198_s13 + $0x68] sm:$0xff]  ;;  %v1149_v50 = vld [vmem:[%s9198_s13 + $0x70] sm:$0xff] }
 0x142   : > { %7677 = vmatprep.subr.bf16.mxu0 %v9175_v0  ;;  %v7711_v49 = vpack.c.bf16 %v1148_v48, %v1147_v47  ;;  %v1150_v51 = vld [vmem:[%s9198_s13 + $0x78] sm:$0xff]  ;;  %v5436_v53 = vld [vmem:[%s9198_s13 + $0x100] sm:$0xff]  ;;  %v5437_v54 = vld [vmem:[%s9198_s13 + $0x108] sm:$0xff]  ;;  %s1119_s2 = scalar_lea.vmem %s10225_s16, %s10236_s23  ;;  %s10231_s16 = sld [smem:[#allocation36_spill]] }
 0x143   : > { %v1152_v18 = vld [vmem:[#allocation2 + $0x1] ss:$2 sm:$0xff]  ;;  %v7714_v52 = vpack.c.bf16 %v1150_v51, %v1149_v50  ;;  %v1134_v55 = vld [vmem:[#allocation2] ss:$2 sm:$0xff]  ;;  %v7717_v56 = vpack.c.bf16 %v5437_v54, %v5436_v53  ;;  %v5438_v57 = vld [vmem:[%s9198_s13 + $0x110] sm:$0xff] }
 0x144   : > { %1410 = vst [vmem:[#allocation2 + $0x9] sm:$0x1] %v9177_v1  ;;  %v5439_v58 = vld [vmem:[%s9198_s13 + $0x118] sm:$0xff]  ;;  %v5440_v60 = vld [vmem:[%s9198_s13 + $0x120] sm:$0xff]  ;;  %v5441_v61 = vld [vmem:[%s9198_s13 + $0x128] sm:$0xff] }
 0x145   : > { %7679 = vmatpush3.bf16.msra.mxu0 %v7678_v15  ;;  %v7720_v59 = vpack.c.bf16 %v5439_v58, %v5438_v57  ;;  %v7723_v62 = vpack.c.bf16 %v5441_v61, %v5440_v60  ;;  %v5442_v63 = vld [vmem:[%s9198_s13 + $0x130] sm:$0xff]  ;;  %v5443_v2 = vld [vmem:[%s9198_s13 + $0x138] sm:$0xff]  ;;  %v5444_v4 = vld [vmem:[%s9198_s13 + $0x140] sm:$0xff] }
 0x146   : > { %7680 = vmatprep.subr.bf16.mxu0 %v9175_v0  ;;  %v7726_v3 = vpack.c.bf16 %v5443_v2, %v5442_v63  ;;  %v5445_v5 = vld [vmem:[%s9198_s13 + $0x148] sm:$0xff]  ;;  %v5446_v7 = vld [vmem:[%s9198_s13 + $0x150] sm:$0xff]  ;;  %v5447_v8 = vld [vmem:[%s9198_s13 + $0x158] sm:$0xff] }
 0x147   : > { %v7729_v6 = vpack.c.bf16 %v5445_v5, %v5444_v4  ;;  %v7732_v9 = vpack.c.bf16 %v5447_v8, %v5446_v7  ;;  %v5448_v10 = vld [vmem:[%s9198_s13 + $0x160] sm:$0xff]  ;;  %v5449_v11 = vld [vmem:[%s9198_s13 + $0x168] sm:$0xff]  ;;  %v5450_v13 = vld [vmem:[%s9198_s13 + $0x170] sm:$0xff] }
 0x148   : > { %v7735_v12 = vpack.c.bf16 %v5449_v11, %v5448_v10  ;;  %v5451_v14 = vld [vmem:[%s9198_s13 + $0x178] sm:$0xff]  ;;  %v1311_v16 = vld [vmem:[#allocation2 + $0x2] ss:$2 sm:$0xff] }
 0x149   : > { %7682 = vmatpush3.bf16.msra.mxu0 %v7681_v19  ;;  %v7738_v15 = vpack.c.bf16 %v5451_v14, %v5450_v13  ;;  %v5453_v17 = vld [vmem:[%s9208_s21 + $0x80] sm:$0xff]  ;;  %v1413_v21 = vld [vmem:[%s9208_s21 + $0x8] sm:$0xff]  ;;  %v5456_v23 = vld [vmem:[%s9208_s21 + $0x98] sm:$0xff] }
 0x14a   : > { %7683 = vmatprep.subr.bf16.mxu0 %v9175_v0  ;;  %v1412_v19 = vld [vmem:[%s9208_s21] sm:$0xff]  ;;  %v1415_v26 = vld [vmem:[%s9208_s21 + $0x18] sm:$0xff]  ;;  %v5458_v30 = vld [vmem:[%s9208_s21 + $0xa8] sm:$0xff] }
 0x14b   : > { %v7765_v24 = vpack.c.bf16 %v1413_v21, %v1412_v19  ;;  %v5457_v29 = vld [vmem:[%s9208_s21 + $0xa0] sm:$0xff]  ;;  %v1417_v32 = vld [vmem:[%s9208_s21 + $0x28] sm:$0xff]  ;;  %v5459_v35 = vld [vmem:[%s9208_s21 + $0xb0] sm:$0xff] }
 0x14c   : > { %v7747_v33 = vpack.c.bf16 %v5458_v30, %v5457_v29  ;;  %v5460_v36 = vld [vmem:[%s9208_s21 + $0xb8] sm:$0xff]  ;;  %v5461_v41 = vld [vmem:[%s9208_s21 + $0xc0] sm:$0xff]  ;;  %v5462_v42 = vld [vmem:[%s9208_s21 + $0xc8] sm:$0xff] }
 0x14d   : > { %7685 = vmatpush3.bf16.msra.mxu0 %v7684_v22  ;;  %v5455_v22 = vld [vmem:[%s9208_s21 + $0x90] sm:$0xff]  ;;  %v1419_v38 = vld [vmem:[%s9208_s21 + $0x38] sm:$0xff]  ;;  %v7750_v39 = vpack.c.bf16 %v5460_v36, %v5459_v35  ;;  %v5465_v47 = vld [vmem:[%s9208_s21 + $0xe0] sm:$0xff] }
 0x14e   : > { %7686 = vmatprep.subr.bf16.mxu0 %v9175_v0  ;;  %v7744_v27 = vpack.c.bf16 %v5456_v23, %v5455_v22  ;;  %v5463_v44 = vld [vmem:[%s9208_s21 + $0xd0] sm:$0xff]  ;;  %v5464_v45 = vld [vmem:[%s9208_s21 + $0xd8] sm:$0xff]  ;;  %v5466_v48 = vld [vmem:[%s9208_s21 + $0xe8] sm:$0xff] }
 0x14f   : > { %v1421_v50 = vld [vmem:[%s9208_s21 + $0x48] sm:$0xff]  ;;  %v7759_v51 = vpack.c.bf16 %v5466_v48, %v5465_v47  ;;  %v5467_v53 = vld [vmem:[%s9208_s21 + $0xf0] sm:$0xff]  ;;  %v5468_v54 = vld [vmem:[%s9208_s21 + $0xf8] sm:$0xff] }
 0x150   : > { %v7762_v57 = vpack.c.bf16 %v5468_v54, %v5467_v53  ;;  %v1425_v60 = vld [vmem:[%s9208_s21 + $0x68] sm:$0xff]  ;;  %v1427_v63 = vld [vmem:[%s9208_s21 + $0x78] sm:$0xff]  ;;  %v5475_v23 = vld [vmem:[%s9208_s21 + $0x130] sm:$0xff] }
 0x151   : > { %7688 = vmatpush3.bf16.msra.mxu0 %v7687_v25  ;;  %v1414_v25 = vld [vmem:[%s9208_s21 + $0x10] sm:$0xff]  ;;  %v5470_v13 = vld [vmem:[%s9208_s21 + $0x108] sm:$0xff] }
 0x152   : > { %7689 = vmatprep.subr.bf16.mxu0 %v9175_v0  ;;  %v5474_v21 = vld [vmem:[%s9208_s21 + $0x128] sm:$0xff] }
 0x153   : > { %v5478_v29 = vld [vmem:[%s9208_s21 + $0x148] sm:$0xff] }
 0x154   : > { %v5482_v35 = vld [vmem:[%s9208_s21 + $0x168] sm:$0xff] }
 0x155   : > { %7691 = vmatpush3.bf16.msra.mxu0 %v7690_v28  ;;  %v7768_v28 = vpack.c.bf16 %v1415_v26, %v1414_v25  ;;  %v1689_v48 = vld [vmem:[#allocation3 + $0x10] sm:$0xff] }
 0x156   : > { %7692 = vmatprep.subr.bf16.mxu0 %v9175_v0 }
 0x158   : > { %6281 = vmatmul.mubr.f32.vlgmr.msra.gmra.mrb[0].mxu0 %v1152_v18  ;;  %v5454_v18 = vld [vmem:[%s9208_s21 + $0x88] sm:$0xff] }
 0x159   : > { %7694 = vmatpush3.bf16.msra.mxu0 %v7693_v31  ;;  %6315 = vmatprep.mubr.msk.f32.mxu0 %vm9176_vm0, %v9177_v1  ;;  %v7741_v20 = vpack.c.bf16 %v5454_v18, %v5453_v17  ;;  %v1416_v31 = vld [vmem:[%s9208_s21 + $0x20] sm:$0xff]  ;;  %v5471_v17 = vld [vmem:[%s9208_s21 + $0x110] sm:$0xff]  ;;  %v5472_v18 = vld [vmem:[%s9208_s21 + $0x118] sm:$0xff] }
 0x15a   : > { %7695 = vmatprep.subr.bf16.mxu0 %v9175_v0  ;;  %v7792_v19 = vpack.c.bf16 %v5472_v18, %v5471_v17  ;;  %v1697_v17 = vld [vmem:[#allocation3 + $0x50] sm:$0xff]  ;;  %v1698_v18 = vld [vmem:[#allocation3 + $0x58] sm:$0xff] }
 0x15b   : > { %7742 = vmatpush3.bf16.msra.mxu1 %v7741_v20  ;;  %v5473_v20 = vld [vmem:[%s9208_s21 + $0x120] sm:$0xff] }
 0x15c   : > { %7743 = vmatprep.subr.bf16.mxu1 %v9175_v0  ;;  %v7795_v22 = vpack.c.bf16 %v5474_v21, %v5473_v20  ;;  %v7852_v20 = vpack.c.bf16 %v1698_v18, %v1697_v17  ;;  %v1699_v21 = vld [vmem:[#allocation3 + $0x60] sm:$0xff]  ;;  %v1968_v18 = vld [vmem:[#allocation5 + $0x28] sm:$0xff] }
 0x15d   : > { %7697 = vmatpush3.bf16.msra.mxu0 %v7696_v34  ;;  %v7771_v34 = vpack.c.bf16 %v1417_v32, %v1416_v31  ;;  %v5479_v31 = vld [vmem:[%s9208_s21 + $0x150] sm:$0xff]  ;;  %v5480_v32 = vld [vmem:[%s9208_s21 + $0x158] sm:$0xff] }
 0x15e   : > { %7698 = vmatprep.subr.bf16.mxu0 %v9175_v0  ;;  %v1967_v17 = vld [vmem:[#allocation5 + $0x20] sm:$0xff] }
 0x15f   : > { %7745 = vmatpush3.bf16.msra.mxu1 %v7744_v27 }
 0x160   : > { %7746 = vmatprep.subr.bf16.mxu1 %v9175_v0 }
 0x161   : > { %7700 = vmatpush3.bf16.msra.mxu0 %v7699_v37  ;;  %v1418_v37 = vld [vmem:[%s9208_s21 + $0x30] sm:$0xff] }
 0x162   : > { %7701 = vmatprep.subr.bf16.mxu0 %v9175_v0 }
 0x163   : > { %7748 = vmatpush3.bf16.msra.mxu1 %v7747_v33  ;;  %v7804_v33 = vpack.c.bf16 %v5480_v32, %v5479_v31 }
 0x164   : > { %7749 = vmatprep.subr.bf16.mxu1 %v9175_v0 }
 0x165   : > { %7703 = vmatpush3.bf16.msra.mxu0 %v7702_v40  ;;  %v7774_v40 = vpack.c.bf16 %v1419_v38, %v1418_v37  ;;  %v5483_v37 = vld [vmem:[%s9208_s21 + $0x170] sm:$0xff]  ;;  %v5484_v38 = vld [vmem:[%s9208_s21 + $0x178] sm:$0xff] }
 0x166   : > { %7704 = vmatprep.subr.bf16.mxu0 %v9175_v0 }
 0x167   : > { %7751 = vmatpush3.bf16.msra.mxu1 %v7750_v39  ;;  %v7810_v39 = vpack.c.bf16 %v5484_v38, %v5483_v37  ;;  %v1864_v37 = vld [vmem:[#allocation3 + $0x108] sm:$0xff] }
 0x168   : > { %7752 = vmatprep.subr.bf16.mxu1 %v9175_v0 }
 0x169   : > { %7706 = vmatpush3.bf16.msra.mxu0 %v7705_v43  ;;  %v7753_v43 = vpack.c.bf16 %v5462_v42, %v5461_v41  ;;  %v1706_v41 = vld [vmem:[#allocation3 + $0x88] sm:$0xff] }
 0x16a   : > { %7707 = vmatprep.subr.bf16.mxu0 %v9175_v0 }
 0x16b   : > { %7754 = vmatpush3.bf16.msra.mxu1 %v7753_v43  ;;  %v1707_v43 = vld [vmem:[#allocation3 + $0x90] sm:$0xff] }
 0x16c   : > { %7755 = vmatprep.subr.bf16.mxu1 %v9175_v0 }
 0x16d   : > { %7709 = vmatpush3.bf16.msra.mxu0 %v7708_v46  ;;  %v7756_v46 = vpack.c.bf16 %v5464_v45, %v5463_v44  ;;  %v1708_v44 = vld [vmem:[#allocation3 + $0x98] sm:$0xff]  ;;  %v1687_v45 = vld [vmem:[#allocation3] sm:$0xff] }
 0x16e   : > { %7710 = vmatprep.subr.bf16.mxu0 %v9175_v0  ;;  %v7816_v47 = vpack.c.bf16 %v1708_v44, %v1707_v43  ;;  %v1867_v44 = vld [vmem:[#allocation3 + $0x120] sm:$0xff] }
 0x16f   : > { %7757 = vmatpush3.bf16.msra.mxu1 %v7756_v46  ;;  %v1688_v46 = vld [vmem:[#allocation3 + $0x8] sm:$0xff] }
 0x170   : > { %7758 = vmatprep.subr.bf16.mxu1 %v9175_v0 }
 0x171   : > { %7712 = vmatpush3.bf16.msra.mxu0 %v7711_v49  ;;  %v1420_v49 = vld [vmem:[%s9208_s21 + $0x40] sm:$0xff] }
 0x172   : > { %7713 = vmatprep.subr.bf16.mxu0 %v9175_v0 }
 0x173   : > { %7760 = vmatpush3.bf16.msra.mxu1 %v7759_v51  ;;  %v1709_v51 = vld [vmem:[#allocation3 + $0xa0] sm:$0xff] }
 0x174   : > { %7761 = vmatprep.subr.bf16.mxu1 %v9175_v0 }
 0x175   : > { %7715 = vmatpush3.bf16.msra.mxu0 %v7714_v52  ;;  %v7777_v52 = vpack.c.bf16 %v1421_v50, %v1420_v49  ;;  %v7837_v49 = vpack.c.bf16 %v1688_v46, %v1687_v45  ;;  %v1690_v50 = vld [vmem:[#allocation3 + $0x18] sm:$0xff]  ;;  %v1868_v45 = vld [vmem:[#allocation3 + $0x128] sm:$0xff] }
 0x176   : > { %7716 = vmatprep.subr.bf16.mxu0 %v9175_v0  ;;  %v7840_v54 = vpack.c.bf16 %v1690_v50, %v1689_v48  ;;  %v7867_v46 = vpack.c.bf16 %v1868_v45, %v1867_v44  ;;  %v1870_v48 = vld [vmem:[#allocation3 + $0x138] sm:$0xff]  ;;  %v1995_v45 = vld [vmem:[#allocation5 + $0xf0] sm:$0xff] }
 0x177   : > { %7763 = vmatpush3.bf16.msra.mxu1 %v7762_v57  ;;  %v1691_v57 = vld [vmem:[#allocation3 + $0x20] sm:$0xff] }
 0x178   : > { %6316 = vmatmul.mubr.f32.vlgmr.msra.gmra.mrb[2].mxu0 %v1134_v55  ;;  %v1422_v55 = vld [vmem:[%s9208_s21 + $0x50] sm:$0xff]  ;;  %7788 = vmatprep.subr.bf16.mxu1 %v9175_v0 }
 0x179   : > { %7718 = vmatpush3.bf16.msra.mxu0 %v7717_v56  ;;  %6350 = vmatprep.mubr.msk.f32.mxu0 %vm9176_vm0, %v9177_v1  ;;  %v1423_v56 = vld [vmem:[%s9208_s21 + $0x58] sm:$0xff] }
 0x17a   : > { %7719 = vmatprep.subr.bf16.mxu0 %v9175_v0  ;;  %v7780_v58 = vpack.c.bf16 %v1423_v56, %v1422_v55  ;;  %v1711_v55 = vld [vmem:[#allocation3 + $0xb0] sm:$0xff]  ;;  %v1712_v56 = vld [vmem:[#allocation3 + $0xb8] sm:$0xff] }
 0x17d   : > { %7721 = vmatpush3.bf16.msra.mxu0 %v7720_v59  ;;  %v1424_v59 = vld [vmem:[%s9208_s21 + $0x60] sm:$0xff] }
 0x17e   : > { %7722 = vmatprep.subr.bf16.mxu0 %v9175_v0  ;;  %v7783_v61 = vpack.c.bf16 %v1425_v60, %v1424_v59  ;;  %v7822_v59 = vpack.c.bf16 %v1712_v56, %v1711_v55  ;;  %v1873_v55 = vld [vmem:[#allocation3 + $0x150] sm:$0xff]  ;;  %v1874_v56 = vld [vmem:[#allocation3 + $0x158] sm:$0xff] }
 0x181   : > { %7724 = vmatpush3.bf16.msra.mxu0 %v7723_v62  ;;  %v1426_v62 = vld [vmem:[%s9208_s21 + $0x70] sm:$0xff] }
 0x182   : > { %7725 = vmatprep.subr.bf16.mxu0 %v9175_v0  ;;  %v7786_v2 = vpack.c.bf16 %v1427_v63, %v1426_v62  ;;  %v1714_v62 = vld [vmem:[#allocation3 + $0xc8] sm:$0xff]  ;;  %v1693_v63 = vld [vmem:[#allocation3 + $0x30] sm:$0xff] }
 0x185   : > { %7727 = vmatpush3.bf16.msra.mxu0 %v7726_v3 }
 0x186   : > { %7728 = vmatprep.subr.bf16.mxu0 %v9175_v0 }
 0x189   : > { %7730 = vmatpush3.bf16.msra.mxu0 %v7729_v6 }
 0x18a   : > { %7731 = vmatprep.subr.bf16.mxu0 %v9175_v0 }
 0x18d   : > { %7733 = vmatpush3.bf16.msra.mxu0 %v7732_v9  ;;  %v5452_v9 = vld [vmem:[%s9203_s17] ss:$0 sm:$0xff] }
 0x18e   : > { %7734 = vmatprep.subr.bf16.mxu0 %v9175_v0 }
 0x191   : > { %7736 = vmatpush3.bf16.msra.mxu0 %v7735_v12  ;;  %v5469_v12 = vld [vmem:[%s9208_s21 + $0x100] sm:$0xff] }
 0x192   : > { %7737 = vmatprep.subr.bf16.mxu0 %v9175_v0 }
 0x195   : > { %7739 = vmatpush3.bf16.msra.mxu0 %v7738_v15  ;;  %v7789_v15 = vpack.c.bf16 %v5470_v13, %v5469_v12 }
 0x196   : > { %7764 = vmatprep.subr.bf16.mxu0 %v9175_v0 }
 0x198   : > { %6351 = vmatmul.mubr.f32.vlgmr.msra.gmra.mrb[4].mxu0 %v1311_v16 }
 0x199   : > { %6420 = vmatprep.mubr.msk.f32.mxu0 %vm9176_vm0, %v9177_v1  ;;  %7766 = vmatpush3.bf16.msra.mxu0 %v7765_v24  ;;  %v5476_v24 = vld [vmem:[%s9208_s21 + $0x138] sm:$0xff] }
 0x19a   : > { %7767 = vmatprep.subr.bf16.mxu0 %v9175_v0  ;;  %v7798_v27 = vpack.c.bf16 %v5476_v24, %v5475_v23  ;;  %v1701_v24 = vld [vmem:[#allocation3 + $0x70] sm:$0xff] }
 0x19d   : > { %7769 = vmatpush3.bf16.msra.mxu0 %v7768_v28  ;;  %v5477_v28 = vld [vmem:[%s9208_s21 + $0x140] sm:$0xff] }
 0x19e   : > { %7770 = vmatprep.subr.bf16.mxu0 %v9175_v0  ;;  %v7801_v30 = vpack.c.bf16 %v5478_v29, %v5477_v28 }
 0x1a1   : > { %7772 = vmatpush3.bf16.msra.mxu0 %v7771_v34  ;;  %v5481_v34 = vld [vmem:[%s9208_s21 + $0x160] sm:$0xff] }
 0x1a2   : > { %7773 = vmatprep.subr.bf16.mxu0 %v9175_v0  ;;  %v7807_v36 = vpack.c.bf16 %v5482_v35, %v5481_v34 }
 0x1a5   : > { %7775 = vmatpush3.bf16.msra.mxu0 %v7774_v40  ;;  %v1705_v40 = vld [vmem:[#allocation3 + $0x80] sm:$0xff] }
 0x1a6   : > { %7776 = vmatprep.subr.bf16.mxu0 %v9175_v0  ;;  %v7813_v42 = vpack.c.bf16 %v1706_v41, %v1705_v40  ;;  %v1865_v41 = vld [vmem:[#allocation3 + $0x110] sm:$0xff] }
 0x1a9   : > { %7778 = vmatpush3.bf16.msra.mxu0 %v7777_v52  ;;  %v1710_v52 = vld [vmem:[#allocation3 + $0xa8] sm:$0xff] }
 0x1aa   : > { %7779 = vmatprep.subr.bf16.mxu0 %v9175_v0  ;;  %v7819_v53 = vpack.c.bf16 %v1710_v52, %v1709_v51  ;;  %v1871_v52 = vld [vmem:[#allocation3 + $0x140] sm:$0xff] }
 0x1ad   : > { %7781 = vmatpush3.bf16.msra.mxu0 %v7780_v58  ;;  %v1692_v58 = vld [vmem:[#allocation3 + $0x28] sm:$0xff] }
 0x1ae   : > { %7782 = vmatprep.subr.bf16.mxu0 %v9175_v0  ;;  %v7843_v60 = vpack.c.bf16 %v1692_v58, %v1691_v57  ;;  %v7876_v57 = vpack.c.bf16 %v1874_v56, %v1873_v55  ;;  %v1875_v58 = vld [vmem:[#allocation3 + $0x160] sm:$0xff] }
 0x1b1   : > { %7784 = vmatpush3.bf16.msra.mxu0 %v7783_v61  ;;  %v1713_v61 = vld [vmem:[#allocation3 + $0xc0] sm:$0xff] }
 0x1b2   : > { %7785 = vmatprep.subr.bf16.mxu0 %v9175_v0 }
 0x1b5   : > { %7787 = vmatpush3.bf16.msra.mxu0 %v7786_v2  ;;  %v1694_v2 = vld [vmem:[#allocation3 + $0x38] sm:$0xff] }
 0x1b6   : > { %7812 = vmatprep.subr.bf16.mxu0 %v9175_v0 }
 0x22b   : > { %v1236_v3 = vpop.f32.mrb[0].mxu0 }
 0x22c   : > { %v6282_v4 = vpop.f32.mrb[1].mxu0 }
 0x22d   : > { %v7846_v4 = vpack.c.bf16 %v1694_v2, %v1693_v63  ;;  %v1981_v2 = vld [vmem:[#allocation5 + $0x80] sm:$0xff] }
 0x24b   : > { %v1306_v5 = vpop.f32.mrb[2].mxu0 }
 0x24c   : > { %v1307_v6 = vadd.f32 %v1306_v5, %v1236_v3  ;;  %v6317_v7 = vpop.f32.mrb[3].mxu0  ;;  %v7825_v3 = vpack.c.bf16 %v1714_v62, %v1713_v61  ;;  %v1715_v5 = vld [vmem:[#allocation3 + $0xd0] sm:$0xff]  ;;  %v1878_v62 = vld [vmem:[#allocation3 + $0x178] sm:$0xff] }
 0x24d   : > { %v1877_v61 = vld [vmem:[#allocation3 + $0x170] sm:$0xff] }
 0x24e   : > { %v7882_v63 = vpack.c.bf16 %v1878_v62, %v1877_v61 }
 0x26b   : > { %v1395_v8 = vpop.f32.mrb[4].mxu0 }
 0x26c   : > { %v1399_v10 = vadd.f32 %v1395_v8, %v1307_v6  ;;  %v6352_v11 = vpop.f32.mrb[5].mxu0  ;;  %v1716_v6 = vld [vmem:[#allocation3 + $0xd8] sm:$0xff]  ;;  %v1717_v8 = vld [vmem:[#allocation3 + $0xe0] sm:$0xff] }
 0x26d   : > { %v7828_v7 = vpack.c.bf16 %v1716_v6, %v1715_v5  ;;  %v1696_v11 = vld [vmem:[#allocation3 + $0x48] sm:$0xff] }
 0x26e   : > { %v1407_v14 = vadd.f32 %v5452_v9, %v1399_v10  ;;  %v1718_v9 = vld [vmem:[#allocation3 + $0xe8] sm:$0xff]  ;;  %v1695_v10 = vld [vmem:[#allocation3 + $0x40] sm:$0xff] }
 0x26f   : > { %v7831_v12 = vpack.c.bf16 %v1718_v9, %v1717_v8  ;;  %v7849_v13 = vpack.c.bf16 %v1696_v11, %v1695_v10  ;;  %v1964_v6 = vld [vmem:[#allocation5 + $0x8] sm:$0xff]  ;;  %v1984_v8 = vld [vmem:[#allocation5 + $0x98] sm:$0xff]  ;;  %v1965_v10 = vld [vmem:[#allocation5 + $0x10] sm:$0xff] }
 0x270   : > { %v9701_v16 = vmax.f32 %v1407_v14, 0.0  ;;  %v1719_v14 = vld [vmem:[#allocation3 + $0xf0] sm:$0xff]  ;;  %v1966_v11 = vld [vmem:[#allocation5 + $0x18] sm:$0xff] }
 0x272   : > { %1409 = vst [vmem:[#allocation2 + $0x1] sm:$0xff] %v9701_v16  ;;  %6386 = vmatmul.mubr.f32.vlgmr.msra.gmra.mrb[0].mxu1 %v9701_v16 }
 0x273   : > { %7790 = vmatpush3.bf16.msra.mxu1 %v7789_v15  ;;  %6455 = vmatprep.mubr.msk.f32.mxu1 %vm9176_vm0, %v9177_v1  ;;  %v1720_v15 = vld [vmem:[#allocation3 + $0xf8] sm:$0xff] }
 0x274   : > { %7791 = vmatprep.subr.bf16.mxu1 %v9175_v0 }
 0x277   : > { %7793 = vmatpush3.bf16.msra.mxu1 %v7792_v19  ;;  %v7834_v19 = vpack.c.bf16 %v1720_v15, %v1719_v14  ;;  %v1985_v14 = vld [vmem:[#allocation5 + $0xa0] sm:$0xff]  ;;  %v1986_v15 = vld [vmem:[#allocation5 + $0xa8] sm:$0xff] }
 0x278   : > { %7794 = vmatprep.subr.bf16.mxu1 %v9175_v0 }
 0x279   : > { %v1411_v25 = vld [vmem:[#allocation2] sm:$0xff] }
 0x27a   : > { %v1586_v26 = vld [vmem:[#allocation2 + $0x2] sm:$0xff]  ;;  %6421 = vmatmul.mubr.f32.vlgmr.msra.gmra.mrb[6].mxu0 %v1411_v25  ;;  %v1702_v25 = vld [vmem:[#allocation3 + $0x78] sm:$0xff] }
 0x27b   : > { %1685 = vst [vmem:[#allocation2 + $0x9] sm:$0x1] %v9177_v1  ;;  %7796 = vmatpush3.bf16.msra.mxu1 %v7795_v22  ;;  %6490 = vmatprep.mubr.msk.f32.mxu0 %vm9176_vm0, %v9177_v1  ;;  %v1700_v22 = vld [vmem:[#allocation3 + $0x68] sm:$0xff] }
 0x27c   : > { %7797 = vmatprep.subr.bf16.mxu1 %v9175_v0  ;;  %7814 = vmatpush3.bf16.msra.mxu0 %v7813_v42  ;;  %v7855_v23 = vpack.c.bf16 %v1700_v22, %v1699_v21  ;;  %v1866_v42 = vld [vmem:[#allocation3 + $0x118] sm:$0xff]  ;;  %v1987_v21 = vld [vmem:[#allocation5 + $0xb0] sm:$0xff] }
 0x27d   : > { %7815 = vmatprep.subr.bf16.mxu0 %v9175_v0  ;;  %v7864_v43 = vpack.c.bf16 %v1866_v42, %v1865_v41  ;;  %v1988_v22 = vld [vmem:[#allocation5 + $0xb8] sm:$0xff]  ;;  %v1975_v42 = vld [vmem:[#allocation5 + $0x60] sm:$0xff] }
 0x27f   : > { %7799 = vmatpush3.bf16.msra.mxu1 %v7798_v27 }
 0x280   : > { %7800 = vmatprep.subr.bf16.mxu1 %v9175_v0  ;;  %7817 = vmatpush3.bf16.msra.mxu0 %v7816_v47  ;;  %v1869_v47 = vld [vmem:[#allocation3 + $0x130] sm:$0xff] }
 0x281   : > { %7818 = vmatprep.subr.bf16.mxu0 %v9175_v0  ;;  %v7870_v51 = vpack.c.bf16 %v1870_v48, %v1869_v47  ;;  %v1977_v48 = vld [vmem:[#allocation5 + $0x70] sm:$0xff] }
 0x283   : > { %7802 = vmatpush3.bf16.msra.mxu1 %v7801_v30 }
 0x284   : > { %7803 = vmatprep.subr.bf16.mxu1 %v9175_v0  ;;  %7820 = vmatpush3.bf16.msra.mxu0 %v7819_v53  ;;  %v1872_v53 = vld [vmem:[#allocation3 + $0x148] sm:$0xff] }
 0x285   : > { %7821 = vmatprep.subr.bf16.mxu0 %v9175_v0 }
 0x287   : > { %7805 = vmatpush3.bf16.msra.mxu1 %v7804_v33  ;;  %v5485_v33 = vld [vmem:[%s9213_s25] ss:$0 sm:$0xff] }
 0x288   : > { %7806 = vmatprep.subr.bf16.mxu1 %v9175_v0  ;;  %7823 = vmatpush3.bf16.msra.mxu0 %v7822_v59  ;;  %v1876_v59 = vld [vmem:[#allocation3 + $0x168] sm:$0xff] }
 0x289   : > { %7824 = vmatprep.subr.bf16.mxu0 %v9175_v0 }
 0x28b   : > { %7808 = vmatpush3.bf16.msra.mxu1 %v7807_v36  ;;  %v1863_v36 = vld [vmem:[#allocation3 + $0x100] sm:$0xff] }
 0x28c   : > { %7809 = vmatprep.subr.bf16.mxu1 %v9175_v0  ;;  %7826 = vmatpush3.bf16.msra.mxu0 %v7825_v3  ;;  %v1982_v3 = vld [vmem:[#allocation5 + $0x88] sm:$0xff] }
 0x28d   : > { %7827 = vmatprep.subr.bf16.mxu0 %v9175_v0  ;;  %v7885_v5 = vpack.c.bf16 %v1982_v3, %v1981_v2  ;;  %v2141_v2 = vld [vmem:[#allocation5 + $0x108] sm:$0xff] }
 0x28f   : > { %7811 = vmatpush3.bf16.msra.mxu1 %v7810_v39  ;;  %v7861_v39 = vpack.c.bf16 %v1864_v37, %v1863_v36  ;;  %v1973_v36 = vld [vmem:[#allocation5 + $0x50] sm:$0xff]  ;;  %v1974_v37 = vld [vmem:[#allocation5 + $0x58] sm:$0xff] }
 0x290   : > { %7836 = vmatprep.subr.bf16.mxu1 %v9175_v0  ;;  %7829 = vmatpush3.bf16.msra.mxu0 %v7828_v7  ;;  %v1983_v7 = vld [vmem:[#allocation5 + $0x90] sm:$0xff] }
 0x291   : > { %7830 = vmatprep.subr.bf16.mxu0 %v9175_v0 }
 0x292   : > { %6456 = vmatmul.mubr.f32.vlgmr.msra.gmra.mrb[2].mxu1 %v1586_v26  ;;  %v7858_v26 = vpack.c.bf16 %v1702_v25, %v1701_v24  ;;  %v1970_v24 = vld [vmem:[#allocation5 + $0x38] sm:$0xff]  ;;  %v7894_v25 = vpack.c.bf16 %v1988_v22, %v1987_v21  ;;  %v2152_v21 = vld [vmem:[#allocation5 + $0x160] sm:$0xff]  ;;  %v2153_v22 = vld [vmem:[#allocation5 + $0x168] sm:$0xff] }
 0x293   : > { %6525 = vmatprep.mubr.msk.f32.mxu1 %vm9176_vm0, %v9177_v1  ;;  %7838 = vmatpush3.bf16.msra.mxu1 %v7837_v49 }
 0x294   : > { %7839 = vmatprep.subr.bf16.mxu1 %v9175_v0  ;;  %7832 = vmatpush3.bf16.msra.mxu0 %v7831_v12  ;;  %v7888_v12 = vpack.c.bf16 %v1984_v8, %v1983_v7 }
 0x295   : > { %7833 = vmatprep.subr.bf16.mxu0 %v9175_v0 }
 0x297   : > { %7841 = vmatpush3.bf16.msra.mxu1 %v7840_v54  ;;  %v7873_v54 = vpack.c.bf16 %v1872_v53, %v1871_v52 }
 0x298   : > { %7842 = vmatprep.subr.bf16.mxu1 %v9175_v0  ;;  %7835 = vmatpush3.bf16.msra.mxu0 %v7834_v19  ;;  %v7891_v19 = vpack.c.bf16 %v1986_v15, %v1985_v14  ;;  %v2148_v14 = vld [vmem:[#allocation5 + $0x140] sm:$0xff]  ;;  %v2149_v15 = vld [vmem:[#allocation5 + $0x148] sm:$0xff] }
 0x299   : > { %7860 = vmatprep.subr.bf16.mxu0 %v9175_v0 }
 0x29b   : > { %7844 = vmatpush3.bf16.msra.mxu1 %v7843_v60  ;;  %v7879_v60 = vpack.c.bf16 %v1876_v59, %v1875_v58 }
 0x29c   : > { %7845 = vmatprep.subr.bf16.mxu1 %v9175_v0 }
 0x29f   : > { %7847 = vmatpush3.bf16.msra.mxu1 %v7846_v4  ;;  %v1963_v4 = vld [vmem:[#allocation5] sm:$0xff] }
 0x2a0   : > { %7848 = vmatprep.subr.bf16.mxu1 %v9175_v0  ;;  %v7909_v9 = vpack.c.bf16 %v1964_v6, %v1963_v4  ;;  %v2142_v4 = vld [vmem:[#allocation5 + $0x110] sm:$0xff] }
 0x2a3   : > { %7850 = vmatpush3.bf16.msra.mxu1 %v7849_v13  ;;  %v7912_v13 = vpack.c.bf16 %v1966_v11, %v1965_v10  ;;  %v2146_v11 = vld [vmem:[#allocation5 + $0x130] sm:$0xff] }
 0x2a4   : > { %7851 = vmatprep.subr.bf16.mxu1 %v9175_v0 }
 0x2a7   : > { %7853 = vmatpush3.bf16.msra.mxu1 %v7852_v20  ;;  %v7915_v20 = vpack.c.bf16 %v1968_v18, %v1967_v17  ;;  %v7945_v17 = vpack.c.bf16 %v2149_v15, %v2148_v14  ;;  %v2150_v18 = vld [vmem:[#allocation5 + $0x150] sm:$0xff] }
 0x2a8   : > { %7854 = vmatprep.subr.bf16.mxu1 %v9175_v0 }
 0x2ab   : > { %7856 = vmatpush3.bf16.msra.mxu1 %v7855_v23  ;;  %v1969_v23 = vld [vmem:[#allocation5 + $0x30] sm:$0xff] }
 0x2ac   : > { %7857 = vmatprep.subr.bf16.mxu1 %v9175_v0 }
 0x2af   : > { %7859 = vmatpush3.bf16.msra.mxu1 %v7858_v26  ;;  %v7918_v26 = vpack.c.bf16 %v1970_v24, %v1969_v23  ;;  %v7951_v23 = vpack.c.bf16 %v2153_v22, %v2152_v21  ;;  %v2154_v24 = vld [vmem:[#allocation5 + $0x170] sm:$0xff] }
 0x2b0   : > { %7884 = vmatprep.subr.bf16.mxu1 %v9175_v0 }
 0x345   : > { %v1512_v27 = vpop.f32.mrb[0].mxu1 }
 0x346   : > { %v6387_v28 = vpop.f32.mrb[1].mxu1 }
 0x347   : > { %v1990_v28 = vld [vmem:[#allocation5 + $0xc8] sm:$0xff] }
 0x34d   : > { %v1582_v29 = vpop.f32.mrb[6].mxu0 }
 0x34e   : > { %v1583_v30 = vadd.f32 %v1582_v29, %v1512_v27  ;;  %v6422_v31 = vpop.f32.mrb[7].mxu0  ;;  %v1989_v27 = vld [vmem:[#allocation5 + $0xc0] sm:$0xff] }
 0x34f   : > { %v7897_v29 = vpack.c.bf16 %v1990_v28, %v1989_v27  ;;  %v1972_v31 = vld [vmem:[#allocation5 + $0x48] sm:$0xff]  ;;  %v2257_v28 = vld [vmem:[#allocation7 + $0x80] sm:$0xff] }
 0x365   : > { %v1670_v32 = vpop.f32.mrb[2].mxu1 }
 0x366   : > { %v1674_v34 = vadd.f32 %v1670_v32, %v1583_v30  ;;  %v6457_v35 = vpop.f32.mrb[3].mxu1  ;;  %v1971_v30 = vld [vmem:[#allocation5 + $0x40] sm:$0xff] }
 0x367   : > { %v7921_v32 = vpack.c.bf16 %v1972_v31, %v1971_v30  ;;  %v2239_v30 = vld [vmem:[#allocation7] sm:$0xff] }
 0x368   : > { %v1682_v38 = vadd.f32 %v5485_v33, %v1674_v34  ;;  %v1991_v33 = vld [vmem:[#allocation5 + $0xd0] sm:$0xff]  ;;  %v1992_v34 = vld [vmem:[#allocation5 + $0xd8] sm:$0xff] }
 0x369   : > { %v7900_v35 = vpack.c.bf16 %v1992_v34, %v1991_v33  ;;  %v2259_v33 = vld [vmem:[#allocation7 + $0x90] sm:$0xff]  ;;  %v2260_v34 = vld [vmem:[#allocation7 + $0x98] sm:$0xff] }
 0x36a   : > { %v1683_v40 = vmax.f32 %v1682_v38, 0.0  ;;  %v7924_v38 = vpack.c.bf16 %v1974_v37, %v1973_v36  ;;  %v2241_v36 = vld [vmem:[#allocation7 + $0x10] sm:$0xff]  ;;  %v2242_v37 = vld [vmem:[#allocation7 + $0x18] sm:$0xff] }
 0x36c   : > { %1684 = vst [vmem:[#allocation2 + $0x1] sm:$0xff] %v1683_v40  ;;  %6491 = vmatmul.mubr.f32.vlgmr.msra.gmra.mrb[8].mxu0 %v1683_v40  ;;  %v1994_v40 = vld [vmem:[#allocation5 + $0xe8] sm:$0xff] }
 0x36d   : > { %7862 = vmatpush3.bf16.msra.mxu0 %v7861_v39  ;;  %6560 = vmatprep.mubr.msk.f32.mxu0 %vm9176_vm0, %v9177_v1  ;;  %v1993_v39 = vld [vmem:[#allocation5 + $0xe0] sm:$0xff] }
 0x36e   : > { %7863 = vmatprep.subr.bf16.mxu0 %v9175_v0  ;;  %v7903_v41 = vpack.c.bf16 %v1994_v40, %v1993_v39  ;;  %v7984_v39 = vpack.c.bf16 %v2242_v37, %v2241_v36  ;;  %v2261_v40 = vld [vmem:[#allocation7 + $0xa0] sm:$0xff]  ;;  %v2421_v37 = vld [vmem:[#allocation7 + $0x130] sm:$0xff] }
 0x371   : > { %7865 = vmatpush3.bf16.msra.mxu0 %v7864_v43  ;;  %v1976_v43 = vld [vmem:[#allocation5 + $0x68] sm:$0xff] }
 0x372   : > { %7866 = vmatprep.subr.bf16.mxu0 %v9175_v0  ;;  %v7927_v44 = vpack.c.bf16 %v1976_v43, %v1975_v42  ;;  %v2243_v42 = vld [vmem:[#allocation7 + $0x20] sm:$0xff]  ;;  %v2244_v43 = vld [vmem:[#allocation7 + $0x28] sm:$0xff] }
 0x373   : > { %v1686_v49 = vld [vmem:[#allocation2] sm:$0xff] }
 0x374   : > { %v1861_v50 = vld [vmem:[#allocation2 + $0x2] sm:$0xff]  ;;  %6526 = vmatmul.mubr.f32.vlgmr.msra.gmra.mrb[4].mxu1 %v1686_v49  ;;  %v1978_v49 = vld [vmem:[#allocation5 + $0x78] sm:$0xff] }
 0x375   : > { %1961 = vst [vmem:[#allocation2 + $0x9] sm:$0x1] %v9177_v1  ;;  %7868 = vmatpush3.bf16.msra.mxu0 %v7867_v46  ;;  %6595 = vmatprep.mubr.msk.f32.mxu1 %vm9176_vm0, %v9177_v1  ;;  %v1996_v46 = vld [vmem:[#allocation5 + $0xf8] sm:$0xff] }
 0x376   : > { %4025 = vst [vmem:[#allocation2 + $0x9] sm:$0x1] %v9177_v1  ;;  %7869 = vmatprep.subr.bf16.mxu0 %v9175_v0  ;;  %7886 = vmatpush3.bf16.msra.mxu1 %v7885_v5  ;;  %v7906_v47 = vpack.c.bf16 %v1996_v46, %v1995_v45  ;;  %v2143_v5 = vld [vmem:[#allocation5 + $0x118] sm:$0xff]  ;;  %v7987_v45 = vpack.c.bf16 %v2244_v43, %v2243_v42  ;;  %v2263_v46 = vld [vmem:[#allocation7 + $0xb0] sm:$0xff] }
 0x377   : > { %7887 = vmatprep.subr.bf16.mxu1 %v9175_v0  ;;  %v7936_v8 = vpack.c.bf16 %v2143_v5, %v2142_v4  ;;  %v2251_v5 = vld [vmem:[#allocation7 + $0x60] sm:$0xff]  ;;  %v2425_v43 = vld [vmem:[#allocation7 + $0x150] sm:$0xff] }
 0x379   : > { %7871 = vmatpush3.bf16.msra.mxu0 %v7870_v51 }
 0x37a   : > { %7872 = vmatprep.subr.bf16.mxu0 %v9175_v0  ;;  %7889 = vmatpush3.bf16.msra.mxu1 %v7888_v12  ;;  %v2147_v12 = vld [vmem:[#allocation5 + $0x138] sm:$0xff] }
 0x37b   : > { %7890 = vmatprep.subr.bf16.mxu1 %v9175_v0 }
 0x37d   : > { %7874 = vmatpush3.bf16.msra.mxu0 %v7873_v54 }
 0x37e   : > { %7875 = vmatprep.subr.bf16.mxu0 %v9175_v0  ;;  %7892 = vmatpush3.bf16.msra.mxu1 %v7891_v19  ;;  %v2151_v19 = vld [vmem:[#allocation5 + $0x158] sm:$0xff] }
 0x37f   : > { %7893 = vmatprep.subr.bf16.mxu1 %v9175_v0 }
 0x381   : > { %7877 = vmatpush3.bf16.msra.mxu0 %v7876_v57  ;;  %v5486_v57 = vld [vmem:[%s10221_s26] ss:$0 sm:$0xff]  ;;  %s9179_s26 = smov 120  }
 0x382   : > { %7878 = vmatprep.subr.bf16.mxu0 %v9175_v0  ;;  %7895 = vmatpush3.bf16.msra.mxu1 %v7894_v25  ;;  %v2155_v25 = vld [vmem:[#allocation5 + $0x178] sm:$0xff] }
 0x383   : > { %7896 = vmatprep.subr.bf16.mxu1 %v9175_v0 }
 0x385   : > { %7880 = vmatpush3.bf16.msra.mxu0 %v7879_v60 }
 0x386   : > { %7881 = vmatprep.subr.bf16.mxu0 %v9175_v0  ;;  %7898 = vmatpush3.bf16.msra.mxu1 %v7897_v29  ;;  %v2258_v29 = vld [vmem:[#allocation7 + $0x88] sm:$0xff] }
 0x387   : > { %7899 = vmatprep.subr.bf16.mxu1 %v9175_v0  ;;  %v7957_v31 = vpack.c.bf16 %v2258_v29, %v2257_v28  ;;  %v2417_v28 = vld [vmem:[#allocation7 + $0x110] sm:$0xff]  ;;  %v2418_v29 = vld [vmem:[#allocation7 + $0x118] sm:$0xff] }
 0x389   : > { %7883 = vmatpush3.bf16.msra.mxu0 %v7882_v63  ;;  %v2140_v63 = vld [vmem:[#allocation5 + $0x100] sm:$0xff] }
 0x38a   : > { %7908 = vmatprep.subr.bf16.mxu0 %v9175_v0  ;;  %7901 = vmatpush3.bf16.msra.mxu1 %v7900_v35  ;;  %v7933_v3 = vpack.c.bf16 %v2141_v2, %v2140_v63  ;;  %v2269_v2 = vld [vmem:[#allocation7 + $0xe0] sm:$0xff] }
 0x38b   : > { %7902 = vmatprep.subr.bf16.mxu1 %v9175_v0 }
 0x38c   : > { %6561 = vmatmul.mubr.f32.vlgmr.msra.gmra.mrb[10].mxu0 %v1861_v50  ;;  %v7930_v50 = vpack.c.bf16 %v1978_v49, %v1977_v48  ;;  %v2245_v48 = vld [vmem:[#allocation7 + $0x30] sm:$0xff]  ;;  %v2246_v49 = vld [vmem:[#allocation7 + $0x38] sm:$0xff] }
 0x38d   : > { %6630 = vmatprep.mubr.msk.f32.mxu0 %vm9176_vm0, %v9177_v1  ;;  %7910 = vmatpush3.bf16.msra.mxu0 %v7909_v9  ;;  %v2145_v9 = vld [vmem:[#allocation5 + $0x128] sm:$0xff] }
 0x38e   : > { %7911 = vmatprep.subr.bf16.mxu0 %v9175_v0  ;;  %7904 = vmatpush3.bf16.msra.mxu1 %v7903_v41  ;;  %v2262_v41 = vld [vmem:[#allocation7 + $0xa8] sm:$0xff] }
 0x38f   : > { %7905 = vmatprep.subr.bf16.mxu1 %v9175_v0 }
 0x391   : > { %7913 = vmatpush3.bf16.msra.mxu0 %v7912_v13  ;;  %v7942_v13 = vpack.c.bf16 %v2147_v12, %v2146_v11  ;;  %v2254_v11 = vld [vmem:[#allocation7 + $0x78] sm:$0xff] }
 0x392   : > { %7914 = vmatprep.subr.bf16.mxu0 %v9175_v0  ;;  %7907 = vmatpush3.bf16.msra.mxu1 %v7906_v47  ;;  %v2264_v47 = vld [vmem:[#allocation7 + $0xb8] sm:$0xff] }
 0x393   : > { %7932 = vmatprep.subr.bf16.mxu1 %v9175_v0 }
 0x395   : > { %7916 = vmatpush3.bf16.msra.mxu0 %v7915_v20  ;;  %v7948_v20 = vpack.c.bf16 %v2151_v19, %v2150_v18 }
 0x396   : > { %7917 = vmatprep.subr.bf16.mxu0 %v9175_v0 }
 0x399   : > { %7919 = vmatpush3.bf16.msra.mxu0 %v7918_v26  ;;  %v7954_v26 = vpack.c.bf16 %v2155_v25, %v2154_v24  ;;  %v2415_v25 = vld [vmem:[#allocation7 + $0x100] sm:$0xff] }
 0x39a   : > { %7920 = vmatprep.subr.bf16.mxu0 %v9175_v0 }
 0x39d   : > { %7922 = vmatpush3.bf16.msra.mxu0 %v7921_v32  ;;  %v2240_v32 = vld [vmem:[#allocation7 + $0x8] sm:$0xff] }
 0x39e   : > { %7923 = vmatprep.subr.bf16.mxu0 %v9175_v0  ;;  %v7981_v35 = vpack.c.bf16 %v2240_v32, %v2239_v30 }
 0x3a1   : > { %7925 = vmatpush3.bf16.msra.mxu0 %v7924_v38  ;;  %v7960_v38 = vpack.c.bf16 %v2260_v34, %v2259_v33  ;;  %v8008_v33 = vpack.c.bf16 %v2418_v29, %v2417_v28  ;;  %v2419_v34 = vld [vmem:[#allocation7 + $0x120] sm:$0xff]  ;;  %v2545_v29 = vld [vmem:[#allocation8 + $0xe8] sm:$0xff] }
 0x3a2   : > { %7926 = vmatprep.subr.bf16.mxu0 %v9175_v0  ;;  %v2544_v28 = vld [vmem:[#allocation8 + $0xe0] sm:$0xff] }
 0x3a5   : > { %7928 = vmatpush3.bf16.msra.mxu0 %v7927_v44  ;;  %v7963_v44 = vpack.c.bf16 %v2262_v41, %v2261_v40  ;;  %v2423_v40 = vld [vmem:[#allocation7 + $0x140] sm:$0xff]  ;;  %v2424_v41 = vld [vmem:[#allocation7 + $0x148] sm:$0xff] }
 0x3a6   : > { %7929 = vmatprep.subr.bf16.mxu0 %v9175_v0  ;;  %v8017_v42 = vpack.c.bf16 %v2424_v41, %v2423_v40 }
 0x3a9   : > { %7931 = vmatpush3.bf16.msra.mxu0 %v7930_v50  ;;  %v7966_v50 = vpack.c.bf16 %v2264_v47, %v2263_v46  ;;  %v2427_v46 = vld [vmem:[#allocation7 + $0x160] sm:$0xff]  ;;  %v2428_v47 = vld [vmem:[#allocation7 + $0x168] sm:$0xff] }
 0x3aa   : > { %7956 = vmatprep.subr.bf16.mxu0 %v9175_v0 }
 0x43f   : > { %v1787_v51 = vpop.f32.mrb[8].mxu0 }
 0x440   : > { %v6492_v52 = vpop.f32.mrb[9].mxu0 }
 0x441   : > { %v2265_v52 = vld [vmem:[#allocation7 + $0xc0] sm:$0xff] }
 0x447   : > { %v1857_v53 = vpop.f32.mrb[4].mxu1 }
 0x448   : > { %v1858_v54 = vadd.f32 %v1857_v53, %v1787_v51  ;;  %v6527_v55 = vpop.f32.mrb[5].mxu1  ;;  %v7990_v51 = vpack.c.bf16 %v2246_v49, %v2245_v48  ;;  %v2266_v53 = vld [vmem:[#allocation7 + $0xc8] sm:$0xff]  ;;  %v8023_v48 = vpack.c.bf16 %v2428_v47, %v2427_v46  ;;  %v2429_v49 = vld [vmem:[#allocation7 + $0x170] sm:$0xff] }
 0x449   : > { %v2247_v55 = vld [vmem:[#allocation7 + $0x40] sm:$0xff]  ;;  %v5488_v46 = vld [vmem:[%s10223_s15] ss:$0 sm:$0xff]  ;;  %s10230_s15 = sld [smem:[#allocation35_spill]] }
 0x45f   : > { %v1945_v56 = vpop.f32.mrb[10].mxu0 }
 0x460   : > { %v1949_v58 = vadd.f32 %v1945_v56, %v1858_v54  ;;  %v6562_v59 = vpop.f32.mrb[11].mxu0  ;;  %v7969_v54 = vpack.c.bf16 %v2266_v53, %v2265_v52  ;;  %v2248_v56 = vld [vmem:[#allocation7 + $0x48] sm:$0xff]  ;;  %v2532_v52 = vld [vmem:[#allocation8 + $0x80] sm:$0xff] }
 0x461   : > { %v2268_v59 = vld [vmem:[#allocation7 + $0xd8] sm:$0xff]  ;;  %v2533_v53 = vld [vmem:[#allocation8 + $0x88] sm:$0xff] }
 0x462   : > { %v1957_v60 = vadd.f32 %v5486_v57, %v1949_v58  ;;  %v7993_v57 = vpack.c.bf16 %v2248_v56, %v2247_v55  ;;  %v2267_v58 = vld [vmem:[#allocation7 + $0xd0] sm:$0xff]  ;;  %v8029_v55 = vpack.c.bf16 %v2533_v53, %v2532_v52  ;;  %v2515_v56 = vld [vmem:[#allocation8 + $0x8] sm:$0xff] }
 0x463   : > { %v2691_v52 = vld [vmem:[#allocation8 + $0x108] sm:$0xff] }
 0x464   : > { %v1958_v61 = vadd.f32 %v1957_v60, %v9701_v16  ;;  %v2144_v16 = vld [vmem:[#allocation5 + $0x120] sm:$0xff]  ;;  %v7972_v60 = vpack.c.bf16 %v2268_v59, %v2267_v58  ;;  %v2535_v58 = vld [vmem:[#allocation8 + $0x98] sm:$0xff] }
 0x465   : > { %v7939_v10 = vpack.c.bf16 %v2145_v9, %v2144_v16  ;;  %v2272_v16 = vld [vmem:[#allocation7 + $0xf8] sm:$0xff]  ;;  %v2253_v9 = vld [vmem:[#allocation7 + $0x70] sm:$0xff] }
 0x466   : > { %v1959_v62 = vmax.f32 %v1958_v61, 0.0  ;;  %v2249_v61 = vld [vmem:[#allocation7 + $0x50] sm:$0xff]  ;;  %v8002_v12 = vpack.c.bf16 %v2254_v11, %v2253_v9 }
 0x467   : > { %v2520_v9 = vld [vmem:[#allocation8 + $0x30] sm:$0xff] }
 0x468   : > { %1960 = vst [vmem:[#allocation2 + $0x1] sm:$0xff] %v1959_v62  ;;  %v2250_v62 = vld [vmem:[#allocation7 + $0x58] sm:$0xff] }
 0x469   : > { %v7996_v63 = vpack.c.bf16 %v2250_v62, %v2249_v61  ;;  %v2517_v61 = vld [vmem:[#allocation8 + $0x18] sm:$0xff] }
 0x46f   : > { %v1979_v6 = vld [vmem:[#allocation2 + $0x1] ss:$2 sm:$0xf]  ;;  %v1962_v7 = vld [vmem:[#allocation2] ss:$2 sm:$0xf] }
 0x470   : > { %2237 = vst [vmem:[#allocation2 + $0x5] sm:$0x1] %v9177_v1  ;;  %6596 = vmatmul.mubr.f32.vlgmr.msra.gmra.mrb[6].mxu1 %v1979_v6  ;;  %6631 = vmatmul.mubr.f32.vlgmr.msra.gmra.mrb[12].mxu0 %v1962_v7  ;;  %v2138_v27 = vld [vmem:[#allocation2 + $0x2] ss:$2 sm:$0xf] }
 0x471   : > { %7934 = vmatpush3.bf16.msra.mxu1 %v7933_v3  ;;  %6665 = vmatprep.mubr.msk.f32.mxu1 %vm9176_vm0, %v9177_v1  ;;  %v2270_v3 = vld [vmem:[#allocation7 + $0xe8] sm:$0xff] }
 0x472   : > { %7935 = vmatprep.subr.bf16.mxu1 %v9175_v0  ;;  %6700 = vmatprep.mubr.msk.f32.mxu0 %vm9176_vm0, %v9177_v1  ;;  %v7975_v4 = vpack.c.bf16 %v2270_v3, %v2269_v2  ;;  %v2252_v6 = vld [vmem:[#allocation7 + $0x68] sm:$0xff]  ;;  %v2536_v2 = vld [vmem:[#allocation8 + $0xa0] sm:$0xff] }
 0x473   : > { %7958 = vmatpush3.bf16.msra.mxu0 %v7957_v31  ;;  %v7999_v7 = vpack.c.bf16 %v2252_v6, %v2251_v5  ;;  %v2537_v3 = vld [vmem:[#allocation8 + $0xa8] sm:$0xff] }
 0x474   : > { %7959 = vmatprep.subr.bf16.mxu0 %v9175_v0  ;;  %v2519_v5 = vld [vmem:[#allocation8 + $0x28] sm:$0xff]  ;;  %v8035_v6 = vpack.c.bf16 %v2537_v3, %v2536_v2  ;;  %v2697_v2 = vld [vmem:[#allocation8 + $0x138] sm:$0xff] }
 0x475   : > { %7937 = vmatpush3.bf16.msra.mxu1 %v7936_v8  ;;  %v2271_v8 = vld [vmem:[#allocation7 + $0xf0] sm:$0xff] }
 0x476   : > { %7938 = vmatprep.subr.bf16.mxu1 %v9175_v0 }
 0x477   : > { %7961 = vmatpush3.bf16.msra.mxu0 %v7960_v38  ;;  %v2422_v38 = vld [vmem:[#allocation7 + $0x138] sm:$0xff] }
 0x478   : > { %7962 = vmatprep.subr.bf16.mxu0 %v9175_v0 }
 0x479   : > { %7940 = vmatpush3.bf16.msra.mxu1 %v7939_v10  ;;  %v7978_v10 = vpack.c.bf16 %v2272_v16, %v2271_v8  ;;  %v2538_v8 = vld [vmem:[#allocation8 + $0xb0] sm:$0xff]  ;;  %v2539_v16 = vld [vmem:[#allocation8 + $0xb8] sm:$0xff] }
 0x47a   : > { %7941 = vmatprep.subr.bf16.mxu1 %v9175_v0  ;;  %v8038_v11 = vpack.c.bf16 %v2539_v16, %v2538_v8  ;;  %v2701_v8 = vld [vmem:[#allocation8 + $0x158] sm:$0xff] }
 0x47b   : > { %7964 = vmatpush3.bf16.msra.mxu0 %v7963_v44  ;;  %v2426_v44 = vld [vmem:[#allocation7 + $0x158] sm:$0xff] }
 0x47c   : > { %7965 = vmatprep.subr.bf16.mxu0 %v9175_v0 }
 0x47d   : > { %7943 = vmatpush3.bf16.msra.mxu1 %v7942_v13 }
 0x47e   : > { %7944 = vmatprep.subr.bf16.mxu1 %v9175_v0 }
 0x47f   : > { %7967 = vmatpush3.bf16.msra.mxu0 %v7966_v50  ;;  %v2430_v50 = vld [vmem:[#allocation7 + $0x178] sm:$0xff] }
 0x480   : > { %7968 = vmatprep.subr.bf16.mxu0 %v9175_v0 }
 0x481   : > { %7946 = vmatpush3.bf16.msra.mxu1 %v7945_v17 }
 0x482   : > { %7947 = vmatprep.subr.bf16.mxu1 %v9175_v0 }
 0x483   : > { %7970 = vmatpush3.bf16.msra.mxu0 %v7969_v54  ;;  %v2514_v54 = vld [vmem:[#allocation8] sm:$0xff] }
 0x484   : > { %7971 = vmatprep.subr.bf16.mxu0 %v9175_v0  ;;  %v8053_v59 = vpack.c.bf16 %v2515_v56, %v2514_v54  ;;  %v2692_v54 = vld [vmem:[#allocation8 + $0x110] sm:$0xff] }
 0x485   : > { %7949 = vmatpush3.bf16.msra.mxu1 %v7948_v20  ;;  %v5487_v20 = vld [vmem:[%s10222_s10] ss:$0 sm:$0xff]  ;;  %s10229_s10 = sld [smem:[#allocation34_spill]] }
 0x486   : > { %7950 = vmatprep.subr.bf16.mxu1 %v9175_v0 }
 0x487   : > { %7973 = vmatpush3.bf16.msra.mxu0 %v7972_v60  ;;  %v2516_v60 = vld [vmem:[#allocation8 + $0x10] sm:$0xff] }
 0x488   : > { %7974 = vmatprep.subr.bf16.mxu0 %v9175_v0 }
 0x489   : > { %7952 = vmatpush3.bf16.msra.mxu1 %v7951_v23 }
 0x48a   : > { %7953 = vmatprep.subr.bf16.mxu1 %v9175_v0 }
 0x48b   : > { %7976 = vmatpush3.bf16.msra.mxu0 %v7975_v4  ;;  %v2518_v4 = vld [vmem:[#allocation8 + $0x20] sm:$0xff] }
 0x48c   : > { %7977 = vmatprep.subr.bf16.mxu0 %v9175_v0 }
 0x48d   : > { %7955 = vmatpush3.bf16.msra.mxu1 %v7954_v26  ;;  %v2416_v26 = vld [vmem:[#allocation7 + $0x108] sm:$0xff] }
 0x48e   : > { %7980 = vmatprep.subr.bf16.mxu1 %v9175_v0 }
 0x48f   : > { %7979 = vmatpush3.bf16.msra.mxu0 %v7978_v10  ;;  %v2521_v10 = vld [vmem:[#allocation8 + $0x38] sm:$0xff] }
 0x490   : > { %6666 = vmatmul.mubr.f32.vlgmr.msra.gmra.mrb[8].mxu1 %v2138_v27  ;;  %8004 = vmatprep.subr.bf16.mxu0 %v9175_v0  ;;  %v8005_v27 = vpack.c.bf16 %v2416_v26, %v2415_v25  ;;  %v2524_v25 = vld [vmem:[#allocation8 + $0x50] sm:$0xff]  ;;  %v2525_v26 = vld [vmem:[#allocation8 + $0x58] sm:$0xff] }
 0x491   : > { %6735 = vmatprep.mubr.msk.f32.mxu1 %vm9176_vm0, %v9177_v1  ;;  %7982 = vmatpush3.bf16.msra.mxu1 %v7981_v35  ;;  %v2420_v35 = vld [vmem:[#allocation7 + $0x128] sm:$0xff] }
 0x492   : > { %7983 = vmatprep.subr.bf16.mxu1 %v9175_v0  ;;  %v8011_v36 = vpack.c.bf16 %v2420_v35, %v2419_v34  ;;  %v2546_v34 = vld [vmem:[#allocation8 + $0xf0] sm:$0xff]  ;;  %v2547_v35 = vld [vmem:[#allocation8 + $0xf8] sm:$0xff] }
 0x495   : > { %7985 = vmatpush3.bf16.msra.mxu1 %v7984_v39  ;;  %v8014_v39 = vpack.c.bf16 %v2422_v38, %v2421_v37  ;;  %v8050_v37 = vpack.c.bf16 %v2547_v35, %v2546_v34  ;;  %v2529_v38 = vld [vmem:[#allocation8 + $0x78] sm:$0xff]  ;;  %v2799_v34 = vld [vmem:[%s10224_s18 + $0x58] sm:$0xff] }
 0x496   : > { %7986 = vmatprep.subr.bf16.mxu1 %v9175_v0 }
 0x499   : > { %7988 = vmatpush3.bf16.msra.mxu1 %v7987_v45  ;;  %v8020_v45 = vpack.c.bf16 %v2426_v44, %v2425_v43 }
 0x49a   : > { %7989 = vmatprep.subr.bf16.mxu1 %v9175_v0 }
 0x49d   : > { %7991 = vmatpush3.bf16.msra.mxu1 %v7990_v51  ;;  %v8026_v51 = vpack.c.bf16 %v2430_v50, %v2429_v49 }
 0x49e   : > { %7992 = vmatprep.subr.bf16.mxu1 %v9175_v0 }
 0x4a1   : > { %7994 = vmatpush3.bf16.msra.mxu1 %v7993_v57  ;;  %v2534_v57 = vld [vmem:[#allocation8 + $0x90] sm:$0xff] }
 0x4a2   : > { %7995 = vmatprep.subr.bf16.mxu1 %v9175_v0  ;;  %v8032_v62 = vpack.c.bf16 %v2535_v58, %v2534_v57 }
 0x4a5   : > { %7997 = vmatpush3.bf16.msra.mxu1 %v7996_v63  ;;  %v8056_v63 = vpack.c.bf16 %v2517_v61, %v2516_v60  ;;  %v2694_v60 = vld [vmem:[#allocation8 + $0x120] sm:$0xff]  ;;  %v2695_v61 = vld [vmem:[#allocation8 + $0x128] sm:$0xff] }
 0x4a6   : > { %7998 = vmatprep.subr.bf16.mxu1 %v9175_v0 }
 0x4a9   : > { %8000 = vmatpush3.bf16.msra.mxu1 %v7999_v7  ;;  %v8059_v7 = vpack.c.bf16 %v2519_v5, %v2518_v4  ;;  %v2698_v4 = vld [vmem:[#allocation8 + $0x140] sm:$0xff]  ;;  %v2699_v5 = vld [vmem:[#allocation8 + $0x148] sm:$0xff] }
 0x4aa   : > { %8001 = vmatprep.subr.bf16.mxu1 %v9175_v0 }
 0x4ad   : > { %8003 = vmatpush3.bf16.msra.mxu1 %v8002_v12  ;;  %v8062_v12 = vpack.c.bf16 %v2521_v10, %v2520_v9  ;;  %v2702_v9 = vld [vmem:[#allocation8 + $0x160] sm:$0xff]  ;;  %v2703_v10 = vld [vmem:[#allocation8 + $0x168] sm:$0xff] }
 0x4ae   : > { %8028 = vmatprep.subr.bf16.mxu1 %v9175_v0 }
 0x543   : > { %v2063_v13 = vpop.f32.mrb[6].mxu1  ;;  %v2133_v14 = vpop.f32.mrb[12].mxu0 }
 0x544   : > { %v2134_v15 = vadd.f32 %v2133_v14, %v2063_v13  ;;  %v6597_v17 = vpop.f32.mrb[7].mxu1  ;;  %v6632_v18 = vpop.f32.mrb[13].mxu0  ;;  %v2540_v13 = vld [vmem:[#allocation8 + $0xc0] sm:$0xff]  ;;  %v2541_v14 = vld [vmem:[#allocation8 + $0xc8] sm:$0xff] }
 0x545   : > { %v2522_v17 = vld [vmem:[#allocation8 + $0x40] sm:$0xff]  ;;  %v2523_v18 = vld [vmem:[#allocation8 + $0x48] sm:$0xff] }
 0x563   : > { %v2222_v19 = vpop.f32.mrb[8].mxu1 }
 0x564   : > { %v2226_v21 = vadd.f32 %v2222_v19, %v2134_v15  ;;  %v6667_v22 = vpop.f32.mrb[9].mxu1  ;;  %v8041_v15 = vpack.c.bf16 %v2541_v14, %v2540_v13  ;;  %v8065_v19 = vpack.c.bf16 %v2523_v18, %v2522_v17  ;;  %v2705_v13 = vld [vmem:[#allocation8 + $0x178] sm:$0xff]  ;;  %v2789_v17 = vld [vmem:[%s10224_s18 + $0x8] sm:$0xff] }
 0x565   : > { %v2790_v18 = vld [vmem:[%s10224_s18 + $0x10] sm:$0xff] }
 0x566   : > { %v9817_v23 = vadd.f32 %v5487_v20, %v2226_v21  ;;  %v2542_v20 = vld [vmem:[#allocation8 + $0xd0] sm:$0xff]  ;;  %v2543_v21 = vld [vmem:[#allocation8 + $0xd8] sm:$0xff] }
 0x567   : > { %v8044_v22 = vpack.c.bf16 %v2543_v21, %v2542_v20  ;;  %v2791_v20 = vld [vmem:[%s10224_s18 + $0x18] sm:$0xff] }
 0x568   : > { %v2235_v24 = vmax.f32 %v9817_v23, 0.0  ;;  %v8104_v21 = vpack.c.bf16 %v2791_v20, %v2790_v18  ;;  %v5494_v23 = vld [vmem:[%s10224_s18 + $0xa0] sm:$0xff]  ;;  %v5509_v20 = vld [vmem:[%s10224_s18 + $0x118] sm:$0xff] }
 0x56a   : > { %2236 = vst [vmem:[#allocation2 + $0x1] sm:$0xf] %v2235_v24 }
 0x571   : > { %v2255_v30 = vld [vmem:[#allocation2 + $0x1] sm:$0xf] }
 0x572   : > { %v2238_v31 = vld [vmem:[#allocation2] sm:$0xf]  ;;  %6701 = vmatmul.mubr.f32.vlgmr.msra.gmra.mrb[14].mxu0 %v2255_v30  ;;  %v8047_v30 = vpack.c.bf16 %v2545_v29, %v2544_v28  ;;  %v2795_v28 = vld [vmem:[%s10224_s18 + $0x38] sm:$0xff] }
 0x573   : > { %v2413_v32 = vld [vmem:[#allocation2 + $0x2] sm:$0xf]  ;;  %6736 = vmatmul.mubr.f32.vlgmr.msra.gmra.mrb[10].mxu1 %v2238_v31  ;;  %8006 = vmatpush3.bf16.msra.mxu0 %v8005_v27  ;;  %v8068_v27 = vpack.c.bf16 %v2525_v26, %v2524_v25  ;;  %v2526_v31 = vld [vmem:[#allocation8 + $0x60] sm:$0xff]  ;;  %v2793_v25 = vld [vmem:[%s10224_s18 + $0x28] sm:$0xff] }
 0x574   : > { %2512 = vst [vmem:[#allocation2 + $0x5] sm:$0x1] %v9177_v1  ;;  %6770 = vmatprep.mubr.msk.f32.mxu0 %vm9176_vm0, %v9177_v1  ;;  %8007 = vmatprep.subr.bf16.mxu0 %v9175_v0 }
 0x575   : > { %6805 = vmatprep.mubr.msk.f32.mxu1 %vm9176_vm0, %v9177_v1  ;;  %8030 = vmatpush3.bf16.msra.mxu1 %v8029_v55  ;;  %v2693_v55 = vld [vmem:[#allocation8 + $0x118] sm:$0xff] }
 0x576   : > { %8031 = vmatprep.subr.bf16.mxu1 %v9175_v0 }
 0x577   : > { %8009 = vmatpush3.bf16.msra.mxu0 %v8008_v33 }
 0x578   : > { %8010 = vmatprep.subr.bf16.mxu0 %v9175_v0 }
 0x579   : > { %8033 = vmatpush3.bf16.msra.mxu1 %v8032_v62  ;;  %v8083_v62 = vpack.c.bf16 %v2695_v61, %v2694_v60 }
 0x57a   : > { %8034 = vmatprep.subr.bf16.mxu1 %v9175_v0 }
 0x57b   : > { %8012 = vmatpush3.bf16.msra.mxu0 %v8011_v36  ;;  %v2528_v36 = vld [vmem:[#allocation8 + $0x70] sm:$0xff] }
 0x57c   : > { %8013 = vmatprep.subr.bf16.mxu0 %v9175_v0 }
 0x57d   : > { %8036 = vmatpush3.bf16.msra.mxu1 %v8035_v6  ;;  %v8089_v6 = vpack.c.bf16 %v2699_v5, %v2698_v4  ;;  %v5499_v4 = vld [vmem:[%s10224_s18 + $0xc8] sm:$0xff] }
 0x57e   : > { %8037 = vmatprep.subr.bf16.mxu1 %v9175_v0 }
 0x57f   : > { %8015 = vmatpush3.bf16.msra.mxu0 %v8014_v39  ;;  %v8074_v39 = vpack.c.bf16 %v2529_v38, %v2528_v36  ;;  %v2800_v36 = vld [vmem:[%s10224_s18 + $0x60] sm:$0xff] }
 0x580   : > { %8016 = vmatprep.subr.bf16.mxu0 %v9175_v0 }
 0x581   : > { %8039 = vmatpush3.bf16.msra.mxu1 %v8038_v11  ;;  %v8095_v11 = vpack.c.bf16 %v2703_v10, %v2702_v9  ;;  %v5503_v9 = vld [vmem:[%s10224_s18 + $0xe8] sm:$0xff] }
 0x582   : > { %8040 = vmatprep.subr.bf16.mxu1 %v9175_v0 }
 0x583   : > { %8018 = vmatpush3.bf16.msra.mxu0 %v8017_v42 }
 0x584   : > { %8019 = vmatprep.subr.bf16.mxu0 %v9175_v0 }
 0x585   : > { %8042 = vmatpush3.bf16.msra.mxu1 %v8041_v15  ;;  %v2788_v15 = vld [vmem:[%s10224_s18] sm:$0xff] }
 0x586   : > { %8043 = vmatprep.subr.bf16.mxu1 %v9175_v0 }
 0x587   : > { %8021 = vmatpush3.bf16.msra.mxu0 %v8020_v45 }
 0x588   : > { %8022 = vmatprep.subr.bf16.mxu0 %v9175_v0 }
 0x589   : > { %8045 = vmatpush3.bf16.msra.mxu1 %v8044_v22  ;;  %v2792_v22 = vld [vmem:[%s10224_s18 + $0x20] sm:$0xff] }
 0x58a   : > { %8046 = vmatprep.subr.bf16.mxu1 %v9175_v0  ;;  %v8107_v26 = vpack.c.bf16 %v2793_v25, %v2792_v22  ;;  %v5510_v22 = vld [vmem:[%s10224_s18 + $0x120] sm:$0xff]  ;;  %v5511_v25 = vld [vmem:[%s10224_s18 + $0x128] sm:$0xff] }
 0x58b   : > { %8024 = vmatpush3.bf16.msra.mxu0 %v8023_v48 }
 0x58c   : > { %8025 = vmatprep.subr.bf16.mxu0 %v9175_v0 }
 0x58d   : > { %8048 = vmatpush3.bf16.msra.mxu1 %v8047_v30  ;;  %v2796_v30 = vld [vmem:[%s10224_s18 + $0x40] sm:$0xff] }
 0x58e   : > { %8049 = vmatprep.subr.bf16.mxu1 %v9175_v0 }
 0x58f   : > { %8027 = vmatpush3.bf16.msra.mxu0 %v8026_v51  ;;  %v2690_v51 = vld [vmem:[#allocation8 + $0x100] sm:$0xff] }
 0x590   : > { %8052 = vmatprep.subr.bf16.mxu0 %v9175_v0  ;;  %v8077_v53 = vpack.c.bf16 %v2691_v52, %v2690_v51 }
 0x591   : > { %8051 = vmatpush3.bf16.msra.mxu1 %v8050_v37  ;;  %v2801_v37 = vld [vmem:[%s10224_s18 + $0x68] sm:$0xff] }
 0x592   : > { %6771 = vmatmul.mubr.f32.vlgmr.msra.gmra.mrb[16].mxu0 %v2413_v32  ;;  %v2527_v32 = vld [vmem:[#allocation8 + $0x68] sm:$0xff]  ;;  %8076 = vmatprep.subr.bf16.mxu1 %v9175_v0  ;;  %v8119_v38 = vpack.c.bf16 %v2801_v37, %v2800_v36  ;;  %v5519_v37 = vld [vmem:[%s10224_s18 + $0x168] sm:$0xff] }
 0x593   : > { %6840 = vmatprep.mubr.msk.f32.mxu0 %vm9176_vm0, %v9177_v1  ;;  %8054 = vmatpush3.bf16.msra.mxu0 %v8053_v59  ;;  %v8071_v33 = vpack.c.bf16 %v2527_v32, %v2526_v31  ;;  %v8080_v59 = vpack.c.bf16 %v2693_v55, %v2692_v54  ;;  %v2797_v31 = vld [vmem:[%s10224_s18 + $0x48] sm:$0xff]  ;;  %v5518_v36 = vld [vmem:[%s10224_s18 + $0x160] sm:$0xff] }
 0x594   : > { %8055 = vmatprep.subr.bf16.mxu0 %v9175_v0  ;;  %v8113_v32 = vpack.c.bf16 %v2797_v31, %v2796_v30  ;;  %v5491_v54 = vld [vmem:[%s10224_s18 + $0x88] sm:$0xff]  ;;  %v5514_v30 = vld [vmem:[%s10224_s18 + $0x140] sm:$0xff] }
 0x595   : > { %v5515_v31 = vld [vmem:[%s10224_s18 + $0x148] sm:$0xff] }
 0x597   : > { %8057 = vmatpush3.bf16.msra.mxu0 %v8056_v63  ;;  %v2696_v63 = vld [vmem:[#allocation8 + $0x130] sm:$0xff] }
 0x598   : > { %8058 = vmatprep.subr.bf16.mxu0 %v9175_v0  ;;  %v8086_v3 = vpack.c.bf16 %v2697_v2, %v2696_v63  ;;  %v5497_v63 = vld [vmem:[%s10224_s18 + $0xb8] sm:$0xff] }
 0x59b   : > { %8060 = vmatpush3.bf16.msra.mxu0 %v8059_v7  ;;  %v2700_v7 = vld [vmem:[#allocation8 + $0x150] sm:$0xff] }
 0x59c   : > { %8061 = vmatprep.subr.bf16.mxu0 %v9175_v0  ;;  %v8092_v16 = vpack.c.bf16 %v2701_v8, %v2700_v7  ;;  %v5501_v7 = vld [vmem:[%s10224_s18 + $0xd8] sm:$0xff] }
 0x59f   : > { %8063 = vmatpush3.bf16.msra.mxu0 %v8062_v12  ;;  %v2704_v12 = vld [vmem:[#allocation8 + $0x170] sm:$0xff] }
 0x5a0   : > { %8064 = vmatprep.subr.bf16.mxu0 %v9175_v0  ;;  %v8098_v14 = vpack.c.bf16 %v2705_v13, %v2704_v12  ;;  %v5505_v12 = vld [vmem:[%s10224_s18 + $0xf8] sm:$0xff] }
 0x5a3   : > { %8066 = vmatpush3.bf16.msra.mxu0 %v8065_v19  ;;  %v8101_v19 = vpack.c.bf16 %v2789_v17, %v2788_v15  ;;  %v5507_v15 = vld [vmem:[%s10224_s18 + $0x108] sm:$0xff] }
 0x5a4   : > { %8067 = vmatprep.subr.bf16.mxu0 %v9175_v0 }
 0x5a7   : > { %8069 = vmatpush3.bf16.msra.mxu0 %v8068_v27  ;;  %v2794_v27 = vld [vmem:[%s10224_s18 + $0x30] sm:$0xff] }
 0x5a8   : > { %8070 = vmatprep.subr.bf16.mxu0 %v9175_v0  ;;  %v8110_v29 = vpack.c.bf16 %v2795_v28, %v2794_v27  ;;  %v5512_v27 = vld [vmem:[%s10224_s18 + $0x130] sm:$0xff]  ;;  %v5513_v28 = vld [vmem:[%s10224_s18 + $0x138] sm:$0xff] }
 0x5ab   : > { %8072 = vmatpush3.bf16.msra.mxu0 %v8071_v33  ;;  %v2798_v33 = vld [vmem:[%s10224_s18 + $0x50] sm:$0xff] }
 0x5ac   : > { %8073 = vmatprep.subr.bf16.mxu0 %v9175_v0  ;;  %v8116_v35 = vpack.c.bf16 %v2799_v34, %v2798_v33  ;;  %v5516_v33 = vld [vmem:[%s10224_s18 + $0x150] sm:$0xff]  ;;  %v5517_v34 = vld [vmem:[%s10224_s18 + $0x158] sm:$0xff] }
 0x5af   : > { %8075 = vmatpush3.bf16.msra.mxu0 %v8074_v39  ;;  %v2802_v39 = vld [vmem:[%s10224_s18 + $0x70] sm:$0xff] }
 0x5b0   : > { %8100 = vmatprep.subr.bf16.mxu0 %v9175_v0 }
 0x645   : > { %v2339_v40 = vpop.f32.mrb[14].mxu0 }
 0x646   : > { %v2409_v41 = vpop.f32.mrb[10].mxu1  ;;  %v6702_v43 = vpop.f32.mrb[15].mxu0 }
 0x647   : > { %v2410_v42 = vadd.f32 %v2409_v41, %v2339_v40  ;;  %v6737_v44 = vpop.f32.mrb[11].mxu1  ;;  %v2803_v40 = vld [vmem:[%s10224_s18 + $0x78] sm:$0xff] }
 0x648   : > { %v8122_v41 = vpack.c.bf16 %v2803_v40, %v2802_v39  ;;  %v5520_v39 = vld [vmem:[%s10224_s18 + $0x170] sm:$0xff]  ;;  %v5521_v40 = vld [vmem:[%s10224_s18 + $0x178] sm:$0xff] }
 0x665   : > { %v2497_v45 = vpop.f32.mrb[16].mxu0 }
 0x666   : > { %v2501_v47 = vadd.f32 %v2497_v45, %v2410_v42  ;;  %v6772_v48 = vpop.f32.mrb[17].mxu0 }
 0x668   : > { %v2509_v49 = vadd.f32 %v5488_v46, %v2501_v47  ;;  %v3151_v47 = vld [vmem:[%s1119_s2] sm:$0x1]  ;;  %s10233_s2 = sld [smem:[#allocation38_spill]] }
 0x669   : > { %3153 = vrot.lane.b32.xlu0 %v3151_v47, %s9178_s11  ;;  %v5525_v47 = vld [vmem:[%s10224_s18 + $0x198] sm:$0xff]  ;;  %s10234_s11 = sld [smem:[#allocation39_spill]] }
 0x66a   : > { %v2510_v50 = vmax.f32 %v2509_v49, 0.0  ;;  %v5489_v49 = vld [vmem:[%s10226_s8] ss:$0 sm:$0xff]  ;;  %s10232_s8 = sld [smem:[#allocation37_spill]] }
 0x66c   : > { %2511 = vst [vmem:[#allocation2 + $0x1] sm:$0xf] %v2510_v50 }
 0x673   : > { %v2530_v56 = vld [vmem:[#allocation2 + $0x1] sm:$0xf] }
 0x674   : > { %v2513_v57 = vld [vmem:[#allocation2] sm:$0xf]  ;;  %6806 = vmatmul.mubr.f32.vlgmr.msra.gmra.mrb[12].mxu1 %v2530_v56 }
 0x675   : > { %v2688_v58 = vld [vmem:[#allocation2 + $0x2] sm:$0xf]  ;;  %6841 = vmatmul.mubr.f32.vlgmr.msra.gmra.mrb[18].mxu0 %v2513_v57  ;;  %8078 = vmatpush3.bf16.msra.mxu1 %v8077_v53 }
 0x676   : > { %3467 = vst [vmem:[#allocation2 + $0x5] sm:$0x1] %v9177_v1  ;;  %6875 = vmatprep.mubr.msk.f32.mxu1 %vm9176_vm0, %v9177_v1  ;;  %8079 = vmatprep.subr.bf16.mxu1 %v9175_v0  ;;  %v5490_v53 = vld [vmem:[%s10224_s18 + $0x80] sm:$0xff] }
 0x677   : > { %6910 = vmatprep.mubr.msk.f32.mxu0 %vm9176_vm0, %v9177_v1  ;;  %8102 = vmatpush3.bf16.msra.mxu0 %v8101_v19  ;;  %v8125_v56 = vpack.c.bf16 %v5491_v54, %v5490_v53  ;;  %v5508_v19 = vld [vmem:[%s10224_s18 + $0x110] sm:$0xff]  ;;  %v5529_v53 = vld [vmem:[%s10224_s18 + $0x1b8] sm:$0xff] }
 0x678   : > { %8103 = vmatprep.subr.bf16.mxu0 %v9175_v0 }
 0x679   : > { %8081 = vmatpush3.bf16.msra.mxu1 %v8080_v59  ;;  %v5493_v59 = vld [vmem:[%s10224_s18 + $0x98] sm:$0xff] }
 0x67a   : > { %8082 = vmatprep.subr.bf16.mxu1 %v9175_v0 }
 0x67b   : > { %8105 = vmatpush3.bf16.msra.mxu0 %v8104_v21  ;;  %v8152_v21 = vpack.c.bf16 %v5509_v20, %v5508_v19  ;;  %v3487_v19 = vld [vmem:[#allocation10 + $0x80] sm:$0xff]  ;;  %v3488_v20 = vld [vmem:[#allocation10 + $0x88] sm:$0xff] }
 0x67c   : > { %8106 = vmatprep.subr.bf16.mxu0 %v9175_v0 }
 0x67d   : > { %8084 = vmatpush3.bf16.msra.mxu1 %v8083_v62  ;;  %v5496_v62 = vld [vmem:[%s10224_s18 + $0xb0] sm:$0xff] }
 0x67e   : > { %8085 = vmatprep.subr.bf16.mxu1 %v9175_v0  ;;  %v8134_v2 = vpack.c.bf16 %v5497_v63, %v5496_v62  ;;  %v5536_v63 = vld [vmem:[%s10224_s18 + $0x1f0] sm:$0xff] }
 0x67f   : > { %8108 = vmatpush3.bf16.msra.mxu0 %v8107_v26  ;;  %v8155_v26 = vpack.c.bf16 %v5511_v25, %v5510_v22  ;;  %v3489_v22 = vld [vmem:[#allocation10 + $0x90] sm:$0xff]  ;;  %v3490_v25 = vld [vmem:[#allocation10 + $0x98] sm:$0xff] }
 0x680   : > { %8109 = vmatprep.subr.bf16.mxu0 %v9175_v0 }
 0x681   : > { %8087 = vmatpush3.bf16.msra.mxu1 %v8086_v3  ;;  %v5498_v3 = vld [vmem:[%s10224_s18 + $0xc0] sm:$0xff] }
 0x682   : > { %8088 = vmatprep.subr.bf16.mxu1 %v9175_v0  ;;  %v8137_v5 = vpack.c.bf16 %v5499_v4, %v5498_v3 }
 0x683   : > { %8111 = vmatpush3.bf16.msra.mxu0 %v8110_v29  ;;  %v8158_v29 = vpack.c.bf16 %v5513_v28, %v5512_v27  ;;  %v3491_v27 = vld [vmem:[#allocation10 + $0xa0] sm:$0xff]  ;;  %v3492_v28 = vld [vmem:[#allocation10 + $0xa8] sm:$0xff] }
 0x684   : > { %8112 = vmatprep.subr.bf16.mxu0 %v9175_v0 }
 0x685   : > { %8090 = vmatpush3.bf16.msra.mxu1 %v8089_v6  ;;  %v5500_v6 = vld [vmem:[%s10224_s18 + $0xd0] sm:$0xff] }
 0x686   : > { %8091 = vmatprep.subr.bf16.mxu1 %v9175_v0  ;;  %v8140_v8 = vpack.c.bf16 %v5501_v7, %v5500_v6  ;;  %v5541_v6 = vld [vmem:[%s10227_s1 + $0x10] sm:$0xff]  ;;  %v2787_v7 = vld [vmem:[%s10228_s28] sm:$0x1]  ;;  %s1124_s28 = scalar_lea.vmem %s9338_s3, %s5555_s0 }
 0x687   : > { %8114 = vmatpush3.bf16.msra.mxu0 %v8113_v32  ;;  %v8161_v32 = vpack.c.bf16 %v5515_v31, %v5514_v30  ;;  %v3493_v30 = vld [vmem:[#allocation10 + $0xb0] sm:$0xff]  ;;  %v3494_v31 = vld [vmem:[#allocation10 + $0xb8] sm:$0xff] }
 0x688   : > { %8115 = vmatprep.subr.bf16.mxu0 %v9175_v0 }
 0x689   : > { %8093 = vmatpush3.bf16.msra.mxu1 %v8092_v16  ;;  %v5502_v16 = vld [vmem:[%s10224_s18 + $0xe0] sm:$0xff] }
 0x68a   : > { %8094 = vmatprep.subr.bf16.mxu1 %v9175_v0  ;;  %v8143_v10 = vpack.c.bf16 %v5503_v9, %v5502_v16 }
 0x68b   : > { %8117 = vmatpush3.bf16.msra.mxu0 %v8116_v35  ;;  %v8164_v35 = vpack.c.bf16 %v5517_v34, %v5516_v33  ;;  %v3495_v33 = vld [vmem:[#allocation10 + $0xc0] sm:$0xff]  ;;  %v3496_v34 = vld [vmem:[#allocation10 + $0xc8] sm:$0xff] }
 0x68c   : > { %8118 = vmatprep.subr.bf16.mxu0 %v9175_v0 }
 0x68d   : > { %8096 = vmatpush3.bf16.msra.mxu1 %v8095_v11  ;;  %v5504_v11 = vld [vmem:[%s10224_s18 + $0xf0] sm:$0xff] }
 0x68e   : > { %8097 = vmatprep.subr.bf16.mxu1 %v9175_v0  ;;  %v8146_v13 = vpack.c.bf16 %v5505_v12, %v5504_v11 }
 0x68f   : > { %8120 = vmatpush3.bf16.msra.mxu0 %v8119_v38  ;;  %v8167_v38 = vpack.c.bf16 %v5519_v37, %v5518_v36  ;;  %v3497_v36 = vld [vmem:[#allocation10 + $0xd0] sm:$0xff]  ;;  %v3498_v37 = vld [vmem:[#allocation10 + $0xd8] sm:$0xff] }
 0x690   : > { %8121 = vmatprep.subr.bf16.mxu0 %v9175_v0 }
 0x691   : > { %8099 = vmatpush3.bf16.msra.mxu1 %v8098_v14  ;;  %v5506_v14 = vld [vmem:[%s10224_s18 + $0x100] sm:$0xff] }
 0x692   : > { %7028 = vmatprep.subr.mxu1 %v9177_v1  ;;  %v8149_v17 = vpack.c.bf16 %v5507_v15, %v5506_v14  ;;  %v5539_v15 = vld [vmem:[%s10227_s1 + $0x8] sm:$0xff] }
 0x693   : > { %8123 = vmatpush3.bf16.msra.mxu0 %v8122_v41  ;;  %v8170_v41 = vpack.c.bf16 %v5521_v40, %v5520_v39  ;;  %v3499_v39 = vld [vmem:[#allocation10 + $0xe0] sm:$0xff]  ;;  %v3500_v40 = vld [vmem:[#allocation10 + $0xe8] sm:$0xff] }
 0x694   : > { %6876 = vmatmul.mubr.f32.vlgmr.msra.gmra.mrb[14].mxu1 %v2688_v58  ;;  %8124 = vmatprep.subr.bf16.mxu0 %v9175_v0  ;;  %v5492_v58 = vld [vmem:[%s10224_s18 + $0x90] sm:$0xff] }
 0x695   : > { %7030 = vmatprep.mubr.msk.f32.mxu1 %vm9176_vm0, %v9177_v1  ;;  %v8128_v60 = vpack.c.bf16 %v5493_v59, %v5492_v58  ;;  %v5532_v59 = vld [vmem:[%s10224_s18 + $0x1d0] sm:$0xff]  ;;  %7029 = vmatpush3.msra.mxu1 %v5541_v6  ;;  %v3471_v6 = vld [vmem:[#allocation10 + $0x10] sm:$0xff] }
 0x696   : > { %7033 = vmatprep.subr.mxu1 %v9177_v1 }
 0x6db   : > { %v3154_v11 = vpop.permute.xlu0 %3153 }
 0x747   : > { %v2614_v42 = vpop.f32.mrb[12].mxu1 }
 0x748   : > { %v2684_v43 = vpop.f32.mrb[18].mxu0  ;;  %v6807_v45 = vpop.f32.mrb[13].mxu1 }
 0x749   : > { %v2685_v44 = vadd.f32 %v2684_v43, %v2614_v42  ;;  %v6842_v46 = vpop.f32.mrb[19].mxu0  ;;  %v5522_v42 = vld [vmem:[%s10224_s18 + $0x180] sm:$0xff]  ;;  %v5523_v43 = vld [vmem:[%s10224_s18 + $0x188] sm:$0xff] }
 0x74a   : > { %v5524_v46 = vld [vmem:[%s10224_s18 + $0x190] sm:$0xff] }
 0x767   : > { %v2772_v48 = vpop.f32.mrb[14].mxu1 }
 0x768   : > { %v2776_v50 = vadd.f32 %v2772_v48, %v2685_v44  ;;  %v6877_v51 = vpop.f32.mrb[15].mxu1  ;;  %v8173_v44 = vpack.c.bf16 %v5523_v43, %v5522_v42  ;;  %v8176_v48 = vpack.c.bf16 %v5525_v47, %v5524_v46  ;;  %v3501_v42 = vld [vmem:[#allocation10 + $0xf0] sm:$0xff]  ;;  %v3502_v43 = vld [vmem:[#allocation10 + $0xf8] sm:$0xff]  ;;  %v3317_v46 = vld [vmem:[%s10229_s10 + $0x2] sm:$0x1] }
 0x76a   : > { %v2784_v52 = vadd.f32 %v5489_v49, %v2776_v50  ;;  %v5526_v49 = vld [vmem:[%s10224_s18 + $0x1a0] sm:$0xff]  ;;  %v5527_v50 = vld [vmem:[%s10224_s18 + $0x1a8] sm:$0xff] }
 0x76b   : > { %v8179_v51 = vpack.c.bf16 %v5527_v50, %v5526_v49 }
 0x76c   : > { %v2785_v55 = vadd.f32 %v2784_v52, %v2235_v24  ;;  %v5495_v24 = vld [vmem:[%s10224_s18 + $0xa8] sm:$0xff]  ;;  %v5528_v52 = vld [vmem:[%s10224_s18 + $0x1b0] sm:$0xff] }
 0x76d   : > { %v8131_v61 = vpack.c.bf16 %v5495_v24, %v5494_v23  ;;  %v8182_v54 = vpack.c.bf16 %v5529_v53, %v5528_v52  ;;  %v5534_v24 = vld [vmem:[%s10224_s18 + $0x1e0] sm:$0xff] }
 0x76e   : > { %v9900_v57 = vmax.f32 %v2785_v55, 0.0  ;;  %v5530_v55 = vld [vmem:[%s10224_s18 + $0x1c0] sm:$0xff] }
 0x76f   : > { %v3242_v53 = vld [vmem:[%s10229_s10 + $0x1] sm:$0x1] }
 0x770   : > { %6911 = vmatmul.mubr.f32.vlgmr.msra.gmra.mrb[20].mxu0 %v9900_v57  ;;  %v2893_v18 = vrot.slane %v9900_v57, 1  ;;  %v2983_v45 = vrot.slane %v9900_v57, 2  ;;  %v3073_v4 = vrot.slane %v9900_v57, 3 }
 0x771   : > { %8126 = vmatpush3.bf16.msra.mxu0 %v8125_v56  ;;  %6945 = vmatprep.mubr.msk.f32.mxu0 %vm9176_vm0, %v9177_v1  ;;  %v5531_v56 = vld [vmem:[%s10224_s18 + $0x1c8] sm:$0xff] }
 0x772   : > { %8127 = vmatprep.subr.bf16.mxu0 %v9175_v0  ;;  %v8185_v58 = vpack.c.bf16 %v5531_v56, %v5530_v55 }
 0x775   : > { %8129 = vmatpush3.bf16.msra.mxu0 %v8128_v60  ;;  %v5533_v60 = vld [vmem:[%s10224_s18 + $0x1d8] sm:$0xff] }
 0x776   : > { %8130 = vmatprep.subr.bf16.mxu0 %v9175_v0  ;;  %v8188_v23 = vpack.c.bf16 %v5533_v60, %v5532_v59 }
 0x779   : > { %8132 = vmatpush3.bf16.msra.mxu0 %v8131_v61  ;;  %v5535_v61 = vld [vmem:[%s10224_s18 + $0x1e8] sm:$0xff] }
 0x77a   : > { %8133 = vmatprep.subr.bf16.mxu0 %v9175_v0  ;;  %v8191_v62 = vpack.c.bf16 %v5535_v61, %v5534_v24 }
 0x77d   : > { %8135 = vmatpush3.bf16.msra.mxu0 %v8134_v2  ;;  %v5537_v2 = vld [vmem:[%s10224_s18 + $0x1f8] sm:$0xff] }
 0x77e   : > { %8136 = vmatprep.subr.bf16.mxu0 %v9175_v0  ;;  %v8194_v3 = vpack.c.bf16 %v5537_v2, %v5536_v63 }
 0x781   : > { %8138 = vmatpush3.bf16.msra.mxu0 %v8137_v5  ;;  %v3162_v5 = vld [vmem:[%s10227_s1] sm:$0xff] }
 0x782   : > { %8139 = vmatprep.subr.bf16.mxu0 %v9175_v0 }
 0x785   : > { %8141 = vmatpush3.bf16.msra.mxu0 %v8140_v8 }
 0x786   : > { %8142 = vmatprep.subr.bf16.mxu0 %v9175_v0 }
 0x789   : > { %8144 = vmatpush3.bf16.msra.mxu0 %v8143_v10 }
 0x78a   : > { %8145 = vmatprep.subr.bf16.mxu0 %v9175_v0 }
 0x78d   : > { %8147 = vmatpush3.bf16.msra.mxu0 %v8146_v13 }
 0x78e   : > { %8148 = vmatprep.subr.bf16.mxu0 %v9175_v0 }
 0x790   : > { %6946 = vmatmul.mubr.f32.vlgmr.msra.gmra.mrb[20].mxu0 %v2893_v18  ;;  %v5543_v18 = vld [vmem:[%s10227_s1 + $0x18] sm:$0xff] }
 0x791   : > { %8150 = vmatpush3.bf16.msra.mxu0 %v8149_v17  ;;  %6980 = vmatprep.mubr.msk.f32.mxu0 %vm9176_vm0, %v9177_v1 }
 0x792   : > { %8151 = vmatprep.subr.bf16.mxu0 %v9175_v0 }
 0x795   : > { %8153 = vmatpush3.bf16.msra.mxu0 %v8152_v21  ;;  %v8197_v21 = vpack.c.bf16 %v3488_v20, %v3487_v19  ;;  %v3479_v19 = vld [vmem:[#allocation10 + $0x50] sm:$0xff]  ;;  %v3480_v20 = vld [vmem:[#allocation10 + $0x58] sm:$0xff] }
 0x796   : > { %8154 = vmatprep.subr.bf16.mxu0 %v9175_v0 }
 0x799   : > { %8156 = vmatpush3.bf16.msra.mxu0 %v8155_v26  ;;  %v8200_v26 = vpack.c.bf16 %v3490_v25, %v3489_v22  ;;  %v3481_v22 = vld [vmem:[#allocation10 + $0x60] sm:$0xff]  ;;  %v3482_v25 = vld [vmem:[#allocation10 + $0x68] sm:$0xff] }
 0x79a   : > { %8157 = vmatprep.subr.bf16.mxu0 %v9175_v0 }
 0x79d   : > { %8159 = vmatpush3.bf16.msra.mxu0 %v8158_v29  ;;  %v8203_v29 = vpack.c.bf16 %v3492_v28, %v3491_v27  ;;  %v3483_v27 = vld [vmem:[#allocation10 + $0x70] sm:$0xff]  ;;  %v3484_v28 = vld [vmem:[#allocation10 + $0x78] sm:$0xff] }
 0x79e   : > { %8160 = vmatprep.subr.bf16.mxu0 %v9175_v0 }
 0x7a1   : > { %8162 = vmatpush3.bf16.msra.mxu0 %v8161_v32  ;;  %v8206_v32 = vpack.c.bf16 %v3494_v31, %v3493_v30  ;;  %v3645_v30 = vld [vmem:[#allocation10 + $0x100] sm:$0xff]  ;;  %v3646_v31 = vld [vmem:[#allocation10 + $0x108] sm:$0xff] }
 0x7a2   : > { %8163 = vmatprep.subr.bf16.mxu0 %v9175_v0 }
 0x7a5   : > { %8165 = vmatpush3.bf16.msra.mxu0 %v8164_v35  ;;  %v8209_v35 = vpack.c.bf16 %v3496_v34, %v3495_v33  ;;  %v3647_v33 = vld [vmem:[#allocation10 + $0x110] sm:$0xff]  ;;  %v3648_v34 = vld [vmem:[#allocation10 + $0x118] sm:$0xff] }
 0x7a6   : > { %8166 = vmatprep.subr.bf16.mxu0 %v9175_v0 }
 0x7a9   : > { %8168 = vmatpush3.bf16.msra.mxu0 %v8167_v38  ;;  %v8212_v38 = vpack.c.bf16 %v3498_v37, %v3497_v36  ;;  %v8248_v36 = vpack.c.bf16 %v3648_v34, %v3647_v33  ;;  %v3649_v37 = vld [vmem:[#allocation10 + $0x120] sm:$0xff]  ;;  %v3757_v34 = vld [vmem:[#allocation11 + $0x68] sm:$0xff] }
 0x7aa   : > { %8169 = vmatprep.subr.bf16.mxu0 %v9175_v0  ;;  %v3756_v33 = vld [vmem:[#allocation11 + $0x60] sm:$0xff] }
 0x7ad   : > { %8171 = vmatpush3.bf16.msra.mxu0 %v8170_v41  ;;  %v8215_v41 = vpack.c.bf16 %v3500_v40, %v3499_v39  ;;  %v3651_v40 = vld [vmem:[#allocation10 + $0x130] sm:$0xff] }
 0x7ae   : > { %8172 = vmatprep.subr.bf16.mxu0 %v9175_v0 }
 0x7b0   : > { %6981 = vmatmul.mubr.f32.vlgmr.msra.gmra.mrb[20].mxu0 %v2983_v45  ;;  %v3163_v45 = vld [vmem:[%s10229_s10] sm:$0x1] }
 0x7b1   : > { %8174 = vmatpush3.bf16.msra.mxu0 %v8173_v44  ;;  %7015 = vmatprep.mubr.msk.f32.mxu0 %vm9176_vm0, %v9177_v1  ;;  %v8218_v44 = vpack.c.bf16 %v3502_v43, %v3501_v42  ;;  %v3653_v43 = vld [vmem:[#allocation10 + $0x140] sm:$0xff] }
 0x7b2   : > { %8175 = vmatprep.subr.bf16.mxu0 %v9175_v0 }
 0x7b5   : > { %8177 = vmatpush3.bf16.msra.mxu0 %v8176_v48 }
 0x7b6   : > { %8178 = vmatprep.subr.bf16.mxu0 %v9175_v0 }
 0x7b9   : > { %8180 = vmatpush3.bf16.msra.mxu0 %v8179_v51 }
 0x7ba   : > { %8181 = vmatprep.subr.bf16.mxu0 %v9175_v0 }
 0x7bd   : > { %8183 = vmatpush3.bf16.msra.mxu0 %v8182_v54  ;;  %v3392_v54 = vld [vmem:[%s10229_s10 + $0x3] sm:$0x1] }
 0x7be   : > { %8184 = vmatprep.subr.bf16.mxu0 %v9175_v0 }
 0x7c1   : > { %8186 = vmatpush3.bf16.msra.mxu0 %v8185_v58 }
 0x7c2   : > { %8187 = vmatprep.subr.bf16.mxu0 %v9175_v0 }
 0x7c5   : > { %8189 = vmatpush3.bf16.msra.mxu0 %v8188_v23 }
 0x7c6   : > { %8190 = vmatprep.subr.bf16.mxu0 %v9175_v0 }
 0x7c9   : > { %8192 = vmatpush3.bf16.msra.mxu0 %v8191_v62 }
 0x7ca   : > { %8193 = vmatprep.subr.bf16.mxu0 %v9175_v0 }
 0x7cd   : > { %8195 = vmatpush3.bf16.msra.mxu0 %v8194_v3  ;;  %v3469_v3 = vld [vmem:[#allocation10] sm:$0xff] }
 0x7ce   : > { %7018 = vmatprep.subr.mxu0 %v9177_v1 }
 0x7d0   : > { %7016 = vmatmul.mubr.f32.vlgmr.msra.gmra.mrb[20].mxu0 %v3073_v4  ;;  %v3470_v4 = vld [vmem:[#allocation10 + $0x8] sm:$0xff] }
 0x7d1   : > { %7020 = vmatprep.mubr.msk.f32.mxu0 %vm9176_vm0, %v9177_v1  ;;  %7019 = vmatpush3.msra.mxu0 %v3162_v5  ;;  %v8221_v5 = vpack.c.bf16 %v3470_v4, %v3469_v3 }
 0x7d2   : > { %7023 = vmatprep.subr.mxu0 %v9177_v1 }
 0x8a3   : > { %v3141_v8 = vpop.f32.mrb[20].mxu0 }
 0x8a4   : > { %v8652_v57 = vadd.f32 %v3141_v8, %v2787_v7  ;;  %v7017_v16 = vpop.f32.mrb[21].mxu0  ;;  %v3472_v7 = vld [vmem:[#allocation10 + $0x18] sm:$0xff] }
 0x8a5   : > { %v8224_v16 = vpack.c.bf16 %v3472_v7, %v3471_v6  ;;  %v3767_v6 = vld [vmem:[#allocation11 + $0xa8] sm:$0xff]  ;;  %v3748_v7 = vld [vmem:[#allocation11 + $0x20] sm:$0xff] }
 0x8a6   : > { %3147 = vst.msk [vmem:[%s1127_s7] sm:$0x1] %vm3146_vm1, %v8652_v57  ;;  %v3148_v9 = vmul.f32 0.5, %v8652_v57 }
 0x8a8   : > { %v3149_v10 = vmul.f32 1.442695, %v3148_v9  ;;  %v3473_v9 = vld [vmem:[#allocation10 + $0x20] sm:$0xff] }
 0x8aa   : > { %8810 = vpow2.f32 %v3149_v10  ;;  %v3474_v10 = vld [vmem:[#allocation10 + $0x28] sm:$0xff] }
 0x8b4   : > { %v8811_v12 = vpop.eup %8810 }
 0x8b5   : > { %v3156_v13 = vmul.f32 %v8811_v12, %v3154_v11  ;;  %v8227_v11 = vpack.c.bf16 %v3474_v10, %v3473_v9  ;;  %v3475_v12 = vld [vmem:[#allocation10 + $0x30] sm:$0xff]  ;;  %v3769_v10 = vld [vmem:[#allocation11 + $0xb8] sm:$0xff] }
 0x8b6   : > { %v3768_v9 = vld [vmem:[#allocation11 + $0xb0] sm:$0xff] }
 0x8b7   : > { %3158 = vrot.lane.b32.xlu0 %v3156_v13, %s9179_s26  ;;  %v3476_v13 = vld [vmem:[#allocation10 + $0x38] sm:$0xff] }
 0x929   : > { %v3159_v14 = vpop.permute.xlu0 %3158 }
 0x92a   : > { %v3161_v17 = vadd.f32 %v8652_v57, %v3159_v14  ;;  %v8230_v14 = vpack.c.bf16 %v3476_v13, %v3475_v12  ;;  %v3751_v12 = vld [vmem:[#allocation11 + $0x38] sm:$0xff]  ;;  %v8278_v13 = vpack.c.bf16 %v3769_v10, %v3768_v9  ;;  %v3932_v9 = vld [vmem:[#allocation11 + $0x160] sm:$0xff]  ;;  %v3933_v10 = vld [vmem:[#allocation11 + $0x168] sm:$0xff] }
 0x92c   : > { %7021 = vmatmul.mubr.msk.f32.vlgmr.msra.gmra.mrb[22].mxu0 %vm3164_vm2, %v3161_v17  ;;  %7031 = vmatmul.mubr.msk.f32.vlgmr.msra.gmra.mrb[16].mxu1 %vm3164_vm2, %v3161_v17 }
 0x92d   : > { %7024 = vmatpush3.msra.mxu0 %v5539_v15  ;;  %7034 = vmatpush3.msra.mxu1 %v5543_v18  ;;  %v3477_v15 = vld [vmem:[#allocation10 + $0x40] sm:$0xff] }
 0x92e   : > { %7025 = vmatprep.mubr.msk.f32.mxu0 %vm9176_vm0, %v9177_v1  ;;  %7035 = vmatprep.mubr.msk.f32.mxu1 %vm9176_vm0, %v9177_v1 }
 0x92f   : > { %8196 = vmatprep.subr.bf16.mxu1 %v9175_v0  ;;  %8292 = vmatprep.subr.bf16.mxu0 %v9175_v0 }
 0x930   : > { %7026 = vmatmul.mubr.msk.f32.vlgmr.msra.gmra.mrb[24].mxu0 %vm3164_vm2, %v3161_v17  ;;  %7036 = vmatmul.mubr.msk.f32.vlgmr.msra.gmra.mrb[18].mxu1 %vm3164_vm2, %v3161_v17  ;;  %v3478_v17 = vld [vmem:[#allocation10 + $0x48] sm:$0xff] }
 0x931   : > { %8198 = vmatpush3.bf16.msra.mxu1 %v8197_v21  ;;  %7070 = vmatprep.mubr.msk.f32.mxu1 %vm9176_vm0, %v9177_v1  ;;  %v8233_v18 = vpack.c.bf16 %v3478_v17, %v3477_v15  ;;  %v8236_v21 = vpack.c.bf16 %v3480_v20, %v3479_v19  ;;  %v3770_v15 = vld [vmem:[#allocation11 + $0xc0] sm:$0xff]  ;;  %v3771_v17 = vld [vmem:[#allocation11 + $0xc8] sm:$0xff] }
 0x932   : > { %8199 = vmatprep.subr.bf16.mxu1 %v9175_v0  ;;  %7210 = vmatprep.mubr.msk.f32.mxu0 %vm9176_vm0, %v9177_v1  ;;  %v3752_v19 = vld [vmem:[#allocation11 + $0x40] sm:$0xff]  ;;  %v3753_v20 = vld [vmem:[#allocation11 + $0x48] sm:$0xff] }
 0x935   : > { %8201 = vmatpush3.bf16.msra.mxu1 %v8200_v26  ;;  %v8239_v26 = vpack.c.bf16 %v3482_v25, %v3481_v22  ;;  %v3772_v22 = vld [vmem:[#allocation11 + $0xd0] sm:$0xff]  ;;  %v3773_v25 = vld [vmem:[#allocation11 + $0xd8] sm:$0xff] }
 0x936   : > { %8202 = vmatprep.subr.bf16.mxu1 %v9175_v0 }
 0x939   : > { %8204 = vmatpush3.bf16.msra.mxu1 %v8203_v29  ;;  %v8242_v29 = vpack.c.bf16 %v3484_v28, %v3483_v27  ;;  %v3754_v27 = vld [vmem:[#allocation11 + $0x50] sm:$0xff]  ;;  %v3755_v28 = vld [vmem:[#allocation11 + $0x58] sm:$0xff] }
 0x93a   : > { %8205 = vmatprep.subr.bf16.mxu1 %v9175_v0 }
 0x93d   : > { %8207 = vmatpush3.bf16.msra.mxu1 %v8206_v32  ;;  %v8245_v32 = vpack.c.bf16 %v3646_v31, %v3645_v30  ;;  %v3774_v30 = vld [vmem:[#allocation11 + $0xe0] sm:$0xff]  ;;  %v3775_v31 = vld [vmem:[#allocation11 + $0xe8] sm:$0xff] }
 0x93e   : > { %8208 = vmatprep.subr.bf16.mxu1 %v9175_v0 }
 0x941   : > { %8210 = vmatpush3.bf16.msra.mxu1 %v8209_v35 }
 0x942   : > { %8211 = vmatprep.subr.bf16.mxu1 %v9175_v0 }
 0x945   : > { %8213 = vmatpush3.bf16.msra.mxu1 %v8212_v38  ;;  %v3650_v38 = vld [vmem:[#allocation10 + $0x128] sm:$0xff] }
 0x946   : > { %8214 = vmatprep.subr.bf16.mxu1 %v9175_v0  ;;  %v8251_v39 = vpack.c.bf16 %v3650_v38, %v3649_v37  ;;  %v3777_v37 = vld [vmem:[#allocation11 + $0xf8] sm:$0xff]  ;;  %v3758_v38 = vld [vmem:[#allocation11 + $0x70] sm:$0xff] }
 0x949   : > { %8216 = vmatpush3.bf16.msra.mxu1 %v8215_v41  ;;  %v3652_v41 = vld [vmem:[#allocation10 + $0x138] sm:$0xff] }
 0x94a   : > { %8217 = vmatprep.subr.bf16.mxu1 %v9175_v0  ;;  %v8254_v42 = vpack.c.bf16 %v3652_v41, %v3651_v40  ;;  %v3759_v40 = vld [vmem:[#allocation11 + $0x78] sm:$0xff] }
 0x94b   : > { %v8314_v41 = vpack.c.bf16 %v3759_v40, %v3758_v38  ;;  %v4052_v38 = vld [vmem:[#allocation13 + $0xb8] sm:$0xff] }
 0x94c   : > { %v4034_v40 = vld [vmem:[#allocation13 + $0x38] sm:$0xff] }
 0x94d   : > { %8219 = vmatpush3.bf16.msra.mxu1 %v8218_v44  ;;  %v3654_v44 = vld [vmem:[#allocation10 + $0x148] sm:$0xff] }
 0x94e   : > { %8220 = vmatprep.subr.bf16.mxu1 %v9175_v0 }
 0x9ff   : > { %v3234_v47 = vpop.f32.mrb[22].mxu0  ;;  %v3384_v48 = vpop.f32.mrb[16].mxu1 }
 0xa00   : > { %v3235_v49 = vadd.f32 %v3234_v47, %v3163_v45  ;;  %v3385_v50 = vadd.f32 %v3384_v48, %v3317_v46  ;;  %v7022_v51 = vpop.f32.mrb[23].mxu0  ;;  %v7032_v52 = vpop.f32.mrb[17].mxu1  ;;  %v8257_v45 = vpack.c.bf16 %v3654_v44, %v3653_v43  ;;  %v3655_v46 = vld [vmem:[#allocation10 + $0x150] sm:$0xff]  ;;  %v3656_v47 = vld [vmem:[#allocation10 + $0x158] sm:$0xff] }
 0xa01   : > { %v8260_v48 = vpack.c.bf16 %v3656_v47, %v3655_v46  ;;  %v3659_v52 = vld [vmem:[#allocation10 + $0x170] sm:$0xff] }
 0xa02   : > { %v3238_v55 = vmax.f32 %v3235_v49, 0.0  ;;  %v3388_v56 = vmax.f32 %v3385_v50, 0.0  ;;  %v3657_v49 = vld [vmem:[#allocation10 + $0x160] sm:$0xff]  ;;  %v3658_v50 = vld [vmem:[#allocation10 + $0x168] sm:$0xff] }
 0xa03   : > { %v3309_v58 = vpop.f32.mrb[24].mxu0  ;;  %v3459_v59 = vpop.f32.mrb[18].mxu1  ;;  %v8263_v51 = vpack.c.bf16 %v3658_v50, %v3657_v49 }
 0xa04   : > { %3239 = vst [vmem:[#allocation2 + $0x1] sm:$0x1] %v3238_v55  ;;  %3389 = vst [vmem:[#allocation2 + $0x3] sm:$0x1] %v3388_v56  ;;  %v3310_v60 = vadd.f32 %v3309_v58, %v3242_v53  ;;  %v3460_v23 = vadd.f32 %v3459_v59, %v3392_v54  ;;  %v7027_v24 = vpop.f32.mrb[25].mxu0  ;;  %v7037_v61 = vpop.f32.mrb[19].mxu1 }
 0xa05   : > { %v3660_v53 = vld [vmem:[#allocation10 + $0x178] sm:$0xff]  ;;  %v3762_v55 = vld [vmem:[#allocation11 + $0x80] sm:$0xff]  ;;  %v3763_v56 = vld [vmem:[#allocation11 + $0x88] sm:$0xff] }
 0xa06   : > { %v3313_v62 = vmax.f32 %v3310_v60, 0.0  ;;  %v3463_v63 = vmax.f32 %v3460_v23, 0.0  ;;  %v8266_v54 = vpack.c.bf16 %v3660_v53, %v3659_v52  ;;  %v3744_v58 = vld [vmem:[#allocation11] sm:$0xff]  ;;  %v8269_v59 = vpack.c.bf16 %v3763_v56, %v3762_v55  ;;  %v3745_v60 = vld [vmem:[#allocation11 + $0x8] sm:$0xff]  ;;  %v3764_v23 = vld [vmem:[#allocation11 + $0x90] sm:$0xff] }
 0xa07   : > { %v3765_v24 = vld [vmem:[#allocation11 + $0x98] sm:$0xff]  ;;  %v8293_v61 = vpack.c.bf16 %v3745_v60, %v3744_v58  ;;  %v3920_v53 = vld [vmem:[#allocation11 + $0x100] sm:$0xff]  ;;  %v3922_v56 = vld [vmem:[#allocation11 + $0x110] sm:$0xff] }
 0xa08   : > { %3314 = vst [vmem:[#allocation2 + $0x2] sm:$0x1] %v3313_v62  ;;  %3464 = vst [vmem:[#allocation2 + $0x4] sm:$0x1] %v3463_v63  ;;  %v3746_v62 = vld [vmem:[#allocation11 + $0x10] sm:$0xff]  ;;  %v3747_v63 = vld [vmem:[#allocation11 + $0x18] sm:$0xff]  ;;  %v8272_v3 = vpack.c.bf16 %v3765_v24, %v3764_v23 }
 0xa09   : > { %8294 = vmatpush3.bf16.msra.mxu0 %v8293_v61  ;;  %v8296_v4 = vpack.c.bf16 %v3747_v63, %v3746_v62  ;;  %v3923_v58 = vld [vmem:[#allocation11 + $0x118] sm:$0xff]  ;;  %v3924_v24 = vld [vmem:[#allocation11 + $0x120] sm:$0xff]  ;;  %v3925_v61 = vld [vmem:[#allocation11 + $0x128] sm:$0xff] }
 0xa0a   : > { %8295 = vmatprep.subr.bf16.mxu0 %v9175_v0  ;;  %v8320_v23 = vpack.c.bf16 %v3923_v58, %v3922_v56  ;;  %v8323_v62 = vpack.c.bf16 %v3925_v61, %v3924_v24  ;;  %v3926_v63 = vld [vmem:[#allocation11 + $0x130] sm:$0xff]  ;;  %v4058_v56 = vld [vmem:[#allocation13 + $0xe8] sm:$0xff]  ;;  %v4060_v61 = vld [vmem:[#allocation13 + $0xf8] sm:$0xff] }
 0xa0b   : > { %v4059_v24 = vld [vmem:[#allocation13 + $0xf0] sm:$0xff] }
 0xa0d   : > { %8297 = vmatpush3.bf16.msra.mxu0 %v8296_v4 }
 0xa0e   : > { %8298 = vmatprep.subr.bf16.mxu0 %v9175_v0 }
 0xa0f   : > { %v10019_v2 = vld [vmem:[#allocation2 + $0x1] sm:$0xf] }
 0xa10   : > { %3466 = vst [vmem:[#allocation2 + $0x1] sm:$0xf] %v10019_v2 }
 0xa17   : > { %v3485_v8 = vld [vmem:[#allocation2 + $0x1] sm:$0xf] }
 0xa18   : > { %v10022_v57 = vld [vmem:[#allocation2 + $0x2] sm:$0xf]  ;;  %7071 = vmatmul.mubr.f32.vlgmr.msra.gmra.mrb[20].mxu1 %v3485_v8 }
 0xa19   : > { %3742 = vst [vmem:[#allocation2 + $0x5] sm:$0x1] %v9177_v1  ;;  %8222 = vmatpush3.bf16.msra.mxu1 %v8221_v5  ;;  %7105 = vmatprep.mubr.msk.f32.mxu1 %vm9176_vm0, %v9177_v1  ;;  %v3468_v35 = vld [vmem:[#allocation2] sm:$0xf]  ;;  %v3766_v5 = vld [vmem:[#allocation11 + $0xa0] sm:$0xff] }
 0xa1a   : > { %8223 = vmatprep.subr.bf16.mxu1 %v9175_v0  ;;  %v3749_v8 = vld [vmem:[#allocation11 + $0x28] sm:$0xff] }
 0xa1d   : > { %8225 = vmatpush3.bf16.msra.mxu1 %v8224_v16  ;;  %v8299_v16 = vpack.c.bf16 %v3749_v8, %v3748_v7  ;;  %v3930_v8 = vld [vmem:[#allocation11 + $0x150] sm:$0xff] }
 0xa1e   : > { %8226 = vmatprep.subr.bf16.mxu1 %v9175_v0 }
 0xa1f   : > { %8300 = vmatpush3.bf16.msra.mxu0 %v8299_v16 }
 0xa20   : > { %8301 = vmatprep.subr.bf16.mxu0 %v9175_v0 }
 0xa21   : > { %8228 = vmatpush3.bf16.msra.mxu1 %v8227_v11  ;;  %v3750_v11 = vld [vmem:[#allocation11 + $0x30] sm:$0xff] }
 0xa22   : > { %8229 = vmatprep.subr.bf16.mxu1 %v9175_v0 }
 0xa25   : > { %8231 = vmatpush3.bf16.msra.mxu1 %v8230_v14  ;;  %v8302_v14 = vpack.c.bf16 %v3751_v12, %v3750_v11  ;;  %v8335_v11 = vpack.c.bf16 %v3933_v10, %v3932_v9  ;;  %v3934_v12 = vld [vmem:[#allocation11 + $0x170] sm:$0xff]  ;;  %v5546_v9 = vld [vmem:[%s10231_s16] ss:$0 sm:$0xff] }
 0xa26   : > { %8232 = vmatprep.subr.bf16.mxu1 %v9175_v0 }
 0xa27   : > { %8303 = vmatpush3.bf16.msra.mxu0 %v8302_v14 }
 0xa28   : > { %8304 = vmatprep.subr.bf16.mxu0 %v9175_v0 }
 0xa29   : > { %8234 = vmatpush3.bf16.msra.mxu1 %v8233_v18  ;;  %v8281_v18 = vpack.c.bf16 %v3771_v17, %v3770_v15  ;;  %v4045_v17 = vld [vmem:[#allocation13 + $0x80] sm:$0xff] }
 0xa2a   : > { %8235 = vmatprep.subr.bf16.mxu1 %v9175_v0 }
 0xa2d   : > { %8237 = vmatpush3.bf16.msra.mxu1 %v8236_v21  ;;  %v8305_v21 = vpack.c.bf16 %v3753_v20, %v3752_v19  ;;  %v4027_v19 = vld [vmem:[#allocation13] sm:$0xff] }
 0xa2e   : > { %8238 = vmatprep.subr.bf16.mxu1 %v9175_v0 }
 0xa2f   : > { %8306 = vmatpush3.bf16.msra.mxu0 %v8305_v21  ;;  %v4028_v21 = vld [vmem:[#allocation13 + $0x8] sm:$0xff] }
 0xa30   : > { %8307 = vmatprep.subr.bf16.mxu0 %v9175_v0 }
 0xa31   : > { %8240 = vmatpush3.bf16.msra.mxu1 %v8239_v26  ;;  %v8284_v26 = vpack.c.bf16 %v3773_v25, %v3772_v22  ;;  %v4047_v22 = vld [vmem:[#allocation13 + $0x90] sm:$0xff]  ;;  %v4048_v25 = vld [vmem:[#allocation13 + $0x98] sm:$0xff] }
 0xa32   : > { %8241 = vmatprep.subr.bf16.mxu1 %v9175_v0 }
 0xa35   : > { %8243 = vmatpush3.bf16.msra.mxu1 %v8242_v29  ;;  %v8308_v29 = vpack.c.bf16 %v3755_v28, %v3754_v27  ;;  %v4029_v27 = vld [vmem:[#allocation13 + $0x10] sm:$0xff]  ;;  %v4030_v28 = vld [vmem:[#allocation13 + $0x18] sm:$0xff] }
 0xa36   : > { %8244 = vmatprep.subr.bf16.mxu1 %v9175_v0 }
 0xa37   : > { %8309 = vmatpush3.bf16.msra.mxu0 %v8308_v29  ;;  %v8344_v29 = vpack.c.bf16 %v4048_v25, %v4047_v22 }
 0xa38   : > { %7106 = vmatmul.mubr.f32.vlgmr.msra.gmra.mrb[22].mxu1 %v3468_v35  ;;  %8310 = vmatprep.subr.bf16.mxu0 %v9175_v0  ;;  %v8311_v35 = vpack.c.bf16 %v3757_v34, %v3756_v33  ;;  %v4031_v33 = vld [vmem:[#allocation13 + $0x20] sm:$0xff]  ;;  %v4032_v34 = vld [vmem:[#allocation13 + $0x28] sm:$0xff] }
 0xa39   : > { %8246 = vmatpush3.bf16.msra.mxu1 %v8245_v32  ;;  %7140 = vmatprep.mubr.msk.f32.mxu1 %vm9176_vm0, %v9177_v1  ;;  %v8287_v32 = vpack.c.bf16 %v3775_v31, %v3774_v30  ;;  %v8368_v30 = vpack.c.bf16 %v4030_v28, %v4029_v27  ;;  %v4049_v31 = vld [vmem:[#allocation13 + $0xa0] sm:$0xff]  ;;  %v4208_v27 = vld [vmem:[#allocation13 + $0x128] sm:$0xff] }
 0xa3a   : > { %8247 = vmatprep.subr.bf16.mxu1 %v9175_v0 }
 0xa3b   : > { %8312 = vmatpush3.bf16.msra.mxu0 %v8311_v35 }
 0xa3c   : > { %8313 = vmatprep.subr.bf16.mxu0 %v9175_v0 }
 0xa3d   : > { %8249 = vmatpush3.bf16.msra.mxu1 %v8248_v36  ;;  %v3776_v36 = vld [vmem:[#allocation11 + $0xf0] sm:$0xff] }
 0xa3e   : > { %8250 = vmatprep.subr.bf16.mxu1 %v9175_v0 }
 0xa3f   : > { %8315 = vmatpush3.bf16.msra.mxu0 %v8314_v41 }
 0xa40   : > { %8340 = vmatprep.subr.bf16.mxu0 %v9175_v0 }
 0xa41   : > { %8252 = vmatpush3.bf16.msra.mxu1 %v8251_v39  ;;  %v8290_v39 = vpack.c.bf16 %v3777_v37, %v3776_v36  ;;  %v8371_v36 = vpack.c.bf16 %v4032_v34, %v4031_v33  ;;  %v4051_v37 = vld [vmem:[#allocation13 + $0xb0] sm:$0xff]  ;;  %v4212_v33 = vld [vmem:[#allocation13 + $0x148] sm:$0xff] }
 0xa42   : > { %8253 = vmatprep.subr.bf16.mxu1 %v9175_v0  ;;  %v8350_v41 = vpack.c.bf16 %v4052_v38, %v4051_v37  ;;  %v4215_v38 = vld [vmem:[#allocation13 + $0x160] sm:$0xff] }
 0xa45   : > { %8255 = vmatpush3.bf16.msra.mxu1 %v8254_v42 }
 0xa46   : > { %8256 = vmatprep.subr.bf16.mxu1 %v9175_v0 }
 0xa49   : > { %8258 = vmatpush3.bf16.msra.mxu1 %v8257_v45 }
 0xa4a   : > { %8259 = vmatprep.subr.bf16.mxu1 %v9175_v0 }
 0xa4d   : > { %8261 = vmatpush3.bf16.msra.mxu1 %v8260_v48  ;;  %v5545_v48 = vld [vmem:[%s10230_s15] ss:$0 sm:$0xff] }
 0xa4e   : > { %8262 = vmatprep.subr.bf16.mxu1 %v9175_v0 }
 0xa51   : > { %8264 = vmatpush3.bf16.msra.mxu1 %v8263_v51 }
 0xa52   : > { %8265 = vmatprep.subr.bf16.mxu1 %v9175_v0 }
 0xa55   : > { %8267 = vmatpush3.bf16.msra.mxu1 %v8266_v54  ;;  %v3921_v54 = vld [vmem:[#allocation11 + $0x108] sm:$0xff] }
 0xa56   : > { %8268 = vmatprep.subr.bf16.mxu1 %v9175_v0  ;;  %v8317_v55 = vpack.c.bf16 %v3921_v54, %v3920_v53  ;;  %v4038_v53 = vld [vmem:[#allocation13 + $0x58] sm:$0xff] }
 0xa58   : > { %7141 = vmatmul.mubr.f32.vlgmr.msra.gmra.mrb[24].mxu1 %v10022_v57  ;;  %v8275_v57 = vpack.c.bf16 %v3767_v6, %v3766_v5  ;;  %v3928_v5 = vld [vmem:[#allocation11 + $0x140] sm:$0xff]  ;;  %v3929_v6 = vld [vmem:[#allocation11 + $0x148] sm:$0xff] }
 0xa59   : > { %7175 = vmatprep.mubr.msk.f32.mxu1 %vm9176_vm0, %v9177_v1  ;;  %8270 = vmatpush3.bf16.msra.mxu1 %v8269_v59  ;;  %v8329_v7 = vpack.c.bf16 %v3929_v6, %v3928_v5 }
 0xa5a   : > { %8271 = vmatprep.subr.bf16.mxu1 %v9175_v0 }
 0xa5d   : > { %8273 = vmatpush3.bf16.msra.mxu1 %v8272_v3  ;;  %v3927_v3 = vld [vmem:[#allocation11 + $0x138] sm:$0xff] }
 0xa5e   : > { %8274 = vmatprep.subr.bf16.mxu1 %v9175_v0  ;;  %v8326_v4 = vpack.c.bf16 %v3927_v3, %v3926_v63  ;;  %v8362_v63 = vpack.c.bf16 %v4060_v61, %v4059_v24  ;;  %v4042_v3 = vld [vmem:[#allocation13 + $0x78] sm:$0xff]  ;;  %v4326_v61 = vld [vmem:[#allocation14 + $0xb0] sm:$0xff] }
 0xa61   : > { %8276 = vmatpush3.bf16.msra.mxu1 %v8275_v57  ;;  %v3931_v57 = vld [vmem:[#allocation11 + $0x158] sm:$0xff] }
 0xa62   : > { %8277 = vmatprep.subr.bf16.mxu1 %v9175_v0  ;;  %v8332_v16 = vpack.c.bf16 %v3931_v57, %v3930_v8 }
 0xa65   : > { %8279 = vmatpush3.bf16.msra.mxu1 %v8278_v13  ;;  %v3935_v13 = vld [vmem:[#allocation11 + $0x178] sm:$0xff] }
 0xa66   : > { %8280 = vmatprep.subr.bf16.mxu1 %v9175_v0  ;;  %v8338_v14 = vpack.c.bf16 %v3935_v13, %v3934_v12 }
 0xa69   : > { %8282 = vmatpush3.bf16.msra.mxu1 %v8281_v18  ;;  %v4046_v18 = vld [vmem:[#allocation13 + $0x88] sm:$0xff] }
 0xa6a   : > { %8283 = vmatprep.subr.bf16.mxu1 %v9175_v0  ;;  %v8341_v20 = vpack.c.bf16 %v4046_v18, %v4045_v17  ;;  %v4204_v17 = vld [vmem:[#allocation13 + $0x108] sm:$0xff] }
 0xa6d   : > { %8285 = vmatpush3.bf16.msra.mxu1 %v8284_v26  ;;  %v8365_v26 = vpack.c.bf16 %v4028_v21, %v4027_v19  ;;  %v4205_v19 = vld [vmem:[#allocation13 + $0x110] sm:$0xff] }
 0xa6e   : > { %8286 = vmatprep.subr.bf16.mxu1 %v9175_v0 }
 0xa71   : > { %8288 = vmatpush3.bf16.msra.mxu1 %v8287_v32  ;;  %v4050_v32 = vld [vmem:[#allocation13 + $0xa8] sm:$0xff] }
 0xa72   : > { %8289 = vmatprep.subr.bf16.mxu1 %v9175_v0  ;;  %v8347_v35 = vpack.c.bf16 %v4050_v32, %v4049_v31  ;;  %v4211_v32 = vld [vmem:[#allocation13 + $0x140] sm:$0xff] }
 0xa73   : > { %v8401_v34 = vpack.c.bf16 %v4212_v33, %v4211_v32 }
 0xa75   : > { %8291 = vmatpush3.bf16.msra.mxu1 %v8290_v39  ;;  %v4033_v39 = vld [vmem:[#allocation13 + $0x30] sm:$0xff] }
 0xa76   : > { %8316 = vmatprep.subr.bf16.mxu1 %v9175_v0 }
 0xaeb   : > { %v3569_v42 = vpop.f32.mrb[20].mxu1 }
 0xaec   : > { %v7072_v43 = vpop.f32.mrb[21].mxu1 }
 0xaed   : > { %v4053_v43 = vld [vmem:[#allocation13 + $0xc0] sm:$0xff] }
 0xb0b   : > { %v3639_v44 = vpop.f32.mrb[22].mxu1 }
 0xb0c   : > { %v3640_v45 = vadd.f32 %v3639_v44, %v3569_v42  ;;  %v7107_v46 = vpop.f32.mrb[23].mxu1  ;;  %v8374_v42 = vpack.c.bf16 %v4034_v40, %v4033_v39  ;;  %v4054_v44 = vld [vmem:[#allocation13 + $0xc8] sm:$0xff] }
 0xb0d   : > { %v4035_v46 = vld [vmem:[#allocation13 + $0x40] sm:$0xff]  ;;  %v4216_v39 = vld [vmem:[#allocation13 + $0x168] sm:$0xff] }
 0xb0e   : > { %v8407_v40 = vpack.c.bf16 %v4216_v39, %v4215_v38  ;;  %v4478_v39 = vld [vmem:[#allocation14 + $0x100] sm:$0xff] }
 0xb2b   : > { %v3727_v47 = vpop.f32.mrb[24].mxu1 }
 0xb2c   : > { %v3731_v49 = vadd.f32 %v3727_v47, %v3640_v45  ;;  %v7142_v50 = vpop.f32.mrb[25].mxu1  ;;  %v8353_v45 = vpack.c.bf16 %v4054_v44, %v4053_v43  ;;  %v4036_v47 = vld [vmem:[#allocation13 + $0x48] sm:$0xff]  ;;  %v4320_v44 = vld [vmem:[#allocation14 + $0x80] sm:$0xff] }
 0xb2d   : > { %v4056_v50 = vld [vmem:[#allocation13 + $0xd8] sm:$0xff] }
 0xb2e   : > { %v3739_v51 = vadd.f32 %v5545_v48, %v3731_v49  ;;  %v8377_v48 = vpack.c.bf16 %v4036_v47, %v4035_v46  ;;  %v4055_v49 = vld [vmem:[#allocation13 + $0xd0] sm:$0xff]  ;;  %v4302_v46 = vld [vmem:[#allocation14] sm:$0xff] }
 0xb30   : > { %v3740_v52 = vmax.f32 %v3739_v51, 0.0  ;;  %v8356_v51 = vpack.c.bf16 %v4056_v50, %v4055_v49  ;;  %v4322_v49 = vld [vmem:[#allocation14 + $0x90] sm:$0xff]  ;;  %v4323_v50 = vld [vmem:[#allocation14 + $0x98] sm:$0xff] }
 0xb32   : > { %3741 = vst [vmem:[#allocation2 + $0x1] sm:$0xf] %v3740_v52  ;;  %v4037_v52 = vld [vmem:[#allocation13 + $0x50] sm:$0xff] }
 0xb33   : > { %v8380_v54 = vpack.c.bf16 %v4038_v53, %v4037_v52  ;;  %v4304_v52 = vld [vmem:[#allocation14 + $0x10] sm:$0xff]  ;;  %v4305_v53 = vld [vmem:[#allocation14 + $0x18] sm:$0xff] }
 0xb39   : > { %v3760_v59 = vld [vmem:[#allocation2 + $0x1] sm:$0xf] }
 0xb3a   : > { %v3743_v60 = vld [vmem:[#allocation2] sm:$0xf]  ;;  %7176 = vmatmul.mubr.f32.vlgmr.msra.gmra.mrb[26].mxu1 %v3760_v59  ;;  %v4039_v59 = vld [vmem:[#allocation13 + $0x60] sm:$0xff] }
 0xb3b   : > { %7211 = vmatmul.mubr.f32.vlgmr.msra.gmra.mrb[26].mxu0 %v3743_v60  ;;  %8318 = vmatpush3.bf16.msra.mxu1 %v8317_v55  ;;  %v3918_v15 = vld [vmem:[#allocation2 + $0x2] sm:$0xf]  ;;  %v4057_v55 = vld [vmem:[#allocation13 + $0xe0] sm:$0xff] }
 0xb3c   : > { %7245 = vmatprep.mubr.msk.f32.mxu1 %vm9176_vm0, %v9177_v1  ;;  %8319 = vmatprep.subr.bf16.mxu1 %v9175_v0  ;;  %v8359_v58 = vpack.c.bf16 %v4058_v56, %v4057_v55  ;;  %v4040_v60 = vld [vmem:[#allocation13 + $0x68] sm:$0xff]  ;;  %v8440_v55 = vpack.c.bf16 %v4305_v53, %v4304_v52  ;;  %v4324_v56 = vld [vmem:[#allocation14 + $0xa0] sm:$0xff] }
 0xb3d   : > { %7280 = vmatprep.mubr.msk.f32.mxu0 %vm9176_vm0, %v9177_v1  ;;  %8342 = vmatpush3.bf16.msra.mxu0 %v8341_v20  ;;  %v4206_v20 = vld [vmem:[#allocation13 + $0x118] sm:$0xff] }
 0xb3e   : > { %8343 = vmatprep.subr.bf16.mxu0 %v9175_v0 }
 0xb3f   : > { %8321 = vmatpush3.bf16.msra.mxu1 %v8320_v23  ;;  %v8383_v23 = vpack.c.bf16 %v4040_v60, %v4039_v59  ;;  %v4306_v59 = vld [vmem:[#allocation14 + $0x20] sm:$0xff]  ;;  %v4307_v60 = vld [vmem:[#allocation14 + $0x28] sm:$0xff] }
 0xb40   : > { %8322 = vmatprep.subr.bf16.mxu1 %v9175_v0  ;;  %v8443_v24 = vpack.c.bf16 %v4307_v60, %v4306_v59  ;;  %v4488_v59 = vld [vmem:[#allocation14 + $0x150] sm:$0xff]  ;;  %v4489_v60 = vld [vmem:[#allocation14 + $0x158] sm:$0xff] }
 0xb41   : > { %8345 = vmatpush3.bf16.msra.mxu0 %v8344_v29  ;;  %v4209_v29 = vld [vmem:[#allocation13 + $0x130] sm:$0xff] }
 0xb42   : > { %8346 = vmatprep.subr.bf16.mxu0 %v9175_v0 }
 0xb43   : > { %8324 = vmatpush3.bf16.msra.mxu1 %v8323_v62  ;;  %v4041_v62 = vld [vmem:[#allocation13 + $0x70] sm:$0xff] }
 0xb44   : > { %8325 = vmatprep.subr.bf16.mxu1 %v9175_v0 }
 0xb45   : > { %8348 = vmatpush3.bf16.msra.mxu0 %v8347_v35  ;;  %v4213_v35 = vld [vmem:[#allocation13 + $0x150] sm:$0xff] }
 0xb46   : > { %8349 = vmatprep.subr.bf16.mxu0 %v9175_v0 }
 0xb47   : > { %8327 = vmatpush3.bf16.msra.mxu1 %v8326_v4  ;;  %v8386_v4 = vpack.c.bf16 %v4042_v3, %v4041_v62  ;;  %v4327_v62 = vld [vmem:[#allocation14 + $0xb8] sm:$0xff] }
 0xb48   : > { %8328 = vmatprep.subr.bf16.mxu1 %v9175_v0  ;;  %v4309_v3 = vld [vmem:[#allocation14 + $0x38] sm:$0xff] }
 0xb49   : > { %8351 = vmatpush3.bf16.msra.mxu0 %v8350_v41  ;;  %v4217_v41 = vld [vmem:[#allocation13 + $0x170] sm:$0xff] }
 0xb4a   : > { %8352 = vmatprep.subr.bf16.mxu0 %v9175_v0 }
 0xb4b   : > { %8330 = vmatpush3.bf16.msra.mxu1 %v8329_v7 }
 0xb4c   : > { %8331 = vmatprep.subr.bf16.mxu1 %v9175_v0 }
 0xb4d   : > { %8354 = vmatpush3.bf16.msra.mxu0 %v8353_v45  ;;  %v4321_v45 = vld [vmem:[#allocation14 + $0x88] sm:$0xff] }
 0xb4e   : > { %8355 = vmatprep.subr.bf16.mxu0 %v9175_v0  ;;  %v8413_v47 = vpack.c.bf16 %v4321_v45, %v4320_v44  ;;  %v4480_v44 = vld [vmem:[#allocation14 + $0x110] sm:$0xff]  ;;  %v4481_v45 = vld [vmem:[#allocation14 + $0x118] sm:$0xff] }
 0xb4f   : > { %8333 = vmatpush3.bf16.msra.mxu1 %v8332_v16 }
 0xb50   : > { %8334 = vmatprep.subr.bf16.mxu1 %v9175_v0 }
 0xb51   : > { %8357 = vmatpush3.bf16.msra.mxu0 %v8356_v51 }
 0xb52   : > { %8358 = vmatprep.subr.bf16.mxu0 %v9175_v0 }
 0xb53   : > { %8336 = vmatpush3.bf16.msra.mxu1 %v8335_v11 }
 0xb54   : > { %8337 = vmatprep.subr.bf16.mxu1 %v9175_v0 }
 0xb55   : > { %8360 = vmatpush3.bf16.msra.mxu0 %v8359_v58  ;;  %v4325_v58 = vld [vmem:[#allocation14 + $0xa8] sm:$0xff] }
 0xb56   : > { %8361 = vmatprep.subr.bf16.mxu0 %v9175_v0 }
 0xb57   : > { %8339 = vmatpush3.bf16.msra.mxu1 %v8338_v14 }
 0xb58   : > { %8364 = vmatprep.subr.bf16.mxu1 %v9175_v0 }
 0xb59   : > { %8363 = vmatpush3.bf16.msra.mxu0 %v8362_v63  ;;  %v4308_v63 = vld [vmem:[#allocation14 + $0x30] sm:$0xff] }
 0xb5a   : > { %7246 = vmatmul.mubr.f32.vlgmr.msra.gmra.mrb[28].mxu1 %v3918_v15  ;;  %8388 = vmatprep.subr.bf16.mxu0 %v9175_v0  ;;  %v4203_v15 = vld [vmem:[#allocation13 + $0x100] sm:$0xff] }
 0xb5b   : > { %7315 = vmatprep.mubr.msk.f32.mxu1 %vm9176_vm0, %v9177_v1  ;;  %8366 = vmatpush3.bf16.msra.mxu1 %v8365_v26  ;;  %v8389_v18 = vpack.c.bf16 %v4204_v17, %v4203_v15  ;;  %v4207_v26 = vld [vmem:[#allocation13 + $0x120] sm:$0xff]  ;;  %v4334_v17 = vld [vmem:[#allocation14 + $0xf0] sm:$0xff] }
 0xb5c   : > { %8367 = vmatprep.subr.bf16.mxu1 %v9175_v0  ;;  %v8395_v28 = vpack.c.bf16 %v4208_v27, %v4207_v26  ;;  %v4316_v27 = vld [vmem:[#allocation14 + $0x70] sm:$0xff] }
 0xb5f   : > { %8369 = vmatpush3.bf16.msra.mxu1 %v8368_v30  ;;  %v4210_v30 = vld [vmem:[#allocation13 + $0x138] sm:$0xff] }
 0xb60   : > { %8370 = vmatprep.subr.bf16.mxu1 %v9175_v0  ;;  %v8398_v31 = vpack.c.bf16 %v4210_v30, %v4209_v29 }
 0xb63   : > { %8372 = vmatpush3.bf16.msra.mxu1 %v8371_v36  ;;  %v4214_v36 = vld [vmem:[#allocation13 + $0x158] sm:$0xff] }
 0xb64   : > { %8373 = vmatprep.subr.bf16.mxu1 %v9175_v0  ;;  %v8404_v37 = vpack.c.bf16 %v4214_v36, %v4213_v35  ;;  %v5547_v36 = vld [vmem:[%s10232_s8] ss:$0 sm:$0xff] }
 0xb67   : > { %8375 = vmatpush3.bf16.msra.mxu1 %v8374_v42  ;;  %v4218_v42 = vld [vmem:[#allocation13 + $0x178] sm:$0xff] }
 0xb68   : > { %8376 = vmatprep.subr.bf16.mxu1 %v9175_v0  ;;  %v8410_v43 = vpack.c.bf16 %v4218_v42, %v4217_v41 }
 0xb6b   : > { %8378 = vmatpush3.bf16.msra.mxu1 %v8377_v48  ;;  %v4303_v48 = vld [vmem:[#allocation14 + $0x8] sm:$0xff] }
 0xb6c   : > { %8379 = vmatprep.subr.bf16.mxu1 %v9175_v0  ;;  %v8437_v51 = vpack.c.bf16 %v4303_v48, %v4302_v46  ;;  %v8464_v46 = vpack.c.bf16 %v4481_v45, %v4480_v44  ;;  %v4483_v48 = vld [vmem:[#allocation14 + $0x128] sm:$0xff]  ;;  %v4587_v44 = vld [vmem:[#allocation16 + $0x50] sm:$0xff]  ;;  %v4588_v45 = vld [vmem:[#allocation16 + $0x58] sm:$0xff] }
 0xb6f   : > { %8381 = vmatpush3.bf16.msra.mxu1 %v8380_v54  ;;  %v8416_v54 = vpack.c.bf16 %v4323_v50, %v4322_v49  ;;  %v4484_v50 = vld [vmem:[#allocation14 + $0x130] sm:$0xff] }
 0xb70   : > { %8382 = vmatprep.subr.bf16.mxu1 %v9175_v0 }
 0xb73   : > { %8384 = vmatpush3.bf16.msra.mxu1 %v8383_v23  ;;  %v8419_v23 = vpack.c.bf16 %v4325_v58, %v4324_v56  ;;  %v4487_v56 = vld [vmem:[#allocation14 + $0x148] sm:$0xff] }
 0xb74   : > { %8385 = vmatprep.subr.bf16.mxu1 %v9175_v0 }
 0xb77   : > { %8387 = vmatpush3.bf16.msra.mxu1 %v8386_v4  ;;  %v8422_v4 = vpack.c.bf16 %v4327_v62, %v4326_v61  ;;  %v4491_v61 = vld [vmem:[#allocation14 + $0x168] sm:$0xff] }
 0xb78   : > { %8412 = vmatprep.subr.bf16.mxu1 %v9175_v0 }
 0xc0d   : > { %v3844_v5 = vpop.f32.mrb[26].mxu1 }
 0xc0e   : > { %v3914_v6 = vpop.f32.mrb[26].mxu0  ;;  %v7177_v8 = vpop.f32.mrb[27].mxu1 }
 0xc0f   : > { %v3915_v7 = vadd.f32 %v3914_v6, %v3844_v5  ;;  %v7212_v57 = vpop.f32.mrb[27].mxu0  ;;  %v8446_v5 = vpack.c.bf16 %v4309_v3, %v4308_v63  ;;  %v4328_v6 = vld [vmem:[#allocation14 + $0xc0] sm:$0xff]  ;;  %v4492_v63 = vld [vmem:[#allocation14 + $0x170] sm:$0xff]  ;;  %v4493_v3 = vld [vmem:[#allocation14 + $0x178] sm:$0xff] }
 0xc10   : > { %v4330_v57 = vld [vmem:[#allocation14 + $0xd0] sm:$0xff] }
 0xc2d   : > { %v4002_v16 = vpop.f32.mrb[28].mxu1 }
 0xc2e   : > { %v4006_v10 = vadd.f32 %v4002_v16, %v3915_v7  ;;  %v7247_v11 = vpop.f32.mrb[29].mxu1  ;;  %v4329_v7 = vld [vmem:[#allocation14 + $0xc8] sm:$0xff]  ;;  %v4331_v16 = vld [vmem:[#allocation14 + $0xd8] sm:$0xff] }
 0xc2f   : > { %v8425_v8 = vpack.c.bf16 %v4329_v7, %v4328_v6  ;;  %v4333_v11 = vld [vmem:[#allocation14 + $0xe8] sm:$0xff] }
 0xc30   : > { %v4014_v12 = vadd.f32 %v5546_v9, %v4006_v10  ;;  %v8428_v9 = vpack.c.bf16 %v4331_v16, %v4330_v57  ;;  %v4332_v10 = vld [vmem:[#allocation14 + $0xe0] sm:$0xff]  ;;  %v4596_v6 = vld [vmem:[#allocation16 + $0x88] sm:$0xff]  ;;  %v4598_v57 = vld [vmem:[#allocation16 + $0x98] sm:$0xff] }
 0xc31   : > { %v4577_v16 = vld [vmem:[#allocation16] sm:$0xff] }
 0xc32   : > { %v4015_v13 = vadd.f32 %v4014_v12, %v10019_v2  ;;  %v8392_v2 = vpack.c.bf16 %v4206_v20, %v4205_v19  ;;  %v4310_v12 = vld [vmem:[#allocation14 + $0x40] sm:$0xff]  ;;  %v4312_v19 = vld [vmem:[#allocation14 + $0x50] sm:$0xff]  ;;  %v4313_v20 = vld [vmem:[#allocation14 + $0x58] sm:$0xff] }
 0xc34   : > { %v4016_v14 = vmax.f32 %v4015_v13, 0.0  ;;  %v4311_v13 = vld [vmem:[#allocation14 + $0x48] sm:$0xff] }
 0xc35   : > { %v8449_v15 = vpack.c.bf16 %v4311_v13, %v4310_v12  ;;  %v4580_v13 = vld [vmem:[#allocation16 + $0x18] sm:$0xff] }
 0xc36   : > { %4017 = vst [vmem:[#allocation2 + $0x1] sm:$0x1] %v4016_v14  ;;  %4018 = vst [vmem:[#allocation2 + $0x2] sm:$0x3] %v4016_v14  }
 0xc37   : > { %4020 = vst [vmem:[#allocation2 + $0x3] sm:$0x6] %v4016_v14   ;;  %4022 = vst [vmem:[#allocation2 + $0x4] sm:$0xc] %v4016_v14  }
 0xc38   : > { %4024 = vst [vmem:[#allocation2 + $0x5] sm:$0x8] %v4016_v14  ;;  %v8431_v14 = vpack.c.bf16 %v4333_v11, %v4332_v10  ;;  %v4579_v11 = vld [vmem:[#allocation16 + $0x10] sm:$0xff] }
 0xc3e   : > { %v4026_v22 = vld [vmem:[#allocation2] sm:$0xff] }
 0xc3f   : > { %v4043_v21 = vld [vmem:[#allocation2 + $0x1] sm:$0xff]  ;;  %7316 = vmatmul.mubr.f32.vlgmr.msra.gmra.mrb[30].mxu1 %v4026_v22  ;;  %v8452_v22 = vpack.c.bf16 %v4313_v20, %v4312_v19  ;;  %v4602_v20 = vld [vmem:[#allocation16 + $0xb8] sm:$0xff] }
 0xc40   : > { %v4201_v25 = vld [vmem:[#allocation2 + $0x2] sm:$0xff]  ;;  %7281 = vmatmul.mubr.f32.vlgmr.msra.gmra.mrb[28].mxu0 %v4043_v21  ;;  %7385 = vmatprep.mubr.msk.f32.mxu1 %vm9176_vm0, %v9177_v1 }
 0xc41   : > { %4300 = vst [vmem:[#allocation2 + $0x9] sm:$0x1] %v9177_v1  ;;  %8390 = vmatpush3.bf16.msra.mxu0 %v8389_v18  ;;  %7350 = vmatprep.mubr.msk.f32.mxu0 %vm9176_vm0, %v9177_v1  ;;  %v4335_v18 = vld [vmem:[#allocation14 + $0xf8] sm:$0xff]  ;;  %v4601_v19 = vld [vmem:[#allocation16 + $0xb0] sm:$0xff] }
 0xc42   : > { %8391 = vmatprep.subr.bf16.mxu0 %v9175_v0  ;;  %8414 = vmatpush3.bf16.msra.mxu1 %v8413_v47  ;;  %v8434_v21 = vpack.c.bf16 %v4335_v18, %v4334_v17  ;;  %v4482_v47 = vld [vmem:[#allocation14 + $0x120] sm:$0xff]  ;;  %v8512_v18 = vpack.c.bf16 %v4580_v13, %v4579_v11  ;;  %v4760_v11 = vld [vmem:[#allocation16 + $0x138] sm:$0xff] }
 0xc43   : > { %8415 = vmatprep.subr.bf16.mxu1 %v9175_v0  ;;  %v8467_v49 = vpack.c.bf16 %v4483_v48, %v4482_v47  ;;  %v8524_v47 = vpack.c.bf16 %v4588_v45, %v4587_v44  ;;  %v4589_v48 = vld [vmem:[#allocation16 + $0x60] sm:$0xff]  ;;  %v4899_v44 = vld [vmem:[#allocation17 + $0xd8] sm:$0xff] }
 0xc45   : > { %8393 = vmatpush3.bf16.msra.mxu0 %v8392_v2  ;;  %v4315_v2 = vld [vmem:[#allocation14 + $0x68] sm:$0xff] }
 0xc46   : > { %8394 = vmatprep.subr.bf16.mxu0 %v9175_v0  ;;  %8417 = vmatpush3.bf16.msra.mxu1 %v8416_v54 }
 0xc47   : > { %8418 = vmatprep.subr.bf16.mxu1 %v9175_v0 }
 0xc49   : > { %8396 = vmatpush3.bf16.msra.mxu0 %v8395_v28  ;;  %v4317_v28 = vld [vmem:[#allocation14 + $0x78] sm:$0xff] }
 0xc4a   : > { %8397 = vmatprep.subr.bf16.mxu0 %v9175_v0  ;;  %8420 = vmatpush3.bf16.msra.mxu1 %v8419_v23  ;;  %v8458_v29 = vpack.c.bf16 %v4317_v28, %v4316_v27  ;;  %v8476_v23 = vpack.c.bf16 %v4489_v60, %v4488_v59  ;;  %v4604_v27 = vld [vmem:[#allocation16 + $0xc8] sm:$0xff]  ;;  %v4583_v28 = vld [vmem:[#allocation16 + $0x30] sm:$0xff] }
 0xc4b   : > { %8421 = vmatprep.subr.bf16.mxu1 %v9175_v0 }
 0xc4d   : > { %8399 = vmatpush3.bf16.msra.mxu0 %v8398_v31 }
 0xc4e   : > { %8400 = vmatprep.subr.bf16.mxu0 %v9175_v0  ;;  %8423 = vmatpush3.bf16.msra.mxu1 %v8422_v4  ;;  %v8482_v4 = vpack.c.bf16 %v4493_v3, %v4492_v63  ;;  %v4754_v63 = vld [vmem:[#allocation16 + $0x108] sm:$0xff] }
 0xc4f   : > { %8424 = vmatprep.subr.bf16.mxu1 %v9175_v0 }
 0xc51   : > { %8402 = vmatpush3.bf16.msra.mxu0 %v8401_v34 }
 0xc52   : > { %8403 = vmatprep.subr.bf16.mxu0 %v9175_v0  ;;  %8426 = vmatpush3.bf16.msra.mxu1 %v8425_v8  ;;  %v4597_v8 = vld [vmem:[#allocation16 + $0x90] sm:$0xff] }
 0xc53   : > { %8427 = vmatprep.subr.bf16.mxu1 %v9175_v0  ;;  %v8488_v10 = vpack.c.bf16 %v4598_v57, %v4597_v8  ;;  %v4757_v57 = vld [vmem:[#allocation16 + $0x120] sm:$0xff] }
 0xc55   : > { %8405 = vmatpush3.bf16.msra.mxu0 %v8404_v37 }
 0xc56   : > { %8406 = vmatprep.subr.bf16.mxu0 %v9175_v0  ;;  %8429 = vmatpush3.bf16.msra.mxu1 %v8428_v9  ;;  %v4578_v9 = vld [vmem:[#allocation16 + $0x8] sm:$0xff] }
 0xc57   : > { %8430 = vmatprep.subr.bf16.mxu1 %v9175_v0  ;;  %v8509_v12 = vpack.c.bf16 %v4578_v9, %v4577_v16  ;;  %v4758_v16 = vld [vmem:[#allocation16 + $0x128] sm:$0xff] }
 0xc58   : > { %v8539_v9 = vpack.c.bf16 %v4758_v16, %v4757_v57  ;;  %v4873_v16 = vld [vmem:[#allocation17 + $0x20] sm:$0xff] }
 0xc59   : > { %8408 = vmatpush3.bf16.msra.mxu0 %v8407_v40  ;;  %v4479_v40 = vld [vmem:[#allocation14 + $0x108] sm:$0xff] }
 0xc5a   : > { %8409 = vmatprep.subr.bf16.mxu0 %v9175_v0  ;;  %8432 = vmatpush3.bf16.msra.mxu1 %v8431_v14  ;;  %v8461_v42 = vpack.c.bf16 %v4479_v40, %v4478_v39  ;;  %v4599_v14 = vld [vmem:[#allocation16 + $0xa0] sm:$0xff] }
 0xc5b   : > { %8433 = vmatprep.subr.bf16.mxu1 %v9175_v0 }
 0xc5d   : > { %8411 = vmatpush3.bf16.msra.mxu0 %v8410_v43 }
 0xc5e   : > { %8436 = vmatprep.subr.bf16.mxu0 %v9175_v0  ;;  %8435 = vmatpush3.bf16.msra.mxu1 %v8434_v21  ;;  %v4581_v21 = vld [vmem:[#allocation16 + $0x20] sm:$0xff] }
 0xc5f   : > { %8460 = vmatprep.subr.bf16.mxu1 %v9175_v0 }
 0xc60   : > { %7351 = vmatmul.mubr.f32.vlgmr.msra.gmra.mrb[30].mxu0 %v4201_v25  ;;  %v4314_v25 = vld [vmem:[#allocation14 + $0x60] sm:$0xff] }
 0xc61   : > { %7420 = vmatprep.mubr.msk.f32.mxu0 %vm9176_vm0, %v9177_v1  ;;  %8438 = vmatpush3.bf16.msra.mxu0 %v8437_v51  ;;  %v8455_v26 = vpack.c.bf16 %v4315_v2, %v4314_v25  ;;  %v4485_v51 = vld [vmem:[#allocation14 + $0x138] sm:$0xff]  ;;  %v8494_v25 = vpack.c.bf16 %v4602_v20, %v4601_v19  ;;  %v4765_v20 = vld [vmem:[#allocation16 + $0x160] sm:$0xff] }
 0xc62   : > { %8439 = vmatprep.subr.bf16.mxu0 %v9175_v0  ;;  %v8470_v54 = vpack.c.bf16 %v4485_v51, %v4484_v50  ;;  %v4591_v51 = vld [vmem:[#allocation16 + $0x70] sm:$0xff] }
 0xc65   : > { %8441 = vmatpush3.bf16.msra.mxu0 %v8440_v55  ;;  %v4486_v55 = vld [vmem:[#allocation14 + $0x140] sm:$0xff] }
 0xc66   : > { %8442 = vmatprep.subr.bf16.mxu0 %v9175_v0  ;;  %v8473_v58 = vpack.c.bf16 %v4487_v56, %v4486_v55 }
 0xc69   : > { %8444 = vmatpush3.bf16.msra.mxu0 %v8443_v24  ;;  %v4490_v24 = vld [vmem:[#allocation14 + $0x160] sm:$0xff] }
 0xc6a   : > { %8445 = vmatprep.subr.bf16.mxu0 %v9175_v0  ;;  %v8479_v62 = vpack.c.bf16 %v4491_v61, %v4490_v24 }
 0xc6d   : > { %8447 = vmatpush3.bf16.msra.mxu0 %v8446_v5  ;;  %v4595_v5 = vld [vmem:[#allocation16 + $0x80] sm:$0xff] }
 0xc6e   : > { %8448 = vmatprep.subr.bf16.mxu0 %v9175_v0  ;;  %v8485_v7 = vpack.c.bf16 %v4596_v6, %v4595_v5  ;;  %v4755_v6 = vld [vmem:[#allocation16 + $0x110] sm:$0xff] }
 0xc71   : > { %8450 = vmatpush3.bf16.msra.mxu0 %v8449_v15  ;;  %v4600_v15 = vld [vmem:[#allocation16 + $0xa8] sm:$0xff] }
 0xc72   : > { %8451 = vmatprep.subr.bf16.mxu0 %v9175_v0  ;;  %v8491_v17 = vpack.c.bf16 %v4600_v15, %v4599_v14  ;;  %v4761_v14 = vld [vmem:[#allocation16 + $0x140] sm:$0xff]  ;;  %v4762_v15 = vld [vmem:[#allocation16 + $0x148] sm:$0xff] }
 0xc75   : > { %8453 = vmatpush3.bf16.msra.mxu0 %v8452_v22  ;;  %v4582_v22 = vld [vmem:[#allocation16 + $0x28] sm:$0xff] }
 0xc76   : > { %8454 = vmatprep.subr.bf16.mxu0 %v9175_v0  ;;  %v8515_v2 = vpack.c.bf16 %v4582_v22, %v4581_v21  ;;  %v4766_v21 = vld [vmem:[#allocation16 + $0x168] sm:$0xff] }
 0xc77   : > { %v8551_v22 = vpack.c.bf16 %v4766_v21, %v4765_v20  ;;  %v4881_v20 = vld [vmem:[#allocation17 + $0x60] sm:$0xff]  ;;  %v4882_v21 = vld [vmem:[#allocation17 + $0x68] sm:$0xff] }
 0xc79   : > { %8456 = vmatpush3.bf16.msra.mxu0 %v8455_v26  ;;  %v4603_v26 = vld [vmem:[#allocation16 + $0xc0] sm:$0xff] }
 0xc7a   : > { %8457 = vmatprep.subr.bf16.mxu0 %v9175_v0 }
 0xc7d   : > { %8459 = vmatpush3.bf16.msra.mxu0 %v8458_v29  ;;  %v4584_v29 = vld [vmem:[#allocation16 + $0x38] sm:$0xff] }
 0xc7e   : > { %8484 = vmatprep.subr.bf16.mxu0 %v9175_v0 }
 0xd12   : > { %v4197_v31 = vpop.f32.mrb[30].mxu1 }
 0xd13   : > { %v4127_v30 = vpop.f32.mrb[28].mxu0  ;;  %v7317_v34 = vpop.f32.mrb[31].mxu1 }
 0xd14   : > { %v4198_v32 = vadd.f32 %v4197_v31, %v4127_v30  ;;  %v7282_v33 = vpop.f32.mrb[29].mxu0  ;;  %v8497_v30 = vpack.c.bf16 %v4604_v27, %v4603_v26  ;;  %v8518_v31 = vpack.c.bf16 %v4584_v29, %v4583_v28  ;;  %v4888_v28 = vld [vmem:[#allocation17 + $0x80] sm:$0xff]  ;;  %v4889_v29 = vld [vmem:[#allocation17 + $0x88] sm:$0xff] }
 0xd15   : > { %v4606_v33 = vld [vmem:[#allocation16 + $0xd8] sm:$0xff] }
 0xd33   : > { %v4285_v35 = vpop.f32.mrb[30].mxu0 }
 0xd34   : > { %v4289_v37 = vadd.f32 %v4285_v35, %v4198_v32  ;;  %v7352_v38 = vpop.f32.mrb[31].mxu0  ;;  %v4605_v32 = vld [vmem:[#allocation16 + $0xd0] sm:$0xff]  ;;  %v4607_v35 = vld [vmem:[#allocation16 + $0xe0] sm:$0xff] }
 0xd35   : > { %v8500_v34 = vpack.c.bf16 %v4606_v33, %v4605_v32  ;;  %v4586_v38 = vld [vmem:[#allocation16 + $0x48] sm:$0xff]  ;;  %v4891_v32 = vld [vmem:[#allocation17 + $0x98] sm:$0xff] }
 0xd36   : > { %v4297_v41 = vadd.f32 %v5547_v36, %v4289_v37  ;;  %v4608_v36 = vld [vmem:[#allocation16 + $0xe8] sm:$0xff]  ;;  %v4585_v37 = vld [vmem:[#allocation16 + $0x40] sm:$0xff] }
 0xd37   : > { %v8503_v39 = vpack.c.bf16 %v4608_v36, %v4607_v35  ;;  %v8521_v40 = vpack.c.bf16 %v4586_v38, %v4585_v37  ;;  %v4893_v35 = vld [vmem:[#allocation17 + $0xa8] sm:$0xff]  ;;  %v4894_v37 = vld [vmem:[#allocation17 + $0xb0] sm:$0xff]  ;;  %v4895_v38 = vld [vmem:[#allocation17 + $0xb8] sm:$0xff] }
 0xd38   : > { %v10129_v43 = vmax.f32 %v4297_v41, 0.0  ;;  %v4609_v41 = vld [vmem:[#allocation16 + $0xf0] sm:$0xff] }
 0xd3a   : > { %4299 = vst [vmem:[#allocation2 + $0x1] sm:$0xff] %v10129_v43  ;;  %7386 = vmatmul.mubr.f32.vlgmr.msra.gmra.mrb[32].mxu1 %v10129_v43 }
 0xd3b   : > { %8462 = vmatpush3.bf16.msra.mxu1 %v8461_v42  ;;  %7455 = vmatprep.mubr.msk.f32.mxu1 %vm9176_vm0, %v9177_v1  ;;  %v4610_v42 = vld [vmem:[#allocation16 + $0xf8] sm:$0xff] }
 0xd3c   : > { %8463 = vmatprep.subr.bf16.mxu1 %v9175_v0 }
 0xd3f   : > { %8465 = vmatpush3.bf16.msra.mxu1 %v8464_v46  ;;  %v8506_v46 = vpack.c.bf16 %v4610_v42, %v4609_v41  ;;  %v4898_v42 = vld [vmem:[#allocation17 + $0xd0] sm:$0xff] }
 0xd40   : > { %8466 = vmatprep.subr.bf16.mxu1 %v9175_v0  ;;  %v8576_v45 = vpack.c.bf16 %v4899_v44, %v4898_v42  ;;  %v5067_v44 = vld [vmem:[#allocation17 + $0x150] sm:$0xff] }
 0xd41   : > { %v4301_v52 = vld [vmem:[#allocation2] sm:$0xff] }
 0xd42   : > { %v4476_v53 = vld [vmem:[#allocation2 + $0x2] sm:$0xff]  ;;  %7421 = vmatmul.mubr.f32.vlgmr.msra.gmra.mrb[32].mxu0 %v4301_v52  ;;  %v4592_v52 = vld [vmem:[#allocation16 + $0x78] sm:$0xff] }
 0xd43   : > { %4575 = vst [vmem:[#allocation2 + $0x9] sm:$0x1] %v9177_v1  ;;  %8468 = vmatpush3.bf16.msra.mxu1 %v8467_v49  ;;  %7490 = vmatprep.mubr.msk.f32.mxu0 %vm9176_vm0, %v9177_v1  ;;  %v4590_v49 = vld [vmem:[#allocation16 + $0x68] sm:$0xff] }
 0xd44   : > { %8469 = vmatprep.subr.bf16.mxu1 %v9175_v0  ;;  %8486 = vmatpush3.bf16.msra.mxu0 %v8485_v7  ;;  %v8527_v50 = vpack.c.bf16 %v4590_v49, %v4589_v48  ;;  %v4756_v7 = vld [vmem:[#allocation16 + $0x118] sm:$0xff]  ;;  %v4902_v49 = vld [vmem:[#allocation17 + $0xf0] sm:$0xff] }
 0xd45   : > { %8487 = vmatprep.subr.bf16.mxu0 %v9175_v0  ;;  %v8536_v8 = vpack.c.bf16 %v4756_v7, %v4755_v6  ;;  %v4872_v6 = vld [vmem:[#allocation17 + $0x18] sm:$0xff] }
 0xd47   : > { %8471 = vmatpush3.bf16.msra.mxu1 %v8470_v54 }
 0xd48   : > { %8472 = vmatprep.subr.bf16.mxu1 %v9175_v0  ;;  %8489 = vmatpush3.bf16.msra.mxu0 %v8488_v10  ;;  %v4759_v10 = vld [vmem:[#allocation16 + $0x130] sm:$0xff] }
 0xd49   : > { %8490 = vmatprep.subr.bf16.mxu0 %v9175_v0  ;;  %v8542_v13 = vpack.c.bf16 %v4760_v11, %v4759_v10  ;;  %v4875_v11 = vld [vmem:[#allocation17 + $0x30] sm:$0xff] }
 0xd4b   : > { %8474 = vmatpush3.bf16.msra.mxu1 %v8473_v58 }
 0xd4c   : > { %8475 = vmatprep.subr.bf16.mxu1 %v9175_v0  ;;  %8492 = vmatpush3.bf16.msra.mxu0 %v8491_v17  ;;  %v4763_v17 = vld [vmem:[#allocation16 + $0x150] sm:$0xff] }
 0xd4d   : > { %8493 = vmatprep.subr.bf16.mxu0 %v9175_v0 }
 0xd4f   : > { %8477 = vmatpush3.bf16.msra.mxu1 %v8476_v23  ;;  %v5548_v23 = vld [vmem:[%s10233_s2] ss:$0 sm:$0xff] }
 0xd50   : > { %8478 = vmatprep.subr.bf16.mxu1 %v9175_v0  ;;  %8495 = vmatpush3.bf16.msra.mxu0 %v8494_v25  ;;  %v4767_v25 = vld [vmem:[#allocation16 + $0x170] sm:$0xff] }
 0xd51   : > { %8496 = vmatprep.subr.bf16.mxu0 %v9175_v0 }
 0xd53   : > { %8480 = vmatpush3.bf16.msra.mxu1 %v8479_v62  ;;  %v4753_v62 = vld [vmem:[#allocation16 + $0x100] sm:$0xff] }
 0xd54   : > { %8481 = vmatprep.subr.bf16.mxu1 %v9175_v0  ;;  %8498 = vmatpush3.bf16.msra.mxu0 %v8497_v30  ;;  %v4890_v30 = vld [vmem:[#allocation17 + $0x90] sm:$0xff] }
 0xd55   : > { %8499 = vmatprep.subr.bf16.mxu0 %v9175_v0  ;;  %v8560_v33 = vpack.c.bf16 %v4891_v32, %v4890_v30  ;;  %v5059_v30 = vld [vmem:[#allocation17 + $0x110] sm:$0xff] }
 0xd57   : > { %8483 = vmatpush3.bf16.msra.mxu1 %v8482_v4  ;;  %v8533_v4 = vpack.c.bf16 %v4754_v63, %v4753_v62 }
 0xd58   : > { %8508 = vmatprep.subr.bf16.mxu1 %v9175_v0  ;;  %8501 = vmatpush3.bf16.msra.mxu0 %v8500_v34  ;;  %v4892_v34 = vld [vmem:[#allocation17 + $0xa0] sm:$0xff] }
 0xd59   : > { %8502 = vmatprep.subr.bf16.mxu0 %v9175_v0  ;;  %v8564_v36 = vpack.c.bf16 %v4893_v35, %v4892_v34  ;;  %v5061_v34 = vld [vmem:[#allocation17 + $0x120] sm:$0xff]  ;;  %v5062_v35 = vld [vmem:[#allocation17 + $0x128] sm:$0xff] }
 0xd5a   : > { %7456 = vmatmul.mubr.f32.vlgmr.msra.gmra.mrb[34].mxu1 %v4476_v53  ;;  %v8530_v53 = vpack.c.bf16 %v4592_v52, %v4591_v51  ;;  %v4869_v52 = vld [vmem:[#allocation17] sm:$0xff] }
 0xd5b   : > { %7525 = vmatprep.mubr.msk.f32.mxu1 %vm9176_vm0, %v9177_v1  ;;  %8510 = vmatpush3.bf16.msra.mxu1 %v8509_v12 }
 0xd5c   : > { %8511 = vmatprep.subr.bf16.mxu1 %v9175_v0  ;;  %8504 = vmatpush3.bf16.msra.mxu0 %v8503_v39  ;;  %v4896_v39 = vld [vmem:[#allocation17 + $0xc0] sm:$0xff] }
 0xd5d   : > { %8505 = vmatprep.subr.bf16.mxu0 %v9175_v0 }
 0xd5f   : > { %8513 = vmatpush3.bf16.msra.mxu1 %v8512_v18  ;;  %v4764_v18 = vld [vmem:[#allocation16 + $0x158] sm:$0xff] }
 0xd60   : > { %8514 = vmatprep.subr.bf16.mxu1 %v9175_v0  ;;  %8507 = vmatpush3.bf16.msra.mxu0 %v8506_v46  ;;  %v8548_v19 = vpack.c.bf16 %v4764_v18, %v4763_v17  ;;  %v4900_v46 = vld [vmem:[#allocation17 + $0xe0] sm:$0xff]  ;;  %v4879_v17 = vld [vmem:[#allocation17 + $0x50] sm:$0xff]  ;;  %v4880_v18 = vld [vmem:[#allocation17 + $0x58] sm:$0xff] }
 0xd61   : > { %8532 = vmatprep.subr.bf16.mxu0 %v9175_v0 }
 0xd63   : > { %8516 = vmatpush3.bf16.msra.mxu1 %v8515_v2  ;;  %v4768_v2 = vld [vmem:[#allocation16 + $0x178] sm:$0xff] }
 0xd64   : > { %8517 = vmatprep.subr.bf16.mxu1 %v9175_v0  ;;  %v8554_v26 = vpack.c.bf16 %v4768_v2, %v4767_v25  ;;  %v4883_v25 = vld [vmem:[#allocation17 + $0x70] sm:$0xff]  ;;  %v4884_v2 = vld [vmem:[#allocation17 + $0x78] sm:$0xff] }
 0xd67   : > { %8519 = vmatpush3.bf16.msra.mxu1 %v8518_v31  ;;  %v8556_v31 = vpack.c.bf16 %v4889_v29, %v4888_v28  ;;  %v5058_v28 = vld [vmem:[#allocation17 + $0x108] sm:$0xff] }
 0xd68   : > { %8520 = vmatprep.subr.bf16.mxu1 %v9175_v0 }
 0xd6b   : > { %8522 = vmatpush3.bf16.msra.mxu1 %v8521_v40  ;;  %v4897_v40 = vld [vmem:[#allocation17 + $0xc8] sm:$0xff] }
 0xd6c   : > { %8523 = vmatprep.subr.bf16.mxu1 %v9175_v0  ;;  %v8572_v41 = vpack.c.bf16 %v4897_v40, %v4896_v39  ;;  %v5065_v40 = vld [vmem:[#allocation17 + $0x140] sm:$0xff] }
 0xd6f   : > { %8525 = vmatpush3.bf16.msra.mxu1 %v8524_v47  ;;  %v4901_v47 = vld [vmem:[#allocation17 + $0xe8] sm:$0xff] }
 0xd70   : > { %8526 = vmatprep.subr.bf16.mxu1 %v9175_v0  ;;  %v8580_v48 = vpack.c.bf16 %v4901_v47, %v4900_v46  ;;  %v5069_v47 = vld [vmem:[#allocation17 + $0x160] sm:$0xff] }
 0xd73   : > { %8528 = vmatpush3.bf16.msra.mxu1 %v8527_v50  ;;  %v4903_v50 = vld [vmem:[#allocation17 + $0xf8] sm:$0xff] }
 0xd74   : > { %8529 = vmatprep.subr.bf16.mxu1 %v9175_v0  ;;  %v8584_v51 = vpack.c.bf16 %v4903_v50, %v4902_v49  ;;  %v5071_v50 = vld [vmem:[#allocation17 + $0x170] sm:$0xff] }
 0xd77   : > { %8531 = vmatpush3.bf16.msra.mxu1 %v8530_v53  ;;  %v4870_v53 = vld [vmem:[#allocation17 + $0x8] sm:$0xff] }
 0xd78   : > { %8557 = vmatprep.subr.bf16.mxu1 %v8556_v31 }
 0xe0d   : > { %v4402_v54 = vpop.f32.mrb[32].mxu1 }
 0xe0e   : > { %v7387_v55 = vpop.f32.mrb[33].mxu1 }
 0xe15   : > { %v4472_v56 = vpop.f32.mrb[32].mxu0 }
 0xe16   : > { %v4473_v58 = vadd.f32 %v4472_v56, %v4402_v54  ;;  %v7422_v59 = vpop.f32.mrb[33].mxu0  ;;  %v8588_v54 = vpack.c.bf16 %v4870_v53, %v4869_v52 }
 0xe2d   : > { %v4560_v60 = vpop.f32.mrb[34].mxu1 }
 0xe2e   : > { %v4564_v24 = vadd.f32 %v4560_v60, %v4473_v58  ;;  %v7457_v61 = vpop.f32.mrb[35].mxu1 }
 0xe30   : > { %v4572_v3 = vadd.f32 %v5548_v23, %v4564_v24  ;;  %v5549_v24 = vld [vmem:[%s10234_s11] ss:$0 sm:$0xff] }
 0xe32   : > { %v4573_v5 = vmax.f32 %v4572_v3, 0.0 }
 0xe34   : > { %4574 = vst [vmem:[#allocation2 + $0x1] sm:$0xff] %v4573_v5  ;;  %7491 = vmatmul.mubr.f32.vlgmr.msra.gmra.mrb[34].mxu0 %v4573_v5  ;;  %v4871_v5 = vld [vmem:[#allocation17 + $0x10] sm:$0xff] }
 0xe35   : > { %8534 = vmatpush3.bf16.msra.mxu0 %v8533_v4  ;;  %7560 = vmatprep.mubr.msk.f32.mxu0 %vm9176_vm0, %v9177_v1  ;;  %v8545_v1 = vpack.c.bf16 %v4762_v15, %v4761_v14  ;;  %v8592_v57 = vpack.c.bf16 %v4872_v6, %v4871_v5  ;;  %v4877_v14 = vld [vmem:[#allocation17 + $0x40] sm:$0xff]  ;;  %v4878_v15 = vld [vmem:[#allocation17 + $0x48] sm:$0xff] }
 0xe36   : > { %8535 = vmatprep.subr.bf16.mxu0 %v9175_v0 }
 0xe39   : > { %8537 = vmatpush3.bf16.msra.mxu0 %v8536_v8 }
 0xe3a   : > { %8538 = vmatprep.subr.bf16.mxu0 %v9175_v0 }
 0xe3b   : > { %v4576_v12 = vld [vmem:[#allocation2] sm:$0xff] }
 0xe3c   : > { %7526 = vmatmul.mubr.f32.vlgmr.msra.gmra.mrb[36].mxu1 %v4576_v12  ;;  %v4751_v27 = vld [vmem:[#allocation2 + $0x2] sm:$0xff]  ;;  %v4876_v12 = vld [vmem:[#allocation17 + $0x38] sm:$0xff] }
 0xe3d   : > { %8540 = vmatpush3.bf16.msra.mxu0 %v8539_v9  ;;  %8559 = vmatpush3.bf16.msra.mxu1 %v8556_v31  ;;  %v4874_v9 = vld [vmem:[#allocation17 + $0x28] sm:$0xff]  ;;  %v5060_v31 = vld [vmem:[#allocation17 + $0x118] sm:$0xff] }
 0xe3e   : > { %8541 = vmatprep.subr.bf16.mxu0 %v9175_v0  ;;  %8561 = vmatprep.subr.bf16.mxu1 %v8560_v33  ;;  %v8624_v32 = vpack.c.bf16 %v5060_v31, %v5059_v30 }
 0xe41   : > { %8543 = vmatpush3.bf16.msra.mxu0 %v8542_v13  ;;  %8563 = vmatpush3.bf16.msra.mxu1 %v8560_v33  ;;  %v8600_v13 = vpack.c.bf16 %v4876_v12, %v4875_v11 }
 0xe42   : > { %8544 = vmatprep.subr.bf16.mxu0 %v9175_v0  ;;  %8565 = vmatprep.subr.bf16.mxu1 %v8564_v36 }
 0xe45   : > { %8546 = vmatpush3.bf16.msra.mxu0 %v8545_v1  ;;  %8567 = vmatpush3.bf16.msra.mxu1 %v8564_v36  ;;  %v8604_v1 = vpack.c.bf16 %v4878_v15, %v4877_v14 }
 0xe46   : > { %8547 = vmatprep.subr.bf16.mxu0 %v9175_v0 }
 0xe49   : > { %8549 = vmatpush3.bf16.msra.mxu0 %v8548_v19  ;;  %v8608_v19 = vpack.c.bf16 %v4880_v18, %v4879_v17 }
 0xe4a   : > { %8550 = vmatprep.subr.bf16.mxu0 %v9175_v0 }
 0xe4d   : > { %8552 = vmatpush3.bf16.msra.mxu0 %v8551_v22  ;;  %v8612_v22 = vpack.c.bf16 %v4882_v21, %v4881_v20 }
 0xe4e   : > { %8553 = vmatprep.subr.bf16.mxu0 %v9175_v0  ;;  %v8568_v0 = vpack.c.bf16 %v4895_v38, %v4894_v37  ;;  %v8628_v37 = vpack.c.bf16 %v5062_v35, %v5061_v34  ;;  %v5063_v38 = vld [vmem:[#allocation17 + $0x130] sm:$0xff] }
 0xe50   : > { %8569 = vmatprep.subr.bf16.mxu1 %v8568_v0 }
 0xe51   : > { %8555 = vmatpush3.bf16.msra.mxu0 %v8554_v26  ;;  %8571 = vmatpush3.bf16.msra.mxu1 %v8568_v0  ;;  %v8616_v26 = vpack.c.bf16 %v4884_v2, %v4883_v25  ;;  %v5064_v0 = vld [vmem:[#allocation17 + $0x138] sm:$0xff] }
 0xe52   : > { %8573 = vmatprep.subr.bf16.mxu1 %v8572_v41  ;;  %v8632_v39 = vpack.c.bf16 %v5064_v0, %v5063_v38 }
 0xe54   : > { %7561 = vmatmul.mubr.f32.vlgmr.msra.gmra.mrb[36].mxu0 %v4751_v27  ;;  %v5057_v27 = vld [vmem:[#allocation17 + $0x100] sm:$0xff] }
 0xe55   : > { %8575 = vmatpush3.bf16.msra.mxu1 %v8572_v41  ;;  %v8620_v29 = vpack.c.bf16 %v5058_v28, %v5057_v27  ;;  %v5066_v41 = vld [vmem:[#allocation17 + $0x148] sm:$0xff] }
 0xe56   : > { %8577 = vmatprep.subr.bf16.mxu1 %v8576_v45  ;;  %v8636_v42 = vpack.c.bf16 %v5066_v41, %v5065_v40 }
 0xe59   : > { %8579 = vmatpush3.bf16.msra.mxu1 %v8576_v45  ;;  %v5068_v45 = vld [vmem:[#allocation17 + $0x158] sm:$0xff] }
 0xe5a   : > { %8581 = vmatprep.subr.bf16.mxu1 %v8580_v48  ;;  %v8640_v46 = vpack.c.bf16 %v5068_v45, %v5067_v44 }
 0xe5d   : > { %8583 = vmatpush3.bf16.msra.mxu1 %v8580_v48  ;;  %v5070_v48 = vld [vmem:[#allocation17 + $0x168] sm:$0xff] }
 0xe5e   : > { %8585 = vmatprep.subr.bf16.mxu1 %v8584_v51  ;;  %v8644_v49 = vpack.c.bf16 %v5070_v48, %v5069_v47 }
 0xe61   : > { %8587 = vmatpush3.bf16.msra.mxu1 %v8584_v51  ;;  %v5072_v51 = vld [vmem:[#allocation17 + $0x178] sm:$0xff] }
 0xe62   : > { %8589 = vmatprep.subr.bf16.mxu1 %v8588_v54  ;;  %v8648_v52 = vpack.c.bf16 %v5072_v51, %v5071_v50 }
 0xf07   : > { %v4677_v55 = vpop.f32.mrb[34].mxu0 }
 0xf08   : > { %v7492_v56 = vpop.f32.mrb[35].mxu0 }
 0xf0f   : > { %v4747_v58 = vpop.f32.mrb[36].mxu1 }
 0xf10   : > { %v4748_v59 = vadd.f32 %v4747_v58, %v4677_v55  ;;  %v7527_v60 = vpop.f32.mrb[37].mxu1 }
 0xf27   : > { %v4835_v23 = vpop.f32.mrb[36].mxu0 }
 0xf28   : > { %v4839_v61 = vadd.f32 %v4835_v23, %v4748_v59  ;;  %v7562_v62 = vpop.f32.mrb[37].mxu0 }
 0xf2a   : > { %v4847_v63 = vadd.f32 %v5549_v24, %v4839_v61 }
 0xf2c   : > { %v4848_v3 = vadd.f32 %v4847_v63, %v10129_v43  ;;  %v8596_v43 = vpack.c.bf16 %v4874_v9, %v4873_v16 }
 0xf2e   : > { %v4849_v4 = vmax.f32 %v4848_v3, 0.0 }
 0xf30   : > { %4850 = vst [vmem:[#allocation2 + $0x1] ss:$9 sps:$4 sm:$0x31] %v4849_v4   ;;  %4851 = vst [vmem:[#allocation2 + $0x2] ss:$9 sps:$4 sm:$0x63] %v4849_v4  }
 0xf31   : > { %4853 = vst [vmem:[#allocation2 + $0x3] ss:$9 sps:$4 sm:$0xc6] %v4849_v4   ;;  %4855 = vst [vmem:[#allocation2 + $0x4] ss:$9 sps:$4 sm:$0x8c] %v4849_v4  }
 0xf32   : > { %4857 = vst [vmem:[#allocation2 + $0x5] sm:$0x18] %v4849_v4  }
 0xf38   : > { %v4867_v10 = vld [vmem:[#allocation2] sm:$0xff]  ;;  %v5055_v53 = vld [vmem:[#allocation2 + $0xa] sm:$0xff] }
 0xf39   : > { %v4885_v7 = vld [vmem:[#allocation2 + $0x1] sm:$0xff]  ;;  %v4886_v8 = vld [vmem:[#allocation2 + $0x9] sm:$0xff] }
 0xf3a   : > { %7595 = vmatprep.mubr.f32.mxu1 %v4885_v7  ;;  %v4868_v33 = vld [vmem:[#allocation2 + $0x8] sm:$0xff] }
 0xf3b   : > { %7596 = vmatmul.mubr.f32.vlgmr.msra.gmra.mrb[38].mxu1 %v4886_v8  ;;  %v5054_v36 = vld [vmem:[#allocation2 + $0x2] sm:$0xff] }
 0xf3c   : > { %8591 = vmatpush3.bf16.msra.mxu1 %v8588_v54  ;;  %7630 = vmatprep.mubr.f32.mxu1 %v4867_v10  ;;  %v5550_v54 = vld [vmem:[%s9333_s4] ss:$0 sm:$0xff] }
 0xf3d   : > { %8593 = vmatprep.subr.bf16.mxu1 %v8592_v57 }
 0xf40   : > { %8595 = vmatpush3.bf16.msra.mxu1 %v8592_v57 }
 0xf41   : > { %8597 = vmatprep.subr.bf16.mxu1 %v8596_v43 }
 0xf44   : > { %8599 = vmatpush3.bf16.msra.mxu1 %v8596_v43 }
 0xf45   : > { %8601 = vmatprep.subr.bf16.mxu1 %v8600_v13 }
 0xf48   : > { %8603 = vmatpush3.bf16.msra.mxu1 %v8600_v13 }
 0xf49   : > { %8605 = vmatprep.subr.bf16.mxu1 %v8604_v1 }
 0xf4c   : > { %8607 = vmatpush3.bf16.msra.mxu1 %v8604_v1 }
 0xf4d   : > { %8609 = vmatprep.subr.bf16.mxu1 %v8608_v19 }
 0xf50   : > { %8611 = vmatpush3.bf16.msra.mxu1 %v8608_v19 }
 0xf51   : > { %8613 = vmatprep.subr.bf16.mxu1 %v8612_v22 }
 0xf54   : > { %8615 = vmatpush3.bf16.msra.mxu1 %v8612_v22 }
 0xf55   : > { %8617 = vmatprep.subr.bf16.mxu1 %v8616_v26 }
 0xf58   : > { %8619 = vmatpush3.bf16.msra.mxu1 %v8616_v26 }
 0xf59   : > { %8621 = vmatprep.subr.bf16.mxu1 %v8620_v29 }
 0xf5b   : > { %7631 = vmatmul.mubr.f32.vlgmr.msra.gmra.mrb[38].mxu1 %v4868_v33 }
 0xf5c   : > { %8623 = vmatpush3.bf16.msra.mxu1 %v8620_v29  ;;  %7665 = vmatprep.mubr.f32.mxu1 %v5054_v36 }
 0xf5d   : > { %8625 = vmatprep.subr.bf16.mxu1 %v8624_v32 }
 0xf60   : > { %8627 = vmatpush3.bf16.msra.mxu1 %v8624_v32 }
 0xf61   : > { %8629 = vmatprep.subr.bf16.mxu1 %v8628_v37 }
 0xf64   : > { %8631 = vmatpush3.bf16.msra.mxu1 %v8628_v37 }
 0xf65   : > { %8633 = vmatprep.subr.bf16.mxu1 %v8632_v39 }
 0xf68   : > { %8635 = vmatpush3.bf16.msra.mxu1 %v8632_v39 }
 0xf69   : > { %8637 = vmatprep.subr.bf16.mxu1 %v8636_v42 }
 0xf6c   : > { %8639 = vmatpush3.bf16.msra.mxu1 %v8636_v42 }
 0xf6d   : > { %8641 = vmatprep.subr.bf16.mxu1 %v8640_v46 }
 0xf70   : > { %8643 = vmatpush3.bf16.msra.mxu1 %v8640_v46 }
 0xf71   : > { %8645 = vmatprep.subr.bf16.mxu1 %v8644_v49 }
 0xf74   : > { %8647 = vmatpush3.bf16.msra.mxu1 %v8644_v49 }
 0xf75   : > { %8649 = vmatprep.subr.bf16.mxu1 %v8648_v52 }
 0xf78   : > { %8651 = vmatpush3.bf16.msra.mxu1 %v8648_v52 }
 0xf7b   : > { %7666 = vmatmul.mubr.f32.vlgmr.msra.gmra.mrb[38].mxu1 %v5055_v53 }
0x104e   : > { %v7667_v55 = vpop.f32.mrb[38].mxu1 }
0x104f   : > { %v5158_v56 = vadd.f32 %v7667_v55, %v5550_v54  ;;  %v5139_v58 = vpop.f32.mrb[39].mxu1 }
0x1050   : > { %v5157_v59 = vadd.f32 %v5550_v54, %v5139_v58 }
0x1051   : > { %v5552_v60 = vmul.f32 -1.442695, %v5158_v56 }
0x1052   : > { %v5551_v23 = vmul.f32 -1.442695, %v5157_v59 }
0x1053   : > { %8812 = vpow2.f32 %v5552_v60 }
0x1054   : > { %8814 = vpow2.f32 %v5551_v23 }
0x105d   : > { %v8813_v24 = vpop.eup %8812 }
0x105e   : > { %v8815_v61 = vpop.eup %8814  ;;  %v5166_v62 = vadd.f32 1.0, %v8813_v24 }
0x105f   : > { %v5165_v63 = vadd.f32 1.0, %v8815_v61 }
0x1060   : > { %8816 = vrcp.f32 %v5166_v62 }
0x1061   : > { %8818 = vrcp.f32 %v5165_v63 }
0x106a   : > { %v8817_v3 = vpop.eup %8816 }
0x106b   : > { %v8819_v4 = vpop.eup %8818  ;;  %5172 = vst [vmem:[%s1124_s28 + $0x8] sm:$0xff] %v8817_v3 }
0x106c   : > { %5171 = vst [vmem:[%s1124_s28] sm:$0xff] %v8819_v4 }
0x106d PF: > { %s80_s22 = sadd.s32 1, %s9130_s22  }
0x106e   : > { %p77_p6 = scmp.ge.s32.totalorder %s80_s22, 4  }
0x1070   :  { %79 = sbr.rel (!%p77_p6) target bundleno = 58 (0x3a), region = 290 }
0x1077   :  { %5206 = vsyncpa [#allocation4], 1 }
0x1078   :  { %5208 = vsyncpa [#allocation4 + $0x1], 1 }
0x1079   :  { %5209 = vsyncpa [#allocation6], 1 }
0x107a   :  { %5210 = vsyncpa [#allocation9], 1 }
0x107b   :  { %5211 = vsyncpa [#allocation12], 1 }
0x107c   :  { %5212 = vsyncpa [#allocation15], 1 }
0x107d   :  { %5213 = vsyncpa [#allocation18], 1 }

</bundles_post_ra>
